<compile_context>
chip_gen: v7x
topology: tpu7x:2x2x1
jax: 0.10.0
libtpu: 0.0.40
codegen_flags: <defaults>
</compile_context>

<pallas_src>
import functools

import jax
import jax.numpy as jnp
from jax.experimental import pallas as pl
from jax.experimental.pallas import tpu as pltpu


def feel_intra_kernel(qe_ref, pe_ref, ne_ref, out_ref, *, delta, inv_l):
    """qe/pe/ne: (TB, L, E) f32 tiles; out: (1, TB) lane-dense f32."""
    # mean over the sequence axis (dim=1 in the PyTorch module)
    q_mean = jnp.sum(qe_ref[...], axis=1) * inv_l            # (TB, E)

    # Stream pos then neg so only one extra (TB, E) intermediate is live.
    p_mean = jnp.sum(pe_ref[...], axis=1) * inv_l             # (TB, E)
    a = jnp.sum(q_mean * p_mean, axis=-1)                     # (TB,)

    n_mean = jnp.sum(ne_ref[...], axis=1) * inv_l              # (TB, E)
    b = jnp.sum(q_mean * n_mean, axis=-1)                      # (TB,)

    res = jnp.maximum(delta - a + b, 0.0)                      # relu margin, (TB,)
    out_ref[...] = res.reshape(1, -1)                           # lane-dense store


def feel_intra_forward(query, pos, neg, emb_table, delta=1.0, batch_tile=128):
    """query/pos/neg: int32 index tensors of shape (B, L) (or reshapeable)."""
    B = query.shape[0]
    q_idx = query.reshape(B, -1).astype(jnp.int32)
    p_idx = pos.reshape(B, -1).astype(jnp.int32)
    n_idx = neg.reshape(B, -1).astype(jnp.int32)
    L = q_idx.shape[1]
    E = emb_table.shape[1]

    tb = batch_tile
    num_tiles = pl.cdiv(B, tb)
    b_pad = num_tiles * tb
    if b_pad != B:
        # Pad batch with index 0 (valid row); padded outputs are discarded.
        pad = jnp.zeros((b_pad - B, L), dtype=jnp.int32)
        q_idx = jnp.concatenate([q_idx, pad], axis=0)
        p_idx = jnp.concatenate([p_idx, pad], axis=0)
        n_idx = jnp.concatenate([n_idx, pad], axis=0)

    # Embedding lookup (gather) kept as JAX glue.
    qe = jnp.take(emb_table, q_idx, axis=0)   # (b_pad, L, E) f32
    pe = jnp.take(emb_table, p_idx, axis=0)
    ne = jnp.take(emb_table, n_idx, axis=0)

    kernel = functools.partial(
        feel_intra_kernel, delta=float(delta), inv_l=1.0 / float(L))

    out = pl.pallas_call(
        kernel,
        out_shape=jax.ShapeDtypeStruct((1, b_pad), jnp.float32),
        grid=(num_tiles,),
        in_specs=[
            pl.BlockSpec((tb, L, E), lambda i: (i, 0, 0)),
            pl.BlockSpec((tb, L, E), lambda i: (i, 0, 0)),
            pl.BlockSpec((tb, L, E), lambda i: (i, 0, 0)),
        ],
        out_specs=pl.BlockSpec((1, tb), lambda i: (0, i)),
        compiler_params=pltpu.CompilerParams(
            dimension_semantics=("parallel",),
            vmem_limit_bytes=32 * 1024 * 1024,
        ),
    )(qe, pe, ne)
    return out[0, :B]


def feel_intra_reference(query, pos, neg, emb_table, delta=1.0):
    """Pure-JAX reference mirroring the PyTorch forward."""
    def mean_emb(idx):
        x = jnp.take(emb_table, idx.reshape(idx.shape[0], -1), axis=0)
        return jnp.mean(x, axis=1)
    qm = mean_emb(query)
    pm = mean_emb(pos)
    nm = mean_emb(neg)
    a = jnp.sum(qm * pm, axis=1)
    b = jnp.sum(qm * nm, axis=1)
    return jax.nn.relu(delta - a + b)


if __name__ == "__main__":
    # Small synthetic shapes consistent with the module.
    B, L = 2, 8          # batch, sequence length of indices
    VOCAB = 64
    E = 32               # embedding_dim
    DELTA = 1.0

    key = jax.random.PRNGKey(0)
    k_emb, k_q, k_p, k_n = jax.random.split(key, 4)

    emb_table = jax.random.normal(k_emb, (VOCAB, E), dtype=jnp.float32) * 0.1
    query = jax.random.randint(k_q, (B, L), 0, VOCAB, dtype=jnp.int32)
    pos = jax.random.randint(k_p, (B, L), 0, VOCAB, dtype=jnp.int32)
    neg = jax.random.randint(k_n, (B, L), 0, VOCAB, dtype=jnp.int32)

    out = feel_intra_forward(query, pos, neg, emb_table, DELTA)
    out = jax.block_until_ready(out)

    ref = feel_intra_reference(query, pos, neg, emb_table, DELTA)
    assert out.shape == (B,)
    assert jnp.allclose(out, ref, atol=1e-4, rtol=1e-4), (out, ref)

    print("KERNEL_OK")
</pallas_src>

<mosaic_0001>
module attributes {stable_mosaic.version = 11 : i64} {
  func.func @feel_intra_kernel(%arg0: i32, %arg1: memref<128x8x32xf32, #tpu.memory_space<vmem>>, %arg2: memref<128x8x32xf32, #tpu.memory_space<vmem>>, %arg3: memref<128x8x32xf32, #tpu.memory_space<vmem>>, %arg4: memref<1x128xf32, #tpu.memory_space<vmem>>) attributes {dimension_semantics = [#tpu.dimension_semantics<parallel>], iteration_bounds = array<i64: 1>, scalar_prefetch = 0 : i64, scratch_operands = 0 : i64, tpu.core_type = #tpu.core_type<tc>, window_params = [{transform_indices = @transform_0, window_bounds = array<i64: 128, 8, 32>}, {transform_indices = @transform_1, window_bounds = array<i64: 128, 8, 32>}, {transform_indices = @transform_2, window_bounds = array<i64: 128, 8, 32>}, {transform_indices = @transform_3, window_bounds = array<i64: 1, 128>}]} {
    %c0 = arith.constant 0 : index
    %c0_0 = arith.constant 0 : index
    %c0_1 = arith.constant 0 : index
    %0 = vector.load %arg1[%c0, %c0_0, %c0_1] : memref<128x8x32xf32, #tpu.memory_space<vmem>>, vector<128x8x32xf32>
    %cst = arith.constant dense<0.000000e+00> : vector<128x32xf32>
    %1 = vector.multi_reduction <add>, %0, %cst [1] : vector<128x8x32xf32> to vector<128x32xf32>
    %cst_2 = arith.constant 1.250000e-01 : f32
    %2 = vector.broadcast %cst_2 : f32 to vector<128x32xf32>
    %3 = arith.mulf %1, %2 : vector<128x32xf32>
    %c0_3 = arith.constant 0 : index
    %c0_4 = arith.constant 0 : index
    %c0_5 = arith.constant 0 : index
    %4 = vector.load %arg2[%c0_3, %c0_4, %c0_5] : memref<128x8x32xf32, #tpu.memory_space<vmem>>, vector<128x8x32xf32>
    %cst_6 = arith.constant dense<0.000000e+00> : vector<128x32xf32>
    %5 = vector.multi_reduction <add>, %4, %cst_6 [1] : vector<128x8x32xf32> to vector<128x32xf32>
    %cst_7 = arith.constant 1.250000e-01 : f32
    %6 = vector.broadcast %cst_7 : f32 to vector<128x32xf32>
    %7 = arith.mulf %5, %6 : vector<128x32xf32>
    %8 = arith.mulf %3, %7 : vector<128x32xf32>
    %cst_8 = arith.constant dense<0.000000e+00> : vector<128xf32>
    %9 = vector.multi_reduction <add>, %8, %cst_8 [1] : vector<128x32xf32> to vector<128xf32>
    %c0_9 = arith.constant 0 : index
    %c0_10 = arith.constant 0 : index
    %c0_11 = arith.constant 0 : index
    %10 = vector.load %arg3[%c0_9, %c0_10, %c0_11] : memref<128x8x32xf32, #tpu.memory_space<vmem>>, vector<128x8x32xf32>
    %cst_12 = arith.constant dense<0.000000e+00> : vector<128x32xf32>
    %11 = vector.multi_reduction <add>, %10, %cst_12 [1] : vector<128x8x32xf32> to vector<128x32xf32>
    %cst_13 = arith.constant 1.250000e-01 : f32
    %12 = vector.broadcast %cst_13 : f32 to vector<128x32xf32>
    %13 = arith.mulf %11, %12 : vector<128x32xf32>
    %14 = arith.mulf %3, %13 : vector<128x32xf32>
    %cst_14 = arith.constant dense<0.000000e+00> : vector<128xf32>
    %15 = vector.multi_reduction <add>, %14, %cst_14 [1] : vector<128x32xf32> to vector<128xf32>
    %cst_15 = arith.constant 1.000000e+00 : f32
    %16 = vector.broadcast %cst_15 : f32 to vector<128xf32>
    %17 = arith.subf %16, %9 : vector<128xf32>
    %18 = arith.addf %17, %15 : vector<128xf32>
    %cst_16 = arith.constant 0.000000e+00 : f32
    %19 = vector.broadcast %cst_16 : f32 to vector<128xf32>
    %20 = arith.maximumf %18, %19 : vector<128xf32>
    %21 = vector.shape_cast %20 : vector<128xf32> to vector<1x128xf32>
    %c0_17 = arith.constant 0 : index
    %c0_18 = arith.constant 0 : index
    %22 = vector.load %arg4[%c0_17, %c0_18] : memref<1x128xf32, #tpu.memory_space<vmem>>, vector<1x128xf32>
    tpu.vector_store %arg4[%c0_17, %c0_18], %21 {strides = array<i32>} : memref<1x128xf32, #tpu.memory_space<vmem>>, vector<1x128xf32>,
    return
  }
  func.func @transform_0(%arg0: i32) -> (i32, i32, i32) {
    %c0_i32 = arith.constant 0 : i32
    %c0_i32_0 = arith.constant 0 : i32
    %c0_i32_1 = arith.constant 0 : i32
    return %arg0, %c0_i32, %c0_i32_0 : i32, i32, i32
  }
  func.func @transform_1(%arg0: i32) -> (i32, i32, i32) {
    %c0_i32 = arith.constant 0 : i32
    %c0_i32_0 = arith.constant 0 : i32
    %c0_i32_1 = arith.constant 0 : i32
    return %arg0, %c0_i32, %c0_i32_0 : i32, i32, i32
  }
  func.func @transform_2(%arg0: i32) -> (i32, i32, i32) {
    %c0_i32 = arith.constant 0 : i32
    %c0_i32_0 = arith.constant 0 : i32
    %c0_i32_1 = arith.constant 0 : i32
    return %arg0, %c0_i32, %c0_i32_0 : i32, i32, i32
  }
  func.func @transform_3(%arg0: i32) -> (i32, i32) {
    %c0_i32 = arith.constant 0 : i32
    %c0_i32_0 = arith.constant 0 : i32
    return %c0_i32, %arg0 : i32, i32
  }
}

</mosaic_0001>

<bundles_post_ra>
// kernel: tpu_custom_call.1
= control target key start
LH: loop header
LB: loop body
LE: loop exit
PB: predicated region body
PF: predicated region fallthrough
CT: control target
= control target key end

     0   :  { %vm143_vm0 = vcmask 261120   ;;  %vm2576_vm1 = vcmask 1041409   ;;  %vm2578_vm2 = vcmask 1042434   ;;  %s6969_s0 = inlined_call_operand.vmem [shape: f32[128,8,32], index: 0, kind: input, shape index: {}]   ;;  %s6970_s1 = inlined_call_operand.vmem [shape: f32[128,8,32], index: 1, kind: input, shape index: {}]   ;;  %s6971_s2 = inlined_call_operand.vmem [shape: f32[128,8,32], index: 2, kind: input, shape index: {}]   ;;  %s6972_s3 = inlined_call_operand.hbm [shape: f32[1,128], index: 3, kind: output, shape index: {}]  }
   0x1   :  { %v31_v0 = vld [vmem:[%s6969_s0 + $0x80] sm:$0xff]  ;;  %v32_v1 = vld [vmem:[%s6969_s0 + $0x88] sm:$0xff]  ;;  %v33_v2 = vld [vmem:[%s6969_s0 + $0x90] sm:$0xff] }
   0x2   :  { %v34_v3 = vld [vmem:[%s6969_s0 + $0x98] sm:$0xff]  ;;  %v35_v4 = vld [vmem:[%s6969_s0 + $0xa0] sm:$0xff]  ;;  %v36_v5 = vld [vmem:[%s6969_s0 + $0xa8] sm:$0xff]  ;;  %v256_v6 = vsel %vm143_vm0, %v31_v0, 0.0  ;;  %v263_v7 = vsel %vm143_vm0, %v32_v1, 0.0  ;;  %v270_v8 = vsel %vm143_vm0, %v33_v2, 0.0 }
   0x3   :  { %v37_v9 = vld [vmem:[%s6969_s0 + $0xb0] sm:$0xff]  ;;  %v38_v10 = vld [vmem:[%s6969_s0 + $0xb8] sm:$0xff]  ;;  %v257_v11 = vrot.slane %v256_v6, 4  ;;  %v264_v12 = vrot.slane %v263_v7, 4  ;;  %v271_v13 = vrot.slane %v270_v8, 4  ;;  %v277_v14 = vsel %vm143_vm0, %v34_v3, 0.0 }
   0x4   :  { %v278_v15 = vrot.slane %v277_v14, 4  ;;  %v284_v16 = vsel %vm143_vm0, %v35_v4, 0.0  ;;  %v291_v17 = vsel %vm143_vm0, %v36_v5, 0.0  ;;  %v298_v18 = vsel %vm143_vm0, %v37_v9, 0.0  ;;  %v1184_v59 = vld [vmem:[%s6970_s1 + $0x80] sm:$0xff]  ;;  %v1185_v60 = vld [vmem:[%s6970_s1 + $0x88] sm:$0xff] }
   0x5   :  { %v258_v19 = vadd.f32 %v257_v11, %v256_v6  ;;  %v265_v20 = vadd.f32 %v264_v12, %v263_v7  ;;  %v272_v21 = vadd.f32 %v271_v13, %v270_v8  ;;  %v285_v22 = vrot.slane %v284_v16, 4  ;;  %v1186_v61 = vld [vmem:[%s6970_s1 + $0x90] sm:$0xff]  ;;  %v1187_v6 = vld [vmem:[%s6970_s1 + $0x98] sm:$0xff]  ;;  %v1188_v7 = vld [vmem:[%s6970_s1 + $0xa0] sm:$0xff] }
   0x6   :  { %v279_v23 = vadd.f32 %v278_v15, %v277_v14  ;;  %v292_v24 = vrot.slane %v291_v17, 4  ;;  %v299_v25 = vrot.slane %v298_v18, 4  ;;  %v305_v26 = vsel %vm143_vm0, %v38_v10, 0.0  ;;  %v1189_v15 = vld [vmem:[%s6970_s1 + $0xa8] sm:$0xff] }
   0x7   :  { %v259_v27 = vrot.slane %v258_v19, 2  ;;  %v266_v28 = vrot.slane %v265_v20, 2  ;;  %v273_v29 = vrot.slane %v272_v21, 2  ;;  %v286_v30 = vadd.f32 %v285_v22, %v284_v16  ;;  %v1190_v16 = vld [vmem:[%s6970_s1 + $0xb0] sm:$0xff] }
   0x8   :  { %v280_v31 = vrot.slane %v279_v23, 2  ;;  %v293_v32 = vadd.f32 %v292_v24, %v291_v17  ;;  %v300_v33 = vadd.f32 %v299_v25, %v298_v18  ;;  %v306_v34 = vrot.slane %v305_v26, 4 }
   0x9   :  { %v260_v35 = vadd.f32 %v259_v27, %v258_v19  ;;  %v267_v36 = vadd.f32 %v266_v28, %v265_v20  ;;  %v274_v37 = vadd.f32 %v273_v29, %v272_v21  ;;  %v287_v38 = vrot.slane %v286_v30, 2 }
   0xa   :  { %v281_v39 = vadd.f32 %v280_v31, %v279_v23  ;;  %v294_v40 = vrot.slane %v293_v32, 2  ;;  %v301_v41 = vrot.slane %v300_v33, 2  ;;  %v307_v42 = vadd.f32 %v306_v34, %v305_v26  ;;  %v1191_v23 = vld [vmem:[%s6970_s1 + $0xb8] sm:$0xff] }
   0xb   :  { %v261_v43 = vrot.slane %v260_v35, 1  ;;  %v268_v44 = vrot.slane %v267_v36, 1  ;;  %v275_v45 = vrot.slane %v274_v37, 1  ;;  %v288_v46 = vadd.f32 %v287_v38, %v286_v30 }
   0xc   :  { %v282_v47 = vrot.slane %v281_v39, 1  ;;  %v295_v48 = vadd.f32 %v294_v40, %v293_v32  ;;  %v302_v49 = vadd.f32 %v301_v41, %v300_v33  ;;  %v308_v50 = vrot.slane %v307_v42, 2 }
   0xd   :  { %v262_v51 = vadd.f32 %v261_v43, %v260_v35  ;;  %v269_v52 = vadd.f32 %v268_v44, %v267_v36  ;;  %v276_v53 = vadd.f32 %v275_v45, %v274_v37  ;;  %v289_v54 = vrot.slane %v288_v46, 1 }
   0xe   :  { %v283_v55 = vadd.f32 %v282_v47, %v281_v39  ;;  %v296_v56 = vrot.slane %v295_v48, 1  ;;  %v303_v57 = vrot.slane %v302_v49, 1  ;;  %v309_v58 = vadd.f32 %v308_v50, %v307_v42 }
   0xf   :  { %v290_v62 = vadd.f32 %v289_v54, %v288_v46  ;;  %v4621_v63 = vmul.f32 0.125, %v262_v51  ;;  %v4623_v0 = vmul.f32 0.125, %v269_v52  ;;  %v4625_v1 = vmul.f32 0.125, %v276_v53 }
  0x10   :  { %v297_v2 = vadd.f32 %v296_v56, %v295_v48  ;;  %v304_v3 = vadd.f32 %v303_v57, %v302_v49  ;;  %v310_v4 = vrot.slane %v309_v58, 1  ;;  %v4627_v5 = vmul.f32 0.125, %v283_v55 }
  0x11   :  { %v4635_v8 = vmul.f32 0.125, %v290_v62  ;;  %v1408_v9 = vsel %vm143_vm0, %v1184_v59, 0.0  ;;  %v1415_v10 = vsel %vm143_vm0, %v1185_v60, 0.0  ;;  %v1422_v11 = vsel %vm143_vm0, %v1186_v61, 0.0 }
  0x12   :  { %v311_v12 = vadd.f32 %v310_v4, %v309_v58  ;;  %v4640_v13 = vmul.f32 0.125, %v297_v2  ;;  %v4642_v14 = vmul.f32 0.125, %v304_v3  ;;  %v1409_v17 = vrot.slane %v1408_v9, 4 }
  0x13   :  { %v1416_v18 = vrot.slane %v1415_v10, 4  ;;  %v1423_v19 = vrot.slane %v1422_v11, 4  ;;  %v1429_v20 = vsel %vm143_vm0, %v1187_v6, 0.0  ;;  %v1436_v21 = vsel %vm143_vm0, %v1188_v7, 0.0 }
  0x14   :  { %v4652_v22 = vmul.f32 0.125, %v311_v12  ;;  %v1410_v24 = vadd.f32 %v1409_v17, %v1408_v9  ;;  %v1430_v25 = vrot.slane %v1429_v20, 4  ;;  %v1437_v26 = vrot.slane %v1436_v21, 4 }
  0x15   :  { %v1417_v27 = vadd.f32 %v1416_v18, %v1415_v10  ;;  %v1424_v28 = vadd.f32 %v1423_v19, %v1422_v11  ;;  %v1443_v29 = vsel %vm143_vm0, %v1189_v15, 0.0  ;;  %v1450_v30 = vsel %vm143_vm0, %v1190_v16, 0.0 }
  0x16   :  { %v1411_v31 = vrot.slane %v1410_v24, 2  ;;  %v1431_v32 = vadd.f32 %v1430_v25, %v1429_v20  ;;  %v1438_v33 = vadd.f32 %v1437_v26, %v1436_v21  ;;  %v1444_v34 = vrot.slane %v1443_v29, 4 }
  0x17   :  { %v1418_v35 = vrot.slane %v1417_v27, 2  ;;  %v1425_v36 = vrot.slane %v1424_v28, 2  ;;  %v1451_v37 = vrot.slane %v1450_v30, 4  ;;  %v1457_v38 = vsel %vm143_vm0, %v1191_v23, 0.0 }
  0x18   :  { %v1412_v39 = vadd.f32 %v1411_v31, %v1410_v24  ;;  %v1432_v40 = vrot.slane %v1431_v32, 2  ;;  %v1439_v41 = vrot.slane %v1438_v33, 2  ;;  %v1445_v42 = vadd.f32 %v1444_v34, %v1443_v29 }
  0x19   :  { %v1419_v43 = vadd.f32 %v1418_v35, %v1417_v27  ;;  %v1426_v44 = vadd.f32 %v1425_v36, %v1424_v28  ;;  %v1452_v45 = vadd.f32 %v1451_v37, %v1450_v30  ;;  %v1458_v46 = vrot.slane %v1457_v38, 4 }
  0x1a   :  { %v1413_v47 = vrot.slane %v1412_v39, 1  ;;  %v1433_v48 = vadd.f32 %v1432_v40, %v1431_v32  ;;  %v1440_v49 = vadd.f32 %v1439_v41, %v1438_v33  ;;  %v1446_v50 = vrot.slane %v1445_v42, 2 }
  0x1b   :  { %v1420_v51 = vrot.slane %v1419_v43, 1  ;;  %v1427_v52 = vrot.slane %v1426_v44, 1  ;;  %v1453_v53 = vrot.slane %v1452_v45, 2  ;;  %v1459_v54 = vadd.f32 %v1458_v46, %v1457_v38 }
  0x1c   :  { %v1414_v55 = vadd.f32 %v1413_v47, %v1412_v39  ;;  %v1434_v56 = vrot.slane %v1433_v48, 1  ;;  %v1441_v57 = vrot.slane %v1440_v49, 1  ;;  %v1447_v58 = vadd.f32 %v1446_v50, %v1445_v42 }
  0x1d   :  { %v1421_v59 = vadd.f32 %v1420_v51, %v1419_v43  ;;  %v1428_v60 = vadd.f32 %v1427_v52, %v1426_v44  ;;  %v1454_v61 = vadd.f32 %v1453_v53, %v1452_v45  ;;  %v1460_v62 = vrot.slane %v1459_v54, 2 }
  0x1e   :  { %8 = vsyncpa [#allocation3], 0  ;;  %v1435_v2 = vadd.f32 %v1434_v56, %v1433_v48  ;;  %v1442_v3 = vadd.f32 %v1441_v57, %v1440_v49  ;;  %v1448_v4 = vrot.slane %v1447_v58, 1  ;;  %v2208_v6 = vmul.f32 0.125, %v1414_v55  ;;  %v15_v26 = vld [vmem:[%s6969_s0] sm:$0xff]  ;;  %v16_v29 = vld [vmem:[%s6969_s0 + $0x8] sm:$0xff] }
  0x1f   :  { %v1455_v7 = vrot.slane %v1454_v61, 1  ;;  %v1461_v9 = vadd.f32 %v1460_v62, %v1459_v54  ;;  %v2209_v10 = vmul.f32 0.125, %v1421_v59  ;;  %v2210_v11 = vmul.f32 0.125, %v1428_v60  ;;  %v17_v30 = vld [vmem:[%s6969_s0 + $0x10] sm:$0xff]  ;;  %v18_v36 = vld [vmem:[%s6969_s0 + $0x18] sm:$0xff]  ;;  %v19_v37 = vld [vmem:[%s6969_s0 + $0x20] sm:$0xff] }
  0x20   :  { %v1449_v12 = vadd.f32 %v1448_v4, %v1447_v58  ;;  %v2211_v15 = vmul.f32 0.125, %v1435_v2  ;;  %v2212_v16 = vmul.f32 0.125, %v1442_v3  ;;  %v2336_v17 = vmul.f32 %v2208_v6, %v4621_v63  ;;  %v20_v45 = vld [vmem:[%s6969_s0 + $0x28] sm:$0xff]  ;;  %v21_v53 = vld [vmem:[%s6969_s0 + $0x30] sm:$0xff]  ;;  %v22_v62 = vld [vmem:[%s6969_s0 + $0x38] sm:$0xff] }
  0x21   :  { %v1456_v18 = vadd.f32 %v1455_v7, %v1454_v61  ;;  %v1462_v19 = vrot.slane %v1461_v9, 1  ;;  %v2337_v20 = vmul.f32 %v2209_v10, %v4623_v0  ;;  %v2338_v21 = vmul.f32 %v2210_v11, %v4625_v1 }
  0x22   :  { %v2213_v23 = vmul.f32 0.125, %v1449_v12  ;;  %v2339_v24 = vmul.f32 %v2211_v15, %v4627_v5  ;;  %v2340_v25 = vmul.f32 %v2212_v16, %v4635_v8  ;;  %vm2580_vm3 = vcmask 1043459  }
  0x23   :  { %v1463_v27 = vadd.f32 %v1462_v19, %v1461_v9  ;;  %v2214_v28 = vmul.f32 0.125, %v1456_v18  ;;  %vm2582_vm4 = vcmask 1044484   ;;  %vm2584_vm5 = vcmask 1045509  }
  0x24   :  { %v2341_v31 = vmul.f32 %v2213_v23, %v4640_v13  ;;  %vm2586_vm6 = vcmask 1046534   ;;  %vm2588_vm7 = vcmask 1047559   ;;  %v2597_v32 = vsel %vm2576_vm1, %v2337_v20, %v2336_v17 }
  0x25   :  { %v2215_v33 = vmul.f32 0.125, %v1463_v27  ;;  %v2342_v34 = vmul.f32 %v2214_v28, %v4642_v14  ;;  %v2598_v35 = vsel %vm2578_vm2, %v2338_v21, %v2597_v32  ;;  %v144_v38 = vsel %vm143_vm0, %v15_v26, 0.0 }
  0x26   :  { %v2599_v39 = vsel %vm2580_vm3, %v2339_v24, %v2598_v35  ;;  %v145_v40 = vrot.slane %v144_v38, 4  ;;  %v151_v41 = vsel %vm143_vm0, %v16_v29, 0.0  ;;  %v158_v42 = vsel %vm143_vm0, %v17_v30, 0.0 }
  0x27   :  { %v2343_v43 = vmul.f32 %v2215_v33, %v4652_v22  ;;  %v2600_v44 = vsel %vm2582_vm4, %v2340_v25, %v2599_v39  ;;  %v152_v46 = vrot.slane %v151_v41, 4  ;;  %v159_v47 = vrot.slane %v158_v42, 4  ;;  %v1169_v39 = vld [vmem:[%s6970_s1 + $0x8] sm:$0xff] }
  0x28   :  { %v2601_v48 = vsel %vm2584_vm5, %v2341_v31, %v2600_v44  ;;  %v146_v49 = vadd.f32 %v145_v40, %v144_v38  ;;  %v165_v50 = vsel %vm143_vm0, %v18_v36, 0.0  ;;  %v172_v51 = vsel %vm143_vm0, %v19_v37, 0.0 }
  0x29   :  { %v2602_v52 = vsel %vm2586_vm6, %v2342_v34, %v2601_v48  ;;  %v153_v54 = vadd.f32 %v152_v46, %v151_v41  ;;  %v160_v55 = vadd.f32 %v159_v47, %v158_v42  ;;  %v166_v56 = vrot.slane %v165_v50, 4  ;;  %v1168_v34 = vld [vmem:[%s6970_s1] sm:$0xff]  ;;  %v1170_v47 = vld [vmem:[%s6970_s1 + $0x10] sm:$0xff]  ;;  %v1171_v48 = vld [vmem:[%s6970_s1 + $0x18] sm:$0xff] }
  0x2a   :  { %v2603_v57 = vsel %vm2588_vm7, %v2343_v43, %v2602_v52  ;;  %v147_v58 = vrot.slane %v146_v49, 2  ;;  %v173_v59 = vrot.slane %v172_v51, 4  ;;  %v179_v60 = vsel %vm143_vm0, %v20_v45, 0.0 }
  0x2b   :  { %v2717_v61 = vsel %vm143_vm0, %v2603_v57, 0.0  ;;  %v154_v2 = vrot.slane %v153_v54, 2  ;;  %v161_v3 = vrot.slane %v160_v55, 2  ;;  %v167_v4 = vadd.f32 %v166_v56, %v165_v50  ;;  %v1172_v57 = vld [vmem:[%s6970_s1 + $0x20] sm:$0xff] }
  0x2c   :  { %2718 = vadd.xlane.f32.xlu1 %v2717_v61  ;;  %v148_v6 = vadd.f32 %v147_v58, %v146_v49  ;;  %v174_v7 = vadd.f32 %v173_v59, %v172_v51  ;;  %v180_v9 = vrot.slane %v179_v60, 4  ;;  %v186_v10 = vsel %vm143_vm0, %v21_v53, 0.0 }
  0x2d   :  { %v155_v11 = vadd.f32 %v154_v2, %v153_v54  ;;  %v162_v12 = vadd.f32 %v161_v3, %v160_v55  ;;  %v168_v15 = vrot.slane %v167_v4, 2  ;;  %v187_v16 = vrot.slane %v186_v10, 4 }
  0x2e   :  { %v149_v17 = vrot.slane %v148_v6, 1  ;;  %v175_v18 = vrot.slane %v174_v7, 2  ;;  %v181_v19 = vadd.f32 %v180_v9, %v179_v60  ;;  %v193_v20 = vsel %vm143_vm0, %v22_v62, 0.0 }
  0x2f   :  { %v156_v21 = vrot.slane %v155_v11, 1  ;;  %v163_v23 = vrot.slane %v162_v12, 1  ;;  %v169_v24 = vadd.f32 %v168_v15, %v167_v4  ;;  %v188_v25 = vadd.f32 %v187_v16, %v186_v10  ;;  %v1173_v4 = vld [vmem:[%s6970_s1 + $0x28] sm:$0xff] }
  0x30   :  { %v150_v26 = vadd.f32 %v149_v17, %v148_v6  ;;  %v176_v27 = vadd.f32 %v175_v18, %v174_v7  ;;  %v182_v28 = vrot.slane %v181_v19, 2  ;;  %v194_v29 = vrot.slane %v193_v20, 4  ;;  %v1174_v6 = vld [vmem:[%s6970_s1 + $0x30] sm:$0xff] }
  0x31   :  { %v157_v30 = vadd.f32 %v156_v21, %v155_v11  ;;  %v164_v31 = vadd.f32 %v163_v23, %v162_v12  ;;  %v170_v32 = vrot.slane %v169_v24, 1  ;;  %v189_v33 = vrot.slane %v188_v25, 2 }
  0x32   :  { %v177_v35 = vrot.slane %v176_v27, 1  ;;  %v183_v36 = vadd.f32 %v182_v28, %v181_v19  ;;  %v195_v37 = vadd.f32 %v194_v29, %v193_v20  ;;  %v4711_v38 = vmul.f32 0.125, %v150_v26  ;;  %v1175_v20 = vld [vmem:[%s6970_s1 + $0x38] sm:$0xff] }
  0x33   :  { %v171_v40 = vadd.f32 %v170_v32, %v169_v24  ;;  %v190_v41 = vadd.f32 %v189_v33, %v188_v25  ;;  %v4716_v42 = vmul.f32 0.125, %v157_v30  ;;  %v4718_v43 = vmul.f32 0.125, %v164_v31 }
  0x34   :  { %v178_v44 = vadd.f32 %v177_v35, %v176_v27  ;;  %v184_v45 = vrot.slane %v183_v36, 1  ;;  %v196_v46 = vrot.slane %v195_v37, 2  ;;  %v1296_v49 = vsel %vm143_vm0, %v1168_v34, 0.0 }
  0x35   :  { %v191_v50 = vrot.slane %v190_v41, 1  ;;  %v4727_v51 = vmul.f32 0.125, %v171_v40  ;;  %v1297_v52 = vrot.slane %v1296_v49, 4  ;;  %v1303_v53 = vsel %vm143_vm0, %v1169_v39, 0.0 }
  0x36   :  { %v185_v54 = vadd.f32 %v184_v45, %v183_v36  ;;  %v197_v55 = vadd.f32 %v196_v46, %v195_v37  ;;  %v4730_v56 = vmul.f32 0.125, %v178_v44  ;;  %v1304_v58 = vrot.slane %v1303_v53, 4 }
  0x37   :  { %v192_v59 = vadd.f32 %v191_v50, %v190_v41  ;;  %v1298_v60 = vadd.f32 %v1297_v52, %v1296_v49  ;;  %v1310_v61 = vsel %vm143_vm0, %v1170_v47, 0.0  ;;  %v1317_v62 = vsel %vm143_vm0, %v1171_v48, 0.0 }
  0x38   :  { %v198_v2 = vrot.slane %v197_v55, 1  ;;  %v4737_v3 = vmul.f32 0.125, %v185_v54  ;;  %v1305_v7 = vadd.f32 %v1304_v58, %v1303_v53  ;;  %v1311_v9 = vrot.slane %v1310_v61, 4 }
  0x39   :  { %v4745_v10 = vmul.f32 0.125, %v192_v59  ;;  %v1299_v11 = vrot.slane %v1298_v60, 2  ;;  %v1318_v12 = vrot.slane %v1317_v62, 4  ;;  %v1324_v15 = vsel %vm143_vm0, %v1172_v57, 0.0  ;;  %v39_v59 = vld [vmem:[%s6969_s0 + $0xc0] sm:$0xff] }
  0x3a   :  { %v199_v16 = vadd.f32 %v198_v2, %v197_v55  ;;  %v1306_v17 = vrot.slane %v1305_v7, 2  ;;  %v1312_v18 = vadd.f32 %v1311_v9, %v1310_v61  ;;  %v1325_v19 = vrot.slane %v1324_v15, 4 }
  0x3b   :  { %v1300_v21 = vadd.f32 %v1299_v11, %v1298_v60  ;;  %v1319_v23 = vadd.f32 %v1318_v12, %v1317_v62  ;;  %v1331_v24 = vsel %vm143_vm0, %v1173_v4, 0.0  ;;  %v1338_v25 = vsel %vm143_vm0, %v1174_v6, 0.0 }
  0x3c   :  { %v4753_v26 = vmul.f32 0.125, %v199_v16  ;;  %v1307_v27 = vadd.f32 %v1306_v17, %v1305_v7  ;;  %v1313_v28 = vrot.slane %v1312_v18, 2  ;;  %v1326_v29 = vadd.f32 %v1325_v19, %v1324_v15  ;;  %v40_v16 = vld [vmem:[%s6969_s0 + $0xc8] sm:$0xff] }
  0x3d   :  { %v1301_v30 = vrot.slane %v1300_v21, 1  ;;  %v1320_v31 = vrot.slane %v1319_v23, 2  ;;  %v1332_v32 = vrot.slane %v1331_v24, 4  ;;  %v1339_v33 = vrot.slane %v1338_v25, 4 }
  0x3e   :  { %v1308_v34 = vrot.slane %v1307_v27, 1  ;;  %v1314_v35 = vadd.f32 %v1313_v28, %v1312_v18  ;;  %v1327_v36 = vrot.slane %v1326_v29, 2  ;;  %v1345_v37 = vsel %vm143_vm0, %v1175_v20, 0.0 }
  0x3f   :  { %v1302_v39 = vadd.f32 %v1301_v30, %v1300_v21  ;;  %v1321_v40 = vadd.f32 %v1320_v31, %v1319_v23  ;;  %v1333_v41 = vadd.f32 %v1332_v32, %v1331_v24  ;;  %v1340_v44 = vadd.f32 %v1339_v33, %v1338_v25 }
  0x40   :  { %v1309_v45 = vadd.f32 %v1308_v34, %v1307_v27  ;;  %v1315_v46 = vrot.slane %v1314_v35, 1  ;;  %v1328_v47 = vadd.f32 %v1327_v36, %v1326_v29  ;;  %v1346_v48 = vrot.slane %v1345_v37, 4  ;;  %v41_v27 = vld [vmem:[%s6969_s0 + $0xd0] sm:$0xff]  ;;  %v42_v36 = vld [vmem:[%s6969_s0 + $0xd8] sm:$0xff] }
  0x41   :  { %v1322_v49 = vrot.slane %v1321_v40, 1  ;;  %v1334_v50 = vrot.slane %v1333_v41, 2  ;;  %v1341_v52 = vrot.slane %v1340_v44, 2  ;;  %v2192_v53 = vmul.f32 0.125, %v1302_v39 }
  0x42   :  { %v1316_v54 = vadd.f32 %v1315_v46, %v1314_v35  ;;  %v1329_v55 = vrot.slane %v1328_v47, 1  ;;  %v1347_v57 = vadd.f32 %v1346_v48, %v1345_v37  ;;  %v2193_v58 = vmul.f32 0.125, %v1309_v45  ;;  %v43_v37 = vld [vmem:[%s6969_s0 + $0xe0] sm:$0xff] }
  0x43   :  { %v1323_v60 = vadd.f32 %v1322_v49, %v1321_v40  ;;  %v1335_v61 = vadd.f32 %v1334_v50, %v1333_v41  ;;  %v1342_v62 = vadd.f32 %v1341_v52, %v1340_v44  ;;  %v2320_v2 = vmul.f32 %v2192_v53, %v4711_v38  ;;  %v44_v52 = vld [vmem:[%s6969_s0 + $0xe8] sm:$0xff] }
  0x44   :  { %v1330_v4 = vadd.f32 %v1329_v55, %v1328_v47  ;;  %v1348_v6 = vrot.slane %v1347_v57, 2  ;;  %v2194_v7 = vmul.f32 0.125, %v1316_v54  ;;  %v2321_v9 = vmul.f32 %v2193_v58, %v4716_v42 }
  0x45   :  { %v1336_v11 = vrot.slane %v1335_v61, 1  ;;  %v1343_v12 = vrot.slane %v1342_v62, 1  ;;  %v2195_v15 = vmul.f32 0.125, %v1323_v60  ;;  %v312_v17 = vsel %vm143_vm0, %v39_v59, 0.0 }
  0x46   :  { %v1349_v18 = vadd.f32 %v1348_v6, %v1347_v57  ;;  %v2196_v19 = vmul.f32 0.125, %v1330_v4  ;;  %v2322_v20 = vmul.f32 %v2194_v7, %v4718_v43  ;;  %v2577_v21 = vsel %vm2576_vm1, %v2321_v9, %v2320_v2  ;;  %v45_v6 = vld [vmem:[%s6969_s0 + $0xf0] sm:$0xff] }
  0x47   :  { %v1337_v23 = vadd.f32 %v1336_v11, %v1335_v61  ;;  %v1344_v24 = vadd.f32 %v1343_v12, %v1342_v62  ;;  %v2323_v25 = vmul.f32 %v2195_v15, %v4727_v51  ;;  %v313_v28 = vrot.slane %v312_v17, 4 }
  0x48   :  { %v1350_v29 = vrot.slane %v1349_v18, 1  ;;  %v2324_v30 = vmul.f32 %v2196_v19, %v4730_v56  ;;  %v2579_v31 = vsel %vm2578_vm2, %v2322_v20, %v2577_v21  ;;  %v319_v32 = vsel %vm143_vm0, %v40_v16, 0.0  ;;  %v46_v16 = vld [vmem:[%s6969_s0 + $0xf8] sm:$0xff] }
  0x49   :  { %v2197_v33 = vmul.f32 0.125, %v1337_v23  ;;  %v2198_v34 = vmul.f32 0.125, %v1344_v24  ;;  %v2581_v35 = vsel %vm2580_vm3, %v2323_v25, %v2579_v31  ;;  %v314_v39 = vadd.f32 %v313_v28, %v312_v17 }
  0x4a   :  { %v1351_v40 = vadd.f32 %v1350_v29, %v1349_v18  ;;  %v2583_v41 = vsel %vm2582_vm4, %v2324_v30, %v2581_v35  ;;  %v320_v44 = vrot.slane %v319_v32, 4  ;;  %v326_v45 = vsel %vm143_vm0, %v41_v27, 0.0 }
  0x4b   :  { %v2325_v46 = vmul.f32 %v2197_v33, %v4737_v3  ;;  %v2326_v47 = vmul.f32 %v2198_v34, %v4745_v10  ;;  %v315_v48 = vrot.slane %v314_v39, 2  ;;  %v327_v49 = vrot.slane %v326_v45, 4 }
  0x4c   :  { %v2199_v50 = vmul.f32 0.125, %v1351_v40  ;;  %v321_v53 = vadd.f32 %v320_v44, %v319_v32  ;;  %v333_v54 = vsel %vm143_vm0, %v42_v36, 0.0  ;;  %v340_v55 = vsel %vm143_vm0, %v43_v37, 0.0 }
  0x4d   :  { %v2585_v57 = vsel %vm2584_vm5, %v2325_v46, %v2583_v41  ;;  %v316_v58 = vadd.f32 %v315_v48, %v314_v39  ;;  %v328_v59 = vadd.f32 %v327_v49, %v326_v45  ;;  %v334_v60 = vrot.slane %v333_v54, 4  ;;  %v1192_v39 = vld [vmem:[%s6970_s1 + $0xc0] sm:$0xff] }
  0x4e   :  { %v2327_v61 = vmul.f32 %v2199_v50, %v4753_v26  ;;  %v2587_v62 = vsel %vm2586_vm6, %v2326_v47, %v2585_v57  ;;  %v322_v2 = vrot.slane %v321_v53, 2  ;;  %v341_v4 = vrot.slane %v340_v55, 4  ;;  %v1193_v50 = vld [vmem:[%s6970_s1 + $0xc8] sm:$0xff] }
  0x4f   :  { %v317_v7 = vrot.slane %v316_v58, 1  ;;  %v329_v9 = vrot.slane %v328_v59, 2  ;;  %v335_v11 = vadd.f32 %v334_v60, %v333_v54  ;;  %v347_v12 = vsel %vm143_vm0, %v44_v52, 0.0  ;;  %v1194_v52 = vld [vmem:[%s6970_s1 + $0xd0] sm:$0xff] }
  0x50   :  { %v2589_v15 = vsel %vm2588_vm7, %v2327_v61, %v2587_v62  ;;  %v323_v17 = vadd.f32 %v322_v2, %v321_v53  ;;  %v342_v18 = vadd.f32 %v341_v4, %v340_v55  ;;  %v348_v19 = vrot.slane %v347_v12, 4  ;;  %v1195_v61 = vld [vmem:[%s6970_s1 + $0xd8] sm:$0xff] }
  0x51   :  { %v2711_v20 = vsel %vm143_vm0, %v2589_v15, 0.0  ;;  %v318_v21 = vadd.f32 %v317_v7, %v316_v58  ;;  %v330_v23 = vadd.f32 %v329_v9, %v328_v59  ;;  %v336_v24 = vrot.slane %v335_v11, 2  ;;  %v1196_v15 = vld [vmem:[%s6970_s1 + $0xe0] sm:$0xff] }
  0x52   :  { %2712 = vadd.xlane.f32.xlu0 %v2711_v20  ;;  %v324_v25 = vrot.slane %v323_v17, 1  ;;  %v343_v27 = vrot.slane %v342_v18, 2  ;;  %v349_v28 = vadd.f32 %v348_v19, %v347_v12  ;;  %v354_v29 = vsel %vm143_vm0, %v45_v6, 0.0 }
  0x53   :  { %v331_v30 = vrot.slane %v330_v23, 1  ;;  %v337_v31 = vadd.f32 %v336_v24, %v335_v11  ;;  %v355_v32 = vrot.slane %v354_v29, 4  ;;  %v361_v33 = vsel %vm143_vm0, %v46_v16, 0.0  ;;  %v1197_v24 = vld [vmem:[%s6970_s1 + $0xe8] sm:$0xff] }
  0x54   :  { %v325_v34 = vadd.f32 %v324_v25, %v323_v17  ;;  %v344_v35 = vadd.f32 %v343_v27, %v342_v18  ;;  %v350_v36 = vrot.slane %v349_v28, 2  ;;  %v362_v37 = vrot.slane %v361_v33, 4 }
  0x55   :  { %v332_v40 = vadd.f32 %v331_v30, %v330_v23  ;;  %v338_v41 = vrot.slane %v337_v31, 1  ;;  %v356_v44 = vadd.f32 %v355_v32, %v354_v29  ;;  %v4807_v45 = vmul.f32 0.125, %v318_v21 }
  0x56   :  { %v345_v46 = vrot.slane %v344_v35, 1  ;;  %v351_v47 = vadd.f32 %v350_v36, %v349_v28  ;;  %v363_v48 = vadd.f32 %v362_v37, %v361_v33  ;;  %v4809_v49 = vmul.f32 0.125, %v325_v34  ;;  %v1198_v33 = vld [vmem:[%s6970_s1 + $0xf0] sm:$0xff] }
  0x57   :  { %v339_v53 = vadd.f32 %v338_v41, %v337_v31  ;;  %v357_v54 = vrot.slane %v356_v44, 2  ;;  %v4817_v55 = vmul.f32 0.125, %v332_v40  ;;  %v1464_v57 = vsel %vm143_vm0, %v1192_v39, 0.0 }
  0x58   :  { %v346_v58 = vadd.f32 %v345_v46, %v344_v35  ;;  %v352_v59 = vrot.slane %v351_v47, 1  ;;  %v364_v60 = vrot.slane %v363_v48, 2  ;;  %v1465_v62 = vrot.slane %v1464_v57, 4  ;;  %v1199_v46 = vld [vmem:[%s6970_s1 + $0xf8] sm:$0xff] }
  0x59   :  { %v358_v2 = vadd.f32 %v357_v54, %v356_v44  ;;  %v4823_v4 = vmul.f32 0.125, %v339_v53  ;;  %v1471_v6 = vsel %vm143_vm0, %v1193_v50, 0.0  ;;  %v1478_v7 = vsel %vm143_vm0, %v1194_v52, 0.0 }
  0x5a   :  { %v353_v9 = vadd.f32 %v352_v59, %v351_v47  ;;  %v365_v11 = vadd.f32 %v364_v60, %v363_v48  ;;  %v4827_v12 = vmul.f32 0.125, %v346_v58  ;;  %v1466_v16 = vadd.f32 %v1465_v62, %v1464_v57 }
  0x5b   :  { %v359_v17 = vrot.slane %v358_v2, 1  ;;  %v1472_v18 = vrot.slane %v1471_v6, 4  ;;  %v1479_v19 = vrot.slane %v1478_v7, 4  ;;  %v1485_v20 = vsel %vm143_vm0, %v1195_v61, 0.0 }
  0x5c   :  { %v366_v21 = vrot.slane %v365_v11, 1  ;;  %v4833_v23 = vmul.f32 0.125, %v353_v9  ;;  %v1467_v25 = vrot.slane %v1466_v16, 2  ;;  %v1486_v27 = vrot.slane %v1485_v20, 4 }
  0x5d   :  { %v360_v28 = vadd.f32 %v359_v17, %v358_v2  ;;  %v1473_v29 = vadd.f32 %v1472_v18, %v1471_v6  ;;  %v1480_v30 = vadd.f32 %v1479_v19, %v1478_v7  ;;  %v1492_v31 = vsel %vm143_vm0, %v1196_v15, 0.0 }
  0x5e   :  { %v367_v32 = vadd.f32 %v366_v21, %v365_v11  ;;  %v1468_v34 = vadd.f32 %v1467_v25, %v1466_v16  ;;  %v1487_v35 = vadd.f32 %v1486_v27, %v1485_v20  ;;  %v1493_v36 = vrot.slane %v1492_v31, 4 }
  0x5f   :  { %v4842_v37 = vmul.f32 0.125, %v360_v28  ;;  %v1474_v39 = vrot.slane %v1473_v29, 2  ;;  %v1481_v40 = vrot.slane %v1480_v30, 2  ;;  %v1499_v41 = vsel %vm143_vm0, %v1197_v24, 0.0  ;;  %v23_v28 = vld [vmem:[%s6969_s0 + $0x40] sm:$0xff] }
  0x60   :  { %v4845_v44 = vmul.f32 0.125, %v367_v32  ;;  %v1469_v47 = vrot.slane %v1468_v34, 1  ;;  %v1488_v48 = vrot.slane %v1487_v35, 2  ;;  %v1494_v50 = vadd.f32 %v1493_v36, %v1492_v31 }
  0x61   :  { %v1475_v52 = vadd.f32 %v1474_v39, %v1473_v29  ;;  %v1482_v53 = vadd.f32 %v1481_v40, %v1480_v30  ;;  %v1500_v54 = vrot.slane %v1499_v41, 4  ;;  %v1506_v57 = vsel %vm143_vm0, %v1198_v33, 0.0  ;;  %v24_v39 = vld [vmem:[%s6969_s0 + $0x48] sm:$0xff] }
  0x62   :  { %v1470_v58 = vadd.f32 %v1469_v47, %v1468_v34  ;;  %v1489_v59 = vadd.f32 %v1488_v48, %v1487_v35  ;;  %v1495_v60 = vrot.slane %v1494_v50, 2  ;;  %v1507_v61 = vrot.slane %v1506_v57, 4 }
  0x63   :  { %v1476_v62 = vrot.slane %v1475_v52, 1  ;;  %v1483_v2 = vrot.slane %v1482_v53, 1  ;;  %v1501_v6 = vadd.f32 %v1500_v54, %v1499_v41  ;;  %v1513_v7 = vsel %vm143_vm0, %v1199_v46, 0.0 }
  0x64   :  { %v1490_v9 = vrot.slane %v1489_v59, 1  ;;  %v1496_v11 = vadd.f32 %v1495_v60, %v1494_v50  ;;  %v1508_v15 = vadd.f32 %v1507_v61, %v1506_v57  ;;  %v1514_v16 = vrot.slane %v1513_v7, 4 }
  0x65   :  { %v1477_v17 = vadd.f32 %v1476_v62, %v1475_v52  ;;  %v1484_v18 = vadd.f32 %v1483_v2, %v1482_v53  ;;  %v1502_v19 = vrot.slane %v1501_v6, 2  ;;  %v2216_v20 = vmul.f32 0.125, %v1470_v58  ;;  %v25_v58 = vld [vmem:[%s6969_s0 + $0x50] sm:$0xff] }
  0x66   :  { %v1491_v21 = vadd.f32 %v1490_v9, %v1489_v59  ;;  %v1497_v24 = vrot.slane %v1496_v11, 1  ;;  %v1509_v25 = vrot.slane %v1508_v15, 2  ;;  %v1515_v27 = vadd.f32 %v1514_v16, %v1513_v7 }
  0x67   :  { %v1503_v29 = vadd.f32 %v1502_v19, %v1501_v6  ;;  %v2217_v30 = vmul.f32 0.125, %v1477_v17  ;;  %v2218_v31 = vmul.f32 0.125, %v1484_v18  ;;  %v2344_v32 = vmul.f32 %v2216_v20, %v4807_v45 }
  0x68   :  { %v1498_v33 = vadd.f32 %v1497_v24, %v1496_v11  ;;  %v1510_v34 = vadd.f32 %v1509_v25, %v1508_v15  ;;  %v1516_v35 = vrot.slane %v1515_v27, 2  ;;  %v2219_v36 = vmul.f32 0.125, %v1491_v21  ;;  %v26_v11 = vld [vmem:[%s6969_s0 + $0x58] sm:$0xff]  ;;  %v27_v15 = vld [vmem:[%s6969_s0 + $0x60] sm:$0xff] }
  0x69   :  { %v1504_v40 = vrot.slane %v1503_v29, 1  ;;  %v2345_v41 = vmul.f32 %v2217_v30, %v4809_v49  ;;  %v2346_v46 = vmul.f32 %v2218_v31, %v4817_v55  ;;  %v200_v47 = vsel %vm143_vm0, %v23_v28, 0.0  ;;  %v28_v31 = vld [vmem:[%s6969_s0 + $0x68] sm:$0xff] }
  0x6a   :  { %v1511_v48 = vrot.slane %v1510_v34, 1  ;;  %v1517_v50 = vadd.f32 %v1516_v35, %v1515_v27  ;;  %v2220_v52 = vmul.f32 0.125, %v1498_v33  ;;  %v2347_v53 = vmul.f32 %v2219_v36, %v4823_v4 }
  0x6b   :  { %v1505_v54 = vadd.f32 %v1504_v40, %v1503_v29  ;;  %v2604_v57 = vsel %vm2576_vm1, %v2345_v41, %v2344_v32  ;;  %v201_v59 = vrot.slane %v200_v47, 4  ;;  %v207_v60 = vsel %vm143_vm0, %v24_v39, 0.0 }
  0x6c   :  { %v1512_v61 = vadd.f32 %v1511_v48, %v1510_v34  ;;  %v1518_v62 = vrot.slane %v1517_v50, 1  ;;  %v2348_v2 = vmul.f32 %v2220_v52, %v4827_v12  ;;  %v2605_v6 = vsel %vm2578_vm2, %v2346_v46, %v2604_v57  ;;  %v29_v48 = vld [vmem:[%s6969_s0 + $0x70] sm:$0xff] }
  0x6d   :  { %v2221_v7 = vmul.f32 0.125, %v1505_v54  ;;  %v2606_v9 = vsel %vm2580_vm3, %v2347_v53, %v2605_v6  ;;  %v202_v16 = vadd.f32 %v201_v59, %v200_v47  ;;  %v208_v17 = vrot.slane %v207_v60, 4 }
  0x6e   :  { %v1519_v18 = vadd.f32 %v1518_v62, %v1517_v50  ;;  %v2222_v19 = vmul.f32 0.125, %v1512_v61  ;;  %v2607_v20 = vsel %vm2582_vm4, %v2348_v2, %v2606_v9  ;;  %v214_v21 = vsel %vm143_vm0, %v25_v58, 0.0  ;;  %v30_v58 = vld [vmem:[%s6969_s0 + $0x78] sm:$0xff] }
  0x6f   :  { %v2349_v24 = vmul.f32 %v2221_v7, %v4833_v23  ;;  %v203_v25 = vrot.slane %v202_v16, 2  ;;  %v209_v27 = vadd.f32 %v208_v17, %v207_v60  ;;  %v215_v28 = vrot.slane %v214_v21, 4 }
  0x70   :  { %v2223_v29 = vmul.f32 0.125, %v1519_v18  ;;  %v2350_v30 = vmul.f32 %v2222_v19, %v4842_v37  ;;  %v221_v32 = vsel %vm143_vm0, %v26_v11, 0.0  ;;  %v228_v33 = vsel %vm143_vm0, %v27_v15, 0.0 }
  0x71   :  { %v2608_v34 = vsel %vm2584_vm5, %v2349_v24, %v2607_v20  ;;  %v204_v35 = vadd.f32 %v203_v25, %v202_v16  ;;  %v210_v36 = vrot.slane %v209_v27, 2  ;;  %v216_v39 = vadd.f32 %v215_v28, %v214_v21  ;;  %v1176_v28 = vld [vmem:[%s6970_s1 + $0x40] sm:$0xff] }
  0x72   :  { %v2351_v40 = vmul.f32 %v2223_v29, %v4845_v44  ;;  %v2609_v41 = vsel %vm2586_vm6, %v2350_v30, %v2608_v34  ;;  %v222_v46 = vrot.slane %v221_v32, 4  ;;  %v229_v47 = vrot.slane %v228_v33, 4  ;;  %v1177_v29 = vld [vmem:[%s6970_s1 + $0x48] sm:$0xff] }
  0x73   :  { %v205_v50 = vrot.slane %v204_v35, 1  ;;  %v211_v52 = vadd.f32 %v210_v36, %v209_v27  ;;  %v217_v53 = vrot.slane %v216_v39, 2  ;;  %v235_v54 = vsel %vm143_vm0, %v28_v31, 0.0 }
  0x74   :  { %v2610_v57 = vsel %vm2588_vm7, %v2351_v40, %v2609_v41  ;;  %v223_v59 = vadd.f32 %v222_v46, %v221_v32  ;;  %v230_v60 = vadd.f32 %v229_v47, %v228_v33  ;;  %v236_v61 = vrot.slane %v235_v54, 4  ;;  %v1178_v40 = vld [vmem:[%s6970_s1 + $0x50] sm:$0xff] }
  0x75   :  { %v2720_v62 = vsel %vm143_vm0, %v2610_v57, 0.0  ;;  %v206_v2 = vadd.f32 %v205_v50, %v204_v35  ;;  %v212_v6 = vrot.slane %v211_v52, 1  ;;  %v218_v7 = vadd.f32 %v217_v53, %v216_v39 }
  0x76   :  { %2721 = vadd.xlane.f32.xlu1 %v2720_v62  ;;  %v224_v9 = vrot.slane %v223_v59, 2  ;;  %v231_v11 = vrot.slane %v230_v60, 2  ;;  %v237_v15 = vadd.f32 %v236_v61, %v235_v54  ;;  %v242_v16 = vsel %vm143_vm0, %v29_v48, 0.0 }
  0x77   :  { %v213_v17 = vadd.f32 %v212_v6, %v211_v52  ;;  %v219_v18 = vrot.slane %v218_v7, 1  ;;  %v243_v19 = vrot.slane %v242_v16, 4  ;;  %v249_v20 = vsel %vm143_vm0, %v30_v58, 0.0  ;;  %v1179_v58 = vld [vmem:[%s6970_s1 + $0x58] sm:$0xff] }
  0x78   :  { %v225_v21 = vadd.f32 %v224_v9, %v223_v59  ;;  %v232_v24 = vadd.f32 %v231_v11, %v230_v60  ;;  %v238_v25 = vrot.slane %v237_v15, 2  ;;  %v250_v27 = vrot.slane %v249_v20, 4  ;;  %v1180_v59 = vld [vmem:[%s6970_s1 + $0x60] sm:$0xff] }
  0x79   :  { %v220_v30 = vadd.f32 %v219_v18, %v218_v7  ;;  %v244_v31 = vadd.f32 %v243_v19, %v242_v16  ;;  %v4906_v32 = vmul.f32 0.125, %v206_v2  ;;  %v4908_v33 = vmul.f32 0.125, %v213_v17 }
  0x7a   :  { %v226_v34 = vrot.slane %v225_v21, 1  ;;  %v233_v35 = vrot.slane %v232_v24, 1  ;;  %v239_v36 = vadd.f32 %v238_v25, %v237_v15  ;;  %v251_v39 = vadd.f32 %v250_v27, %v249_v20  ;;  %v1181_v15 = vld [vmem:[%s6970_s1 + $0x68] sm:$0xff] }
  0x7b   :  { %v245_v41 = vrot.slane %v244_v31, 2  ;;  %v4913_v46 = vmul.f32 0.125, %v220_v30  ;;  %v1352_v47 = vsel %vm143_vm0, %v1176_v28, 0.0  ;;  %v1359_v48 = vsel %vm143_vm0, %v1177_v29, 0.0 }
  0x7c   :  { %v227_v50 = vadd.f32 %v226_v34, %v225_v21  ;;  %v234_v52 = vadd.f32 %v233_v35, %v232_v24  ;;  %v240_v53 = vrot.slane %v239_v36, 1  ;;  %v252_v54 = vrot.slane %v251_v39, 2 }
  0x7d   :  { %v246_v57 = vadd.f32 %v245_v41, %v244_v31  ;;  %v1353_v60 = vrot.slane %v1352_v47, 4  ;;  %v1360_v61 = vrot.slane %v1359_v48, 4  ;;  %v1366_v62 = vsel %vm143_vm0, %v1178_v40, 0.0  ;;  %v1182_v31 = vld [vmem:[%s6970_s1 + $0x70] sm:$0xff] }
  0x7e   :  { %v241_v2 = vadd.f32 %v240_v53, %v239_v36  ;;  %v253_v6 = vadd.f32 %v252_v54, %v251_v39  ;;  %v4924_v7 = vmul.f32 0.125, %v227_v50  ;;  %v4926_v9 = vmul.f32 0.125, %v234_v52  ;;  %v1183_v50 = vld [vmem:[%s6970_s1 + $0x78] sm:$0xff] }
  0x7f   :  { %v247_v11 = vrot.slane %v246_v57, 1  ;;  %v1354_v16 = vadd.f32 %v1353_v60, %v1352_v47  ;;  %v1361_v17 = vadd.f32 %v1360_v61, %v1359_v48  ;;  %v1367_v18 = vrot.slane %v1366_v62, 4 }
  0x80   :  { %v254_v19 = vrot.slane %v253_v6, 1  ;;  %v4931_v20 = vmul.f32 0.125, %v241_v2  ;;  %v1373_v21 = vsel %vm143_vm0, %v1179_v58, 0.0  ;;  %v1380_v24 = vsel %vm143_vm0, %v1180_v59, 0.0 }
  0x81   :  { %v248_v25 = vadd.f32 %v247_v11, %v246_v57  ;;  %v1355_v27 = vrot.slane %v1354_v16, 2  ;;  %v1362_v28 = vrot.slane %v1361_v17, 2  ;;  %v1368_v29 = vadd.f32 %v1367_v18, %v1366_v62 }
  0x82   :  { %v255_v30 = vadd.f32 %v254_v19, %v253_v6  ;;  %v1374_v34 = vrot.slane %v1373_v21, 4  ;;  %v1381_v35 = vrot.slane %v1380_v24, 4  ;;  %v1387_v36 = vsel %vm143_vm0, %v1181_v15, 0.0 }
  0x83   :  { %v4939_v39 = vmul.f32 0.125, %v248_v25  ;;  %v1356_v40 = vadd.f32 %v1355_v27, %v1354_v16  ;;  %v1363_v41 = vadd.f32 %v1362_v28, %v1361_v17  ;;  %v1369_v47 = vrot.slane %v1368_v29, 2 }
  0x84   :  { %v4941_v48 = vmul.f32 0.125, %v255_v30  ;;  %v1375_v52 = vadd.f32 %v1374_v34, %v1373_v21  ;;  %v1382_v53 = vadd.f32 %v1381_v35, %v1380_v24  ;;  %v1388_v54 = vrot.slane %v1387_v36, 4 }
  0x85   :  { %v1357_v57 = vrot.slane %v1356_v40, 1  ;;  %v1364_v58 = vrot.slane %v1363_v41, 1  ;;  %v1370_v59 = vadd.f32 %v1369_v47, %v1368_v29  ;;  %v1394_v60 = vsel %vm143_vm0, %v1182_v31, 0.0 }
  0x86   :  { %v1376_v61 = vrot.slane %v1375_v52, 2  ;;  %v1383_v62 = vrot.slane %v1382_v53, 2  ;;  %v1389_v2 = vadd.f32 %v1388_v54, %v1387_v36  ;;  %v1395_v6 = vrot.slane %v1394_v60, 4  ;;  %v2767_v36 = vld [vmem:[%s6971_s2 + $0x40] sm:$0xff] }
  0x87   :  { %v1358_v11 = vadd.f32 %v1357_v57, %v1356_v40  ;;  %v1365_v15 = vadd.f32 %v1364_v58, %v1363_v41  ;;  %v1371_v16 = vrot.slane %v1370_v59, 1  ;;  %v1401_v17 = vsel %vm143_vm0, %v1183_v50, 0.0  ;;  %v2768_v58 = vld [vmem:[%s6971_s2 + $0x48] sm:$0xff] }
  0x88   :  { %v1377_v18 = vadd.f32 %v1376_v61, %v1375_v52  ;;  %v1384_v19 = vadd.f32 %v1383_v62, %v1382_v53  ;;  %v1390_v25 = vrot.slane %v1389_v2, 2  ;;  %v1396_v21 = vadd.f32 %v1395_v6, %v1394_v60 }
  0x89   :  { %v1372_v24 = vadd.f32 %v1371_v16, %v1370_v59  ;;  %v1402_v27 = vrot.slane %v1401_v17, 4  ;;  %v2200_v28 = vmul.f32 0.125, %v1358_v11  ;;  %v2201_v30 = vmul.f32 0.125, %v1365_v15  ;;  %v2769_v16 = vld [vmem:[%s6971_s2 + $0x50] sm:$0xff] }
  0x8a   :  { %v1378_v29 = vrot.slane %v1377_v18, 1  ;;  %v1385_v34 = vrot.slane %v1384_v19, 1  ;;  %v1391_v31 = vadd.f32 %v1390_v25, %v1389_v2  ;;  %v1397_v35 = vrot.slane %v1396_v21, 2 }
  0x8b   :  { %v1403_v40 = vadd.f32 %v1402_v27, %v1401_v17  ;;  %v2202_v41 = vmul.f32 0.125, %v1372_v24  ;;  %v2328_v47 = vmul.f32 %v2200_v28, %v4906_v32  ;;  %v2329_v50 = vmul.f32 %v2201_v30, %v4908_v33 }
  0x8c   :  { %v1379_v52 = vadd.f32 %v1378_v29, %v1377_v18  ;;  %v1386_v53 = vadd.f32 %v1385_v34, %v1384_v19  ;;  %v1392_v54 = vrot.slane %v1391_v31, 1  ;;  %v1398_v57 = vadd.f32 %v1397_v35, %v1396_v21  ;;  %v2770_v29 = vld [vmem:[%s6971_s2 + $0x58] sm:$0xff] }
  0x8d   :  { %v1404_v59 = vrot.slane %v1403_v40, 2  ;;  %v2330_v60 = vmul.f32 %v2202_v41, %v4913_v46  ;;  %v2590_v61 = vsel %vm2576_vm1, %v2329_v50, %v2328_v47  ;;  %v2943_v62 = vsel %vm143_vm0, %v2767_v36, 0.0 }
  0x8e   :  { %v1393_v2 = vadd.f32 %v1392_v54, %v1391_v31  ;;  %v1399_v6 = vrot.slane %v1398_v57, 1  ;;  %v2203_v11 = vmul.f32 0.125, %v1379_v52  ;;  %v2204_v15 = vmul.f32 0.125, %v1386_v53  ;;  %v2771_v53 = vld [vmem:[%s6971_s2 + $0x60] sm:$0xff]  ;;  %v2772_v54 = vld [vmem:[%s6971_s2 + $0x68] sm:$0xff] }
  0x8f   :  { %v1405_v17 = vadd.f32 %v1404_v59, %v1403_v40  ;;  %v2591_v18 = vsel %vm2578_vm2, %v2330_v60, %v2590_v61  ;;  %v2944_v19 = vrot.slane %v2943_v62, 4  ;;  %v2950_v25 = vsel %vm143_vm0, %v2768_v58, 0.0 }
  0x90   :  { %v1400_v21 = vadd.f32 %v1399_v6, %v1398_v57  ;;  %v2205_v24 = vmul.f32 0.125, %v1393_v2  ;;  %v2331_v27 = vmul.f32 %v2203_v11, %v4924_v7  ;;  %v2332_v28 = vmul.f32 %v2204_v15, %v4926_v9  ;;  %v2773_v6 = vld [vmem:[%s6971_s2 + $0x70] sm:$0xff] }
  0x91   :  { %v1406_v30 = vrot.slane %v1405_v17, 1  ;;  %v2945_v34 = vadd.f32 %v2944_v19, %v2943_v62  ;;  %v2951_v31 = vrot.slane %v2950_v25, 4  ;;  %v2957_v35 = vsel %vm143_vm0, %v2769_v16, 0.0 }
  0x92   :  { %v2206_v36 = vmul.f32 0.125, %v1400_v21  ;;  %v2333_v40 = vmul.f32 %v2205_v24, %v4931_v20  ;;  %v2592_v41 = vsel %vm2580_vm3, %v2331_v27, %v2591_v18  ;;  %v2958_v47 = vrot.slane %v2957_v35, 4 }
  0x93   :  { %v1407_v50 = vadd.f32 %v1406_v30, %v1405_v17  ;;  %v2593_v52 = vsel %vm2582_vm4, %v2332_v28, %v2592_v41  ;;  %v2946_v57 = vrot.slane %v2945_v34, 2  ;;  %v2952_v58 = vadd.f32 %v2951_v31, %v2950_v25  ;;  %v2774_v30 = vld [vmem:[%s6971_s2 + $0x78] sm:$0xff] }
  0x94   :  { %v2334_v59 = vmul.f32 %v2206_v36, %v4939_v39  ;;  %v2594_v60 = vsel %vm2584_vm5, %v2333_v40, %v2593_v52  ;;  %v2959_v61 = vadd.f32 %v2958_v47, %v2957_v35  ;;  %v2964_v62 = vsel %vm143_vm0, %v2770_v29, 0.0 }
  0x95   :  { %v2207_v2 = vmul.f32 0.125, %v1407_v50  ;;  %v2947_v11 = vadd.f32 %v2946_v57, %v2945_v34  ;;  %v2953_v15 = vrot.slane %v2952_v58, 2  ;;  %v2965_v16 = vrot.slane %v2964_v62, 4 }
  0x96   :  { %v2595_v17 = vsel %vm2586_vm6, %v2334_v59, %v2594_v60  ;;  %v2960_v18 = vrot.slane %v2959_v61, 2  ;;  %v2971_v19 = vsel %vm143_vm0, %v2771_v53, 0.0  ;;  %v2978_v25 = vsel %vm143_vm0, %v2772_v54, 0.0 }
  0x97   :  { %v2335_v21 = vmul.f32 %v2207_v2, %v4941_v48  ;;  %v2948_v24 = vrot.slane %v2947_v11, 1  ;;  %v2954_v27 = vadd.f32 %v2953_v15, %v2952_v58  ;;  %v2966_v28 = vadd.f32 %v2965_v16, %v2964_v62 }
  0x98   :  { %v2961_v29 = vadd.f32 %v2960_v18, %v2959_v61  ;;  %v2972_v34 = vrot.slane %v2971_v19, 4  ;;  %v2979_v31 = vrot.slane %v2978_v25, 4  ;;  %v2985_v35 = vsel %vm143_vm0, %v2773_v6, 0.0 }
  0x99   :  { %v2596_v36 = vsel %vm2588_vm7, %v2335_v21, %v2595_v17  ;;  %v2949_v40 = vadd.f32 %v2948_v24, %v2947_v11  ;;  %v2955_v41 = vrot.slane %v2954_v27, 1  ;;  %v2967_v47 = vrot.slane %v2966_v28, 2 }
  0x9a   :  { %v2714_v50 = vsel %vm143_vm0, %v2596_v36, 0.0  ;;  %v2962_v52 = vrot.slane %v2961_v29, 1  ;;  %v2973_v53 = vadd.f32 %v2972_v34, %v2971_v19  ;;  %v2980_v54 = vadd.f32 %v2979_v31, %v2978_v25  ;;  %v2759_v19 = vld [vmem:[%s6971_s2] sm:$0xff] }
  0x9b   :  { %2715 = vadd.xlane.f32.xlu0 %v2714_v50  ;;  %v2956_v57 = vadd.f32 %v2955_v41, %v2954_v27  ;;  %v2968_v58 = vadd.f32 %v2967_v47, %v2966_v28  ;;  %v2986_v59 = vrot.slane %v2985_v35, 4  ;;  %v2992_v60 = vsel %vm143_vm0, %v2774_v30, 0.0 }
  0x9c   :  { %v2963_v61 = vadd.f32 %v2962_v52, %v2961_v29  ;;  %v2974_v62 = vrot.slane %v2973_v53, 2  ;;  %v2981_v2 = vrot.slane %v2980_v54, 2  ;;  %v2993_v6 = vrot.slane %v2992_v60, 4 }
  0x9d   :  { %v2969_v15 = vrot.slane %v2968_v58, 1  ;;  %v2987_v16 = vadd.f32 %v2986_v59, %v2985_v35  ;;  %v3791_v11 = vmul.f32 0.125, %v2949_v40  ;;  %v3792_v17 = vmul.f32 0.125, %v2956_v57  ;;  %v2760_v40 = vld [vmem:[%s6971_s2 + $0x8] sm:$0xff]  ;;  %v2761_v57 = vld [vmem:[%s6971_s2 + $0x10] sm:$0xff] }
  0x9e   :  { %v2975_v18 = vadd.f32 %v2974_v62, %v2973_v53  ;;  %v2982_v21 = vadd.f32 %v2981_v2, %v2980_v54  ;;  %v2994_v24 = vadd.f32 %v2993_v6, %v2992_v60  ;;  %v3793_v36 = vmul.f32 0.125, %v2963_v61  ;;  %v2762_v6 = vld [vmem:[%s6971_s2 + $0x18] sm:$0xff] }
  0x9f   :  { %v2970_v25 = vadd.f32 %v2969_v15, %v2968_v58  ;;  %v2988_v27 = vrot.slane %v2987_v16, 2  ;;  %v3919_v28 = vmul.f32 %v3791_v11, %v4906_v32  ;;  %v3920_v30 = vmul.f32 %v3792_v17, %v4908_v33 }
  0xa0   :  { %v2976_v29 = vrot.slane %v2975_v18, 1  ;;  %v2983_v34 = vrot.slane %v2982_v21, 1  ;;  %v2995_v31 = vrot.slane %v2994_v24, 2  ;;  %v3921_v35 = vmul.f32 %v3793_v36, %v4913_v46 }
  0xa1   :  { %v2989_v41 = vadd.f32 %v2988_v27, %v2987_v16  ;;  %v3794_v47 = vmul.f32 0.125, %v2970_v25  ;;  %v4174_v50 = vsel %vm2576_vm1, %v3920_v30, %v3919_v28  ;;  %v2887_v52 = vsel %vm143_vm0, %v2759_v19, 0.0  ;;  %v2763_v25 = vld [vmem:[%s6971_s2 + $0x20] sm:$0xff] }
  0xa2   :  { %v2977_v53 = vadd.f32 %v2976_v29, %v2975_v18  ;;  %v2984_v54 = vadd.f32 %v2983_v34, %v2982_v21  ;;  %v2996_v32 = vadd.f32 %v2995_v31, %v2994_v24  ;;  %v4175_v33 = vsel %vm2578_vm2, %v3921_v35, %v4174_v50 }
  0xa3   :  { %v2990_v46 = vrot.slane %v2989_v41, 1  ;;  %v3922_v58 = vmul.f32 %v3794_v47, %v4924_v7  ;;  %v2888_v59 = vrot.slane %v2887_v52, 4  ;;  %v2894_v60 = vsel %vm143_vm0, %v2760_v40, 0.0 }
  0xa4   :  { %v2997_v61 = vrot.slane %v2996_v32, 1  ;;  %v3795_v62 = vmul.f32 0.125, %v2977_v53  ;;  %v3796_v2 = vmul.f32 0.125, %v2984_v54  ;;  %v2895_v15 = vrot.slane %v2894_v60, 4 }
  0xa5   :  { %v2991_v16 = vadd.f32 %v2990_v46, %v2989_v41  ;;  %v4176_v11 = vsel %vm2580_vm3, %v3922_v58, %v4175_v33  ;;  %v2889_v17 = vadd.f32 %v2888_v59, %v2887_v52  ;;  %v2901_v18 = vsel %vm143_vm0, %v2761_v57, 0.0  ;;  %v2766_v59 = vld [vmem:[%s6971_s2 + $0x38] sm:$0xff] }
  0xa6   :  { %v2998_v21 = vadd.f32 %v2997_v61, %v2996_v32  ;;  %v3923_v7 = vmul.f32 %v3795_v62, %v4926_v9  ;;  %v3924_v24 = vmul.f32 %v3796_v2, %v4931_v20  ;;  %v2896_v36 = vadd.f32 %v2895_v15, %v2894_v60  ;;  %v2764_v20 = vld [vmem:[%s6971_s2 + $0x28] sm:$0xff] }
  0xa7   :  { %v3797_v19 = vmul.f32 0.125, %v2991_v16  ;;  %v2890_v27 = vrot.slane %v2889_v17, 2  ;;  %v2902_v28 = vrot.slane %v2901_v18, 4  ;;  %v2908_v30 = vsel %vm143_vm0, %v2762_v6, 0.0 }
  0xa8   :  { %v3798_v29 = vmul.f32 0.125, %v2998_v21  ;;  %v4177_v34 = vsel %vm2582_vm4, %v3923_v7, %v4176_v11  ;;  %v2897_v31 = vrot.slane %v2896_v36, 2  ;;  %v2909_v35 = vrot.slane %v2908_v30, 4 }
  0xa9   :  { %v3925_v40 = vmul.f32 %v3797_v19, %v4939_v39  ;;  %v4178_v9 = vsel %vm2584_vm5, %v3924_v24, %v4177_v34  ;;  %v2891_v41 = vadd.f32 %v2890_v27, %v2889_v17  ;;  %v2903_v47 = vadd.f32 %v2902_v28, %v2901_v18  ;;  %v2765_v39 = vld [vmem:[%s6971_s2 + $0x30] sm:$0xff] }
  0xaa   :  { %v3926_v50 = vmul.f32 %v3798_v29, %v4941_v48  ;;  %v2898_v52 = vadd.f32 %v2897_v31, %v2896_v36  ;;  %v2910_v53 = vadd.f32 %v2909_v35, %v2908_v30  ;;  %v2915_v54 = vsel %vm143_vm0, %v2763_v25, 0.0  ;;  %v2775_v35 = vld [vmem:[%s6971_s2 + $0x80] sm:$0xff] }
  0xab   :  { %v4179_v32 = vsel %vm2586_vm6, %v3925_v40, %v4178_v9  ;;  %v2892_v33 = vrot.slane %v2891_v41, 1  ;;  %v2904_v57 = vrot.slane %v2903_v47, 2  ;;  %v2916_v46 = vrot.slane %v2915_v54, 4 }
  0xac   :  { %v4180_v58 = vsel %vm2588_vm7, %v3926_v50, %v4179_v32  ;;  %v2899_v48 = vrot.slane %v2898_v52, 1  ;;  %v2911_v60 = vrot.slane %v2910_v53, 2  ;;  %v2922_v61 = vsel %vm143_vm0, %v2764_v20, 0.0 }
  0xad   :  { %v4298_v62 = vsel %vm143_vm0, %v4180_v58, 0.0  ;;  %v2893_v2 = vadd.f32 %v2892_v33, %v2891_v41  ;;  %v2905_v6 = vadd.f32 %v2904_v57, %v2903_v47  ;;  %v2917_v15 = vadd.f32 %v2916_v46, %v2915_v54  ;;  %v2776_v33 = vld [vmem:[%s6971_s2 + $0x88] sm:$0xff] }
  0xae   :  { %4299 = vadd.xlane.f32.xlu1 %v4298_v62  ;;  %v2900_v16 = vadd.f32 %v2899_v48, %v2898_v52  ;;  %v2912_v11 = vadd.f32 %v2911_v60, %v2910_v53  ;;  %v2923_v17 = vrot.slane %v2922_v61, 4  ;;  %v2929_v18 = vsel %vm143_vm0, %v2765_v39, 0.0 }
  0xaf   :  { %v2906_v21 = vrot.slane %v2905_v6, 1  ;;  %v2918_v7 = vrot.slane %v2917_v15, 2  ;;  %v2930_v24 = vrot.slane %v2929_v18, 4  ;;  %v2936_v36 = vsel %vm143_vm0, %v2766_v59, 0.0 }
  0xb0   :  { %v2913_v19 = vrot.slane %v2912_v11, 1  ;;  %v2924_v25 = vadd.f32 %v2923_v17, %v2922_v61  ;;  %v2937_v27 = vrot.slane %v2936_v36, 4  ;;  %v3783_v28 = vmul.f32 0.125, %v2893_v2 }
  0xb1   :  { %v2907_v30 = vadd.f32 %v2906_v21, %v2905_v6  ;;  %v2919_v29 = vadd.f32 %v2918_v7, %v2917_v15  ;;  %v2931_v34 = vadd.f32 %v2930_v24, %v2929_v18  ;;  %v3784_v31 = vmul.f32 0.125, %v2900_v16  ;;  %v2778_v18 = vld [vmem:[%s6971_s2 + $0x98] sm:$0xff] }
  0xb2   :  { %v2914_v40 = vadd.f32 %v2913_v19, %v2912_v11  ;;  %v2925_v9 = vrot.slane %v2924_v25, 2  ;;  %v2938_v20 = vadd.f32 %v2937_v27, %v2936_v36  ;;  %v3911_v41 = vmul.f32 %v3783_v28, %v4711_v38  ;;  %v2779_v27 = vld [vmem:[%s6971_s2 + $0xa0] sm:$0xff] }
  0xb3   :  { %v2920_v47 = vrot.slane %v2919_v29, 1  ;;  %v2932_v50 = vrot.slane %v2931_v34, 2  ;;  %v3785_v52 = vmul.f32 0.125, %v2907_v30  ;;  %v3912_v53 = vmul.f32 %v3784_v31, %v4716_v42  ;;  %v2777_v42 = vld [vmem:[%s6971_s2 + $0x90] sm:$0xff] }
  0xb4   :  { %v2926_v54 = vadd.f32 %v2925_v9, %v2924_v25  ;;  %v2939_v32 = vrot.slane %v2938_v20, 2  ;;  %v3786_v39 = vmul.f32 0.125, %v2914_v40  ;;  %v2999_v57 = vsel %vm143_vm0, %v2775_v35, 0.0 }
  0xb5   :  { %v2921_v46 = vadd.f32 %v2920_v47, %v2919_v29  ;;  %v2933_v58 = vadd.f32 %v2932_v50, %v2931_v34  ;;  %v3913_v59 = vmul.f32 %v3785_v52, %v4718_v43  ;;  %v4167_v38 = vsel %vm2576_vm1, %v3912_v53, %v3911_v41  ;;  %v2780_v47 = vld [vmem:[%s6971_s2 + $0xa8] sm:$0xff] }
  0xb6   :  { %v2927_v48 = vrot.slane %v2926_v54, 1  ;;  %v2940_v60 = vadd.f32 %v2939_v32, %v2938_v20  ;;  %v3914_v61 = vmul.f32 %v3786_v39, %v4727_v51  ;;  %v3000_v62 = vrot.slane %v2999_v57, 4 }
  0xb7   :  { %v2934_v2 = vrot.slane %v2933_v58, 1  ;;  %v3787_v6 = vmul.f32 0.125, %v2921_v46  ;;  %v4168_v15 = vsel %vm2578_vm2, %v3913_v59, %v4167_v38  ;;  %v3006_v16 = vsel %vm143_vm0, %v2776_v33, 0.0 }
  0xb8   :  { %v2928_v11 = vadd.f32 %v2927_v48, %v2926_v54  ;;  %v2941_v17 = vrot.slane %v2940_v60, 1  ;;  %v4169_v43 = vsel %vm2580_vm3, %v3914_v61, %v4168_v15  ;;  %v3001_v51 = vadd.f32 %v3000_v62, %v2999_v57  ;;  %v2782_v57 = vld [vmem:[%s6971_s2 + $0xb8] sm:$0xff] }
  0xb9   :  { %v2935_v21 = vadd.f32 %v2934_v2, %v2933_v58  ;;  %v3915_v7 = vmul.f32 %v3787_v6, %v4730_v56  ;;  %v3007_v24 = vrot.slane %v3006_v16, 4  ;;  %v3013_v36 = vsel %vm143_vm0, %v2777_v42, 0.0 }
  0xba   :  { %v2942_v19 = vadd.f32 %v2941_v17, %v2940_v60  ;;  %v3788_v25 = vmul.f32 0.125, %v2928_v11  ;;  %v3002_v28 = vrot.slane %v3001_v51, 2  ;;  %v3014_v30 = vrot.slane %v3013_v36, 4 }
  0xbb   :  { %v3789_v29 = vmul.f32 0.125, %v2935_v21  ;;  %v4170_v34 = vsel %vm2582_vm4, %v3915_v7, %v4169_v43  ;;  %v3008_v31 = vadd.f32 %v3007_v24, %v3006_v16  ;;  %v3020_v35 = vsel %vm143_vm0, %v2778_v18, 0.0 }
  0xbc   :  { %v3790_v40 = vmul.f32 0.125, %v2942_v19  ;;  %v3916_v56 = vmul.f32 %v3788_v25, %v4737_v3  ;;  %v3003_v9 = vadd.f32 %v3002_v28, %v3001_v51  ;;  %v3015_v20 = vadd.f32 %v3014_v30, %v3013_v36  ;;  %v47_v30 = vld [vmem:[%s6969_s0 + $0x100] sm:$0xff] }
  0xbd   :  { %v3917_v41 = vmul.f32 %v3789_v29, %v4745_v10  ;;  %v3009_v50 = vrot.slane %v3008_v31, 2  ;;  %v3021_v52 = vrot.slane %v3020_v35, 4  ;;  %v3027_v53 = vsel %vm143_vm0, %v2779_v27, 0.0  ;;  %v2781_v10 = vld [vmem:[%s6971_s2 + $0xb0] sm:$0xff] }
  0xbe   :  { %v3918_v54 = vmul.f32 %v3790_v40, %v4753_v26  ;;  %v4171_v32 = vsel %vm2584_vm5, %v3916_v56, %v4170_v34  ;;  %v3004_v39 = vrot.slane %v3003_v9, 1  ;;  %v3016_v33 = vrot.slane %v3015_v20, 2 }
  0xbf   :  { %v4172_v3 = vsel %vm2586_vm6, %v3917_v41, %v4171_v32  ;;  %v3010_v46 = vadd.f32 %v3009_v50, %v3008_v31  ;;  %v3022_v58 = vadd.f32 %v3021_v52, %v3020_v35  ;;  %v3028_v59 = vrot.slane %v3027_v53, 4  ;;  %v48_v52 = vld [vmem:[%s6969_s0 + $0x108] sm:$0xff] }
  0xc0   :  { %v4173_v38 = vsel %vm2588_vm7, %v3918_v54, %v4172_v3  ;;  %v3005_v26 = vadd.f32 %v3004_v39, %v3003_v9  ;;  %v3017_v48 = vadd.f32 %v3016_v33, %v3015_v20  ;;  %v3034_v60 = vsel %vm143_vm0, %v2780_v47, 0.0 }
  0xc1   :  { %v4295_v61 = vsel %vm143_vm0, %v4173_v38, 0.0  ;;  %v3011_v42 = vrot.slane %v3010_v46, 1  ;;  %v3023_v62 = vrot.slane %v3022_v58, 2  ;;  %v3029_v2 = vadd.f32 %v3028_v59, %v3027_v53 }
  0xc2   :  { %4296 = vadd.xlane.f32.xlu0 %v4295_v61  ;;  %v3018_v6 = vrot.slane %v3017_v48, 1  ;;  %v3035_v15 = vrot.slane %v3034_v60, 4  ;;  %v3041_v16 = vsel %vm143_vm0, %v2781_v10, 0.0  ;;  %v3048_v11 = vsel %vm143_vm0, %v2782_v57, 0.0 }
  0xc3   :  { %v3012_v17 = vadd.f32 %v3011_v42, %v3010_v46  ;;  %v3024_v43 = vadd.f32 %v3023_v62, %v3022_v58  ;;  %v3030_v18 = vrot.slane %v3029_v2, 2  ;;  %v3042_v51 = vrot.slane %v3041_v16, 4 }
  0xc4   :  { %v3019_v21 = vadd.f32 %v3018_v6, %v3017_v48  ;;  %v3036_v7 = vadd.f32 %v3035_v15, %v3034_v60  ;;  %v3049_v24 = vrot.slane %v3048_v11, 4  ;;  %v3799_v36 = vmul.f32 0.125, %v3005_v26  ;;  %v50_v48 = vld [vmem:[%s6969_s0 + $0x118] sm:$0xff] }
  0xc5   :  { %v3025_v19 = vrot.slane %v3024_v43, 1  ;;  %v3031_v25 = vadd.f32 %v3030_v18, %v3029_v2  ;;  %v3043_v27 = vadd.f32 %v3042_v51, %v3041_v16  ;;  %v3800_v28 = vmul.f32 0.125, %v3012_v17 }
  0xc6   :  { %v3037_v29 = vrot.slane %v3036_v7, 2  ;;  %v3050_v34 = vadd.f32 %v3049_v24, %v3048_v11  ;;  %v3801_v31 = vmul.f32 0.125, %v3019_v21  ;;  %v3927_v35 = vmul.f32 %v3799_v36, %v4621_v63 }
  0xc7   :  { %v3026_v40 = vadd.f32 %v3025_v19, %v3024_v43  ;;  %v3032_v56 = vrot.slane %v3031_v25, 1  ;;  %v3044_v9 = vrot.slane %v3043_v27, 2  ;;  %v3928_v20 = vmul.f32 %v3800_v28, %v4623_v0  ;;  %v49_v0 = vld [vmem:[%s6969_s0 + $0x110] sm:$0xff] }
  0xc8   :  { %v3038_v41 = vadd.f32 %v3037_v29, %v3036_v7  ;;  %v3051_v47 = vrot.slane %v3050_v34, 2  ;;  %v3929_v50 = vmul.f32 %v3801_v31, %v4625_v1  ;;  %v368_v53 = vsel %vm143_vm0, %v47_v30, 0.0 }
  0xc9   :  { %v3033_v54 = vadd.f32 %v3032_v56, %v3031_v25  ;;  %v3045_v32 = vadd.f32 %v3044_v9, %v3043_v27  ;;  %v3802_v39 = vmul.f32 0.125, %v3026_v40  ;;  %v4181_v63 = vsel %vm2576_vm1, %v3928_v20, %v3927_v35  ;;  %v52_v25 = vld [vmem:[%s6969_s0 + $0x128] sm:$0xff]  ;;  %v54_v40 = vld [vmem:[%s6969_s0 + $0x138] sm:$0xff] }
  0xca   :  { %v3039_v33 = vrot.slane %v3038_v41, 1  ;;  %v3052_v3 = vadd.f32 %v3051_v47, %v3050_v34  ;;  %v4182_v10 = vsel %vm2578_vm2, %v3929_v50, %v4181_v63  ;;  %v369_v1 = vrot.slane %v368_v53, 4 }
  0xcb   :  { %v3046_v57 = vrot.slane %v3045_v32, 1  ;;  %v3803_v46 = vmul.f32 0.125, %v3033_v54  ;;  %v3930_v58 = vmul.f32 %v3802_v39, %v4627_v5  ;;  %v375_v59 = vsel %vm143_vm0, %v48_v52, 0.0  ;;  %v51_v5 = vld [vmem:[%s6969_s0 + $0x120] sm:$0xff] }
  0xcc   :  { %v3040_v38 = vadd.f32 %v3039_v33, %v3038_v41  ;;  %v3053_v26 = vrot.slane %v3052_v3, 1  ;;  %v370_v60 = vadd.f32 %v369_v1, %v368_v53  ;;  %v376_v61 = vrot.slane %v375_v59, 4 }
  0xcd   :  { %v3047_v42 = vadd.f32 %v3046_v57, %v3045_v32  ;;  %v3931_v62 = vmul.f32 %v3803_v46, %v4635_v8  ;;  %v4183_v2 = vsel %vm2580_vm3, %v3930_v58, %v4182_v10  ;;  %v382_v6 = vsel %vm143_vm0, %v49_v0, 0.0  ;;  %v1200_v46 = vld [vmem:[%s6970_s1 + $0x100] sm:$0xff]  ;;  %v1201_v58 = vld [vmem:[%s6970_s1 + $0x108] sm:$0xff] }
  0xce   :  { %v3054_v15 = vadd.f32 %v3053_v26, %v3052_v3  ;;  %v3804_v16 = vmul.f32 0.125, %v3040_v38  ;;  %v371_v11 = vrot.slane %v370_v60, 2  ;;  %v377_v17 = vadd.f32 %v376_v61, %v375_v59 }
  0xcf   :  { %v3805_v43 = vmul.f32 0.125, %v3047_v42  ;;  %v4184_v18 = vsel %vm2582_vm4, %v3931_v62, %v4183_v2  ;;  %v383_v51 = vrot.slane %v382_v6, 4  ;;  %v389_v21 = vsel %vm143_vm0, %v50_v48, 0.0 }
  0xd0   :  { %v3806_v7 = vmul.f32 0.125, %v3054_v15  ;;  %v3932_v8 = vmul.f32 %v3804_v16, %v4640_v13  ;;  %v372_v24 = vadd.f32 %v371_v11, %v370_v60  ;;  %v378_v36 = vrot.slane %v377_v17, 2  ;;  %v1202_v15 = vld [vmem:[%s6970_s1 + $0x110] sm:$0xff] }
  0xd1   :  { %v3933_v19 = vmul.f32 %v3805_v43, %v4642_v14  ;;  %v384_v27 = vadd.f32 %v383_v51, %v382_v6  ;;  %v390_v28 = vrot.slane %v389_v21, 4  ;;  %v396_v30 = vsel %vm143_vm0, %v51_v5, 0.0  ;;  %v53_v14 = vld [vmem:[%s6969_s0 + $0x130] sm:$0xff] }
  0xd2   :  { %v3934_v29 = vmul.f32 %v3806_v7, %v4652_v22  ;;  %v4185_v34 = vsel %vm2584_vm5, %v3932_v8, %v4184_v18  ;;  %v373_v31 = vrot.slane %v372_v24, 1  ;;  %v379_v35 = vadd.f32 %v378_v36, %v377_v17  ;;  %v1203_v7 = vld [vmem:[%s6970_s1 + $0x118] sm:$0xff] }
  0xd3   :  { %v4186_v13 = vsel %vm2586_vm6, %v3933_v19, %v4185_v34  ;;  %v385_v56 = vrot.slane %v384_v27, 2  ;;  %v391_v9 = vadd.f32 %v390_v28, %v389_v21  ;;  %v397_v20 = vrot.slane %v396_v30, 4 }
  0xd4   :  { %v4187_v41 = vsel %vm2588_vm7, %v3934_v29, %v4186_v13  ;;  %v374_v22 = vadd.f32 %v373_v31, %v372_v24  ;;  %v380_v47 = vrot.slane %v379_v35, 1  ;;  %v403_v50 = vsel %vm143_vm0, %v52_v25, 0.0  ;;  %v1204_v29 = vld [vmem:[%s6970_s1 + $0x120] sm:$0xff] }
  0xd5   :  { %v4301_v52 = vsel %vm143_vm0, %v4187_v41, 0.0  ;;  %v386_v53 = vadd.f32 %v385_v56, %v384_v27  ;;  %v392_v54 = vrot.slane %v391_v9, 2  ;;  %v398_v32 = vadd.f32 %v397_v20, %v396_v30 }
  0xd6   :  { %4302 = vadd.xlane.f32.xlu1 %v4301_v52  ;;  %v381_v39 = vadd.f32 %v380_v47, %v379_v35  ;;  %v404_v63 = vrot.slane %v403_v50, 4  ;;  %v410_v33 = vsel %vm143_vm0, %v53_v14, 0.0  ;;  %v417_v3 = vsel %vm143_vm0, %v54_v40, 0.0  ;;  %v1205_v47 = vld [vmem:[%s6970_s1 + $0x128] sm:$0xff] }
  0xd7   :  { %v387_v10 = vrot.slane %v386_v53, 1  ;;  %v393_v0 = vadd.f32 %v392_v54, %v391_v9  ;;  %v399_v1 = vrot.slane %v398_v32, 2  ;;  %v411_v57 = vrot.slane %v410_v33, 4 }
  0xd8   :  { %v405_v59 = vadd.f32 %v404_v63, %v403_v50  ;;  %v418_v38 = vrot.slane %v417_v3, 4  ;;  %v5146_v26 = vmul.f32 0.125, %v374_v22  ;;  %v5148_v48 = vmul.f32 0.125, %v381_v39 }
  0xd9   :  { %v388_v60 = vadd.f32 %v387_v10, %v386_v53  ;;  %v394_v61 = vrot.slane %v393_v0, 1  ;;  %v400_v42 = vadd.f32 %v399_v1, %v398_v32  ;;  %v412_v62 = vadd.f32 %v411_v57, %v410_v33  ;;  %v1207_v10 = vld [vmem:[%s6970_s1 + $0x138] sm:$0xff] }
  0xda   :  { %v406_v2 = vrot.slane %v405_v59, 2  ;;  %v419_v6 = vadd.f32 %v418_v38, %v417_v3  ;;  %v1520_v16 = vsel %vm143_vm0, %v1200_v46, 0.0  ;;  %v1527_v5 = vsel %vm143_vm0, %v1201_v58, 0.0  ;;  %v1206_v3 = vld [vmem:[%s6970_s1 + $0x130] sm:$0xff] }
  0xdb   :  { %v395_v11 = vadd.f32 %v394_v61, %v393_v0  ;;  %v401_v17 = vrot.slane %v400_v42, 1  ;;  %v413_v43 = vrot.slane %v412_v62, 2  ;;  %v5155_v18 = vmul.f32 0.125, %v388_v60 }
  0xdc   :  { %v407_v51 = vadd.f32 %v406_v2, %v405_v59  ;;  %v420_v21 = vrot.slane %v419_v6, 2  ;;  %v1521_v8 = vrot.slane %v1520_v16, 4  ;;  %v1528_v24 = vrot.slane %v1527_v5, 4 }
  0xdd   :  { %v402_v36 = vadd.f32 %v401_v17, %v400_v42  ;;  %v414_v19 = vadd.f32 %v413_v43, %v412_v62  ;;  %v5160_v25 = vmul.f32 0.125, %v395_v11  ;;  %v1534_v27 = vsel %vm143_vm0, %v1202_v15, 0.0 }
  0xde   :  { %v408_v28 = vrot.slane %v407_v51, 1  ;;  %v421_v30 = vadd.f32 %v420_v21, %v419_v6  ;;  %v1522_v34 = vadd.f32 %v1521_v8, %v1520_v16  ;;  %v1529_v31 = vadd.f32 %v1528_v24, %v1527_v5 }
  0xdf   :  { %v415_v35 = vrot.slane %v414_v19, 1  ;;  %v5166_v13 = vmul.f32 0.125, %v402_v36  ;;  %v1535_v14 = vrot.slane %v1534_v27, 4  ;;  %v1541_v40 = vsel %vm143_vm0, %v1203_v7, 0.0 }
  0xe0   :  { %v409_v56 = vadd.f32 %v408_v28, %v407_v51  ;;  %v422_v9 = vrot.slane %v421_v30, 1  ;;  %v1523_v20 = vrot.slane %v1522_v34, 2  ;;  %v1530_v41 = vrot.slane %v1529_v31, 2  ;;  %v2783_v28 = vld [vmem:[%s6971_s2 + $0xc0] sm:$0xff] }
  0xe1   :  { %v416_v22 = vadd.f32 %v415_v35, %v414_v19  ;;  %v1536_v50 = vadd.f32 %v1535_v14, %v1534_v27  ;;  %v1542_v52 = vrot.slane %v1541_v40, 4  ;;  %v1548_v53 = vsel %vm143_vm0, %v1204_v29, 0.0 }
  0xe2   :  { %v423_v54 = vadd.f32 %v422_v9, %v421_v30  ;;  %v5173_v32 = vmul.f32 0.125, %v409_v56  ;;  %v1524_v39 = vadd.f32 %v1523_v20, %v1522_v34  ;;  %v1531_v63 = vadd.f32 %v1530_v41, %v1529_v31  ;;  %v2784_v9 = vld [vmem:[%s6971_s2 + $0xc8] sm:$0xff] }
  0xe3   :  { %v5175_v33 = vmul.f32 0.125, %v416_v22  ;;  %v1537_v0 = vrot.slane %v1536_v50, 2  ;;  %v1543_v1 = vadd.f32 %v1542_v52, %v1541_v40  ;;  %v1549_v57 = vrot.slane %v1548_v53, 4 }
  0xe4   :  { %v5183_v46 = vmul.f32 0.125, %v423_v54  ;;  %v1525_v58 = vrot.slane %v1524_v39, 1  ;;  %v1532_v59 = vrot.slane %v1531_v63, 1  ;;  %v1555_v38 = vsel %vm143_vm0, %v1205_v47, 0.0 }
  0xe5   :  { %v1538_v60 = vadd.f32 %v1537_v0, %v1536_v50  ;;  %v1544_v61 = vrot.slane %v1543_v1, 2  ;;  %v1550_v42 = vadd.f32 %v1549_v57, %v1548_v53  ;;  %v1556_v62 = vrot.slane %v1555_v38, 4 }
  0xe6   :  { %v1526_v2 = vadd.f32 %v1525_v58, %v1524_v39  ;;  %v1533_v6 = vadd.f32 %v1532_v59, %v1531_v63  ;;  %v1562_v15 = vsel %vm143_vm0, %v1206_v3, 0.0  ;;  %v1569_v16 = vsel %vm143_vm0, %v1207_v10, 0.0  ;;  %v2785_v3 = vld [vmem:[%s6971_s2 + $0xd0] sm:$0xff] }
  0xe7   :  { %v1539_v5 = vrot.slane %v1538_v60, 1  ;;  %v1545_v11 = vadd.f32 %v1544_v61, %v1543_v1  ;;  %v1551_v17 = vrot.slane %v1550_v42, 2  ;;  %v1557_v43 = vadd.f32 %v1556_v62, %v1555_v38  ;;  %v2786_v61 = vld [vmem:[%s6971_s2 + $0xd8] sm:$0xff] }
  0xe8   :  { %v1563_v51 = vrot.slane %v1562_v15, 4  ;;  %v1570_v21 = vrot.slane %v1569_v16, 4  ;;  %v2224_v7 = vmul.f32 0.125, %v1526_v2  ;;  %v2225_v8 = vmul.f32 0.125, %v1533_v6 }
  0xe9   :  { %v1540_v24 = vadd.f32 %v1539_v5, %v1538_v60  ;;  %v1546_v36 = vrot.slane %v1545_v11, 1  ;;  %v1552_v19 = vadd.f32 %v1551_v17, %v1550_v42  ;;  %v1558_v27 = vrot.slane %v1557_v43, 2  ;;  %v2787_v17 = vld [vmem:[%s6971_s2 + $0xe0] sm:$0xff] }
  0xea   :  { %v1564_v30 = vadd.f32 %v1563_v51, %v1562_v15  ;;  %v1571_v29 = vadd.f32 %v1570_v21, %v1569_v16  ;;  %v2352_v34 = vmul.f32 %v2224_v7, %v5146_v26  ;;  %v2353_v31 = vmul.f32 %v2225_v8, %v5148_v48 }
  0xeb   :  { %v1547_v35 = vadd.f32 %v1546_v36, %v1545_v11  ;;  %v1553_v14 = vrot.slane %v1552_v19, 1  ;;  %v1559_v40 = vadd.f32 %v1558_v27, %v1557_v43  ;;  %v2226_v56 = vmul.f32 0.125, %v1540_v24  ;;  %v2788_v27 = vld [vmem:[%s6971_s2 + $0xe8] sm:$0xff] }
  0xec   :  { %v1565_v20 = vrot.slane %v1564_v30, 2  ;;  %v1572_v41 = vrot.slane %v1571_v29, 2  ;;  %v2611_v22 = vsel %vm2576_vm1, %v2353_v31, %v2352_v34  ;;  %v3055_v47 = vsel %vm143_vm0, %v2783_v28, 0.0 }
  0xed   :  { %v1554_v50 = vadd.f32 %v1553_v14, %v1552_v19  ;;  %v1560_v52 = vrot.slane %v1559_v40, 1  ;;  %v2227_v53 = vmul.f32 0.125, %v1547_v35  ;;  %v2354_v54 = vmul.f32 %v2226_v56, %v5155_v18 }
  0xee   :  { %v1566_v39 = vadd.f32 %v1565_v20, %v1564_v30  ;;  %v1573_v63 = vadd.f32 %v1572_v41, %v1571_v29  ;;  %v3056_v10 = vrot.slane %v3055_v47, 4  ;;  %v3062_v0 = vsel %vm143_vm0, %v2784_v9, 0.0  ;;  %v2789_v20 = vld [vmem:[%s6971_s2 + $0xf0] sm:$0xff] }
  0xef   :  { %v1561_v1 = vadd.f32 %v1560_v52, %v1559_v40  ;;  %v2228_v57 = vmul.f32 0.125, %v1554_v50  ;;  %v2355_v58 = vmul.f32 %v2227_v53, %v5160_v25  ;;  %v2612_v59 = vsel %vm2578_vm2, %v2354_v54, %v2611_v22 }
  0xf0   :  { %v1567_v38 = vrot.slane %v1566_v39, 1  ;;  %v1574_v60 = vrot.slane %v1573_v63, 1  ;;  %v3057_v42 = vadd.f32 %v3056_v10, %v3055_v47  ;;  %v3063_v62 = vrot.slane %v3062_v0, 4 }
  0xf1   :  { %v2229_v2 = vmul.f32 0.125, %v1561_v1  ;;  %v2356_v6 = vmul.f32 %v2228_v57, %v5166_v13  ;;  %v2613_v15 = vsel %vm2580_vm3, %v2355_v58, %v2612_v59  ;;  %v3069_v16 = vsel %vm143_vm0, %v2785_v3, 0.0  ;;  %v2790_v3 = vld [vmem:[%s6971_s2 + $0xf8] sm:$0xff] }
  0xf2   :  { %v1568_v5 = vadd.f32 %v1567_v38, %v1566_v39  ;;  %v1575_v11 = vadd.f32 %v1574_v60, %v1573_v63  ;;  %v3058_v43 = vrot.slane %v3057_v42, 2  ;;  %v3064_v51 = vadd.f32 %v3063_v62, %v3062_v0 }
  0xf3   :  { %v2357_v21 = vmul.f32 %v2229_v2, %v5173_v32  ;;  %v2614_v7 = vsel %vm2582_vm4, %v2356_v6, %v2613_v15  ;;  %v3070_v8 = vrot.slane %v3069_v16, 4  ;;  %v3076_v24 = vsel %vm143_vm0, %v2786_v61, 0.0 }
  0xf4   :  { %v2230_v36 = vmul.f32 0.125, %v1568_v5  ;;  %v2231_v19 = vmul.f32 0.125, %v1575_v11  ;;  %v3059_v28 = vadd.f32 %v3058_v43, %v3057_v42  ;;  %v3065_v30 = vrot.slane %v3064_v51, 2 }
  0xf5   :  { %v2615_v29 = vsel %vm2584_vm5, %v2357_v21, %v2614_v7  ;;  %v3071_v34 = vadd.f32 %v3070_v8, %v3069_v16  ;;  %v3077_v31 = vrot.slane %v3076_v24, 4  ;;  %v3083_v35 = vsel %vm143_vm0, %v2787_v17, 0.0 }
  0xf6   :  { %v2358_v14 = vmul.f32 %v2230_v36, %v5175_v33  ;;  %v2359_v40 = vmul.f32 %v2231_v19, %v5183_v46  ;;  %v3060_v56 = vrot.slane %v3059_v28, 1  ;;  %v3066_v9 = vadd.f32 %v3065_v30, %v3064_v51  ;;  %v55_v51 = vld [vmem:[%s6969_s0 + $0x140] sm:$0xff]  ;;  %v56_v30 = vld [vmem:[%s6969_s0 + $0x148] sm:$0xff] }
  0xf7   :  { %v3072_v41 = vrot.slane %v3071_v34, 2  ;;  %v3078_v22 = vadd.f32 %v3077_v31, %v3076_v24  ;;  %v3084_v47 = vrot.slane %v3083_v35, 4  ;;  %v3090_v50 = vsel %vm143_vm0, %v2788_v27, 0.0 }
  0xf8   :  { %v2616_v52 = vsel %vm2586_vm6, %v2358_v14, %v2615_v29  ;;  %v3061_v53 = vadd.f32 %v3060_v56, %v3059_v28  ;;  %v3067_v54 = vrot.slane %v3066_v9, 1  ;;  %v3091_v39 = vrot.slane %v3090_v50, 4 }
  0xf9   :  { %v2617_v63 = vsel %vm2588_vm7, %v2359_v40, %v2616_v52  ;;  %v3073_v10 = vadd.f32 %v3072_v41, %v3071_v34  ;;  %v3079_v0 = vrot.slane %v3078_v22, 2  ;;  %v3085_v1 = vadd.f32 %v3084_v47, %v3083_v35 }
  0xfa   :  { %v2723_v57 = vsel %vm143_vm0, %v2617_v63, 0.0  ;;  %v3068_v58 = vadd.f32 %v3067_v54, %v3066_v9  ;;  %v3092_v59 = vadd.f32 %v3091_v39, %v3090_v50  ;;  %v3097_v38 = vsel %vm143_vm0, %v2789_v20, 0.0  ;;  %v57_v20 = vld [vmem:[%s6969_s0 + $0x150] sm:$0xff] }
  0xfb   :  { %2724 = vadd.xlane.f32.xlu0 %v2723_v57  ;;  %v3074_v60 = vrot.slane %v3073_v10, 1  ;;  %v3080_v61 = vadd.f32 %v3079_v0, %v3078_v22  ;;  %v3086_v42 = vrot.slane %v3085_v1, 2  ;;  %v3098_v62 = vrot.slane %v3097_v38, 4 }
  0xfc   :  { %v3093_v2 = vrot.slane %v3092_v59, 2  ;;  %v3104_v6 = vsel %vm143_vm0, %v2790_v3, 0.0  ;;  %v3807_v15 = vmul.f32 0.125, %v3061_v53  ;;  %v3808_v16 = vmul.f32 0.125, %v3068_v58 }
  0xfd   :  { %v3075_v5 = vadd.f32 %v3074_v60, %v3073_v10  ;;  %v3081_v11 = vrot.slane %v3080_v61, 1  ;;  %v3087_v17 = vadd.f32 %v3086_v42, %v3085_v1  ;;  %v3099_v43 = vadd.f32 %v3098_v62, %v3097_v38 }
  0xfe   :  { %v3094_v21 = vadd.f32 %v3093_v2, %v3092_v59  ;;  %v3105_v7 = vrot.slane %v3104_v6, 4  ;;  %v3935_v8 = vmul.f32 %v3807_v15, %v4807_v45  ;;  %v3936_v24 = vmul.f32 %v3808_v16, %v4809_v49  ;;  %v59_v59 = vld [vmem:[%s6969_s0 + $0x160] sm:$0xff]  ;;  %v60_v15 = vld [vmem:[%s6969_s0 + $0x168] sm:$0xff] }
  0xff   :  { %v3082_v36 = vadd.f32 %v3081_v11, %v3080_v61  ;;  %v3088_v19 = vrot.slane %v3087_v17, 1  ;;  %v3100_v27 = vrot.slane %v3099_v43, 2  ;;  %v3809_v28 = vmul.f32 0.125, %v3075_v5 }
 0x100   :  { %v3095_v29 = vrot.slane %v3094_v21, 1  ;;  %v3106_v34 = vadd.f32 %v3105_v7, %v3104_v6  ;;  %v4188_v31 = vsel %vm2576_vm1, %v3936_v24, %v3935_v8  ;;  %v424_v35 = vsel %vm143_vm0, %v55_v51, 0.0 }
 0x101   :  { %v3089_v14 = vadd.f32 %v3088_v19, %v3087_v17  ;;  %v3101_v40 = vadd.f32 %v3100_v27, %v3099_v43  ;;  %v3810_v56 = vmul.f32 0.125, %v3082_v36  ;;  %v3937_v45 = vmul.f32 %v3809_v28, %v4817_v55  ;;  %v58_v55 = vld [vmem:[%s6969_s0 + $0x158] sm:$0xff] }
 0x102   :  { %v3096_v49 = vadd.f32 %v3095_v29, %v3094_v21  ;;  %v3107_v9 = vrot.slane %v3106_v34, 2  ;;  %v425_v41 = vrot.slane %v424_v35, 4  ;;  %v431_v22 = vsel %vm143_vm0, %v56_v30, 0.0  ;;  %v61_v21 = vld [vmem:[%s6969_s0 + $0x170] sm:$0xff] }
 0x103   :  { %v3102_v47 = vrot.slane %v3101_v40, 1  ;;  %v3811_v50 = vmul.f32 0.125, %v3089_v14  ;;  %v3938_v52 = vmul.f32 %v3810_v56, %v4823_v4  ;;  %v4189_v53 = vsel %vm2578_vm2, %v3937_v45, %v4188_v31  ;;  %v62_v31 = vld [vmem:[%s6969_s0 + $0x178] sm:$0xff] }
 0x104   :  { %v3108_v54 = vadd.f32 %v3107_v9, %v3106_v34  ;;  %v3812_v39 = vmul.f32 0.125, %v3096_v49  ;;  %v426_v63 = vadd.f32 %v425_v41, %v424_v35  ;;  %v432_v3 = vrot.slane %v431_v22, 4 }
 0x105   :  { %v3103_v10 = vadd.f32 %v3102_v47, %v3101_v40  ;;  %v3939_v0 = vmul.f32 %v3811_v50, %v4827_v12  ;;  %v4190_v1 = vsel %vm2580_vm3, %v3938_v52, %v4189_v53  ;;  %v438_v57 = vsel %vm143_vm0, %v57_v20, 0.0  ;;  %v1208_v50 = vld [vmem:[%s6970_s1 + $0x140] sm:$0xff] }
 0x106   :  { %v3109_v58 = vrot.slane %v3108_v54, 1  ;;  %v3940_v4 = vmul.f32 %v3812_v39, %v4833_v23  ;;  %v427_v38 = vrot.slane %v426_v63, 2  ;;  %v433_v60 = vadd.f32 %v432_v3, %v431_v22 }
 0x107   :  { %v3813_v61 = vmul.f32 0.125, %v3103_v10  ;;  %v4191_v42 = vsel %vm2582_vm4, %v3939_v0, %v4190_v1  ;;  %v439_v62 = vrot.slane %v438_v57, 4  ;;  %v445_v2 = vsel %vm143_vm0, %v58_v55, 0.0  ;;  %v1209_v0 = vld [vmem:[%s6970_s1 + $0x148] sm:$0xff] }
 0x108   :  { %v3110_v12 = vadd.f32 %v3109_v58, %v3108_v54  ;;  %v4192_v6 = vsel %vm2584_vm5, %v3940_v4, %v4191_v42  ;;  %v428_v23 = vadd.f32 %v427_v38, %v426_v63  ;;  %v434_v16 = vrot.slane %v433_v60, 2  ;;  %v1210_v42 = vld [vmem:[%s6970_s1 + $0x150] sm:$0xff] }
 0x109   :  { %v3941_v5 = vmul.f32 %v3813_v61, %v4842_v37  ;;  %v440_v11 = vadd.f32 %v439_v62, %v438_v57  ;;  %v446_v17 = vrot.slane %v445_v2, 4  ;;  %v452_v43 = vsel %vm143_vm0, %v59_v59, 0.0 }
 0x10a   :  { %v3814_v51 = vmul.f32 0.125, %v3110_v12  ;;  %v429_v7 = vrot.slane %v428_v23, 1  ;;  %v435_v8 = vadd.f32 %v434_v16, %v433_v60  ;;  %v453_v24 = vrot.slane %v452_v43, 4 }
 0x10b   :  { %v4193_v36 = vsel %vm2586_vm6, %v3941_v5, %v4192_v6  ;;  %v441_v19 = vrot.slane %v440_v11, 2  ;;  %v447_v27 = vadd.f32 %v446_v17, %v445_v2  ;;  %v459_v28 = vsel %vm143_vm0, %v60_v15, 0.0  ;;  %v1211_v5 = vld [vmem:[%s6970_s1 + $0x158] sm:$0xff] }
 0x10c   :  { %v3942_v37 = vmul.f32 %v3814_v51, %v4845_v44  ;;  %v430_v30 = vadd.f32 %v429_v7, %v428_v23  ;;  %v436_v29 = vrot.slane %v435_v8, 1  ;;  %v454_v34 = vadd.f32 %v453_v24, %v452_v43 }
 0x10d   :  { %v442_v35 = vadd.f32 %v441_v19, %v440_v11  ;;  %v448_v14 = vrot.slane %v447_v27, 2  ;;  %v460_v40 = vrot.slane %v459_v28, 4  ;;  %v466_v56 = vsel %vm143_vm0, %v61_v21, 0.0  ;;  %v1212_v11 = vld [vmem:[%s6970_s1 + $0x160] sm:$0xff] }
 0x10e   :  { %v4194_v45 = vsel %vm2588_vm7, %v3942_v37, %v4193_v36  ;;  %v437_v49 = vadd.f32 %v436_v29, %v435_v8  ;;  %v455_v9 = vrot.slane %v454_v34, 2  ;;  %v467_v20 = vrot.slane %v466_v56, 4 }
 0x10f   :  { %v4304_v41 = vsel %vm143_vm0, %v4194_v45, 0.0  ;;  %v443_v44 = vrot.slane %v442_v35, 1  ;;  %v449_v22 = vadd.f32 %v448_v14, %v447_v27  ;;  %v461_v47 = vadd.f32 %v460_v40, %v459_v28  ;;  %v1213_v28 = vld [vmem:[%s6970_s1 + $0x168] sm:$0xff] }
 0x110   :  { %4305 = vadd.xlane.f32.xlu1 %v4304_v41  ;;  %v456_v52 = vadd.f32 %v455_v9, %v454_v34  ;;  %v468_v53 = vadd.f32 %v467_v20, %v466_v56  ;;  %v473_v54 = vsel %vm143_vm0, %v62_v31, 0.0  ;;  %v5287_v39 = vmul.f32 0.125, %v430_v30  ;;  %v1214_v56 = vld [vmem:[%s6970_s1 + $0x170] sm:$0xff] }
 0x111   :  { %v444_v55 = vadd.f32 %v443_v44, %v442_v35  ;;  %v450_v63 = vrot.slane %v449_v22, 1  ;;  %v462_v3 = vrot.slane %v461_v47, 2  ;;  %v474_v10 = vrot.slane %v473_v54, 4 }
 0x112   :  { %v457_v1 = vrot.slane %v456_v52, 1  ;;  %v469_v57 = vrot.slane %v468_v53, 2  ;;  %v5292_v58 = vmul.f32 0.125, %v437_v49  ;;  %v1576_v4 = vsel %vm143_vm0, %v1208_v50, 0.0 }
 0x113   :  { %v451_v59 = vadd.f32 %v450_v63, %v449_v22  ;;  %v463_v38 = vadd.f32 %v462_v3, %v461_v47  ;;  %v475_v60 = vadd.f32 %v474_v10, %v473_v54  ;;  %v5295_v61 = vmul.f32 0.125, %v444_v55  ;;  %v1215_v47 = vld [vmem:[%s6970_s1 + $0x178] sm:$0xff] }
 0x114   :  { %v458_v62 = vadd.f32 %v457_v1, %v456_v52  ;;  %v470_v2 = vadd.f32 %v469_v57, %v468_v53  ;;  %v1577_v12 = vrot.slane %v1576_v4, 4  ;;  %v1583_v6 = vsel %vm143_vm0, %v1209_v0, 0.0 }
 0x115   :  { %v464_v15 = vrot.slane %v463_v38, 1  ;;  %v476_v23 = vrot.slane %v475_v60, 2  ;;  %v5301_v16 = vmul.f32 0.125, %v451_v59  ;;  %v1584_v17 = vrot.slane %v1583_v6, 4 }
 0x116   :  { %v471_v43 = vrot.slane %v470_v2, 1  ;;  %v5309_v51 = vmul.f32 0.125, %v458_v62  ;;  %v1578_v21 = vadd.f32 %v1577_v12, %v1576_v4  ;;  %v1590_v7 = vsel %vm143_vm0, %v1210_v42, 0.0 }
 0x117   :  { %v465_v8 = vadd.f32 %v464_v15, %v463_v38  ;;  %v477_v24 = vadd.f32 %v476_v23, %v475_v60  ;;  %v1585_v36 = vadd.f32 %v1584_v17, %v1583_v6  ;;  %v1591_v19 = vrot.slane %v1590_v7, 4 }
 0x118   :  { %v472_v27 = vadd.f32 %v471_v43, %v470_v2  ;;  %v1579_v37 = vrot.slane %v1578_v21, 2  ;;  %v1597_v30 = vsel %vm143_vm0, %v1211_v5, 0.0  ;;  %v1604_v29 = vsel %vm143_vm0, %v1212_v11, 0.0 }
 0x119   :  { %v478_v34 = vrot.slane %v477_v24, 1  ;;  %v5317_v31 = vmul.f32 0.125, %v465_v8  ;;  %v1586_v35 = vrot.slane %v1585_v36, 2  ;;  %v1592_v14 = vadd.f32 %v1591_v19, %v1590_v7  ;;  %v2791_v8 = vld [vmem:[%s6971_s2 + $0x100] sm:$0xff] }
 0x11a   :  { %v5319_v40 = vmul.f32 0.125, %v472_v27  ;;  %v1580_v45 = vadd.f32 %v1579_v37, %v1578_v21  ;;  %v1598_v49 = vrot.slane %v1597_v30, 4  ;;  %v1605_v9 = vrot.slane %v1604_v29, 4 }
 0x11b   :  { %v479_v20 = vadd.f32 %v478_v34, %v477_v24  ;;  %v1587_v41 = vadd.f32 %v1586_v35, %v1585_v36  ;;  %v1593_v44 = vrot.slane %v1592_v14, 2  ;;  %v1611_v22 = vsel %vm143_vm0, %v1213_v28, 0.0  ;;  %v2792_v34 = vld [vmem:[%s6971_s2 + $0x108] sm:$0xff] }
 0x11c   :  { %v1581_v50 = vrot.slane %v1580_v45, 1  ;;  %v1599_v52 = vadd.f32 %v1598_v49, %v1597_v30  ;;  %v1606_v53 = vadd.f32 %v1605_v9, %v1604_v29  ;;  %v1612_v54 = vrot.slane %v1611_v22, 4 }
 0x11d   :  { %v5328_v55 = vmul.f32 0.125, %v479_v20  ;;  %v1588_v63 = vrot.slane %v1587_v41, 1  ;;  %v1594_v3 = vadd.f32 %v1593_v44, %v1592_v14  ;;  %v1618_v10 = vsel %vm143_vm0, %v1214_v56, 0.0  ;;  %v2793_v44 = vld [vmem:[%s6971_s2 + $0x110] sm:$0xff] }
 0x11e   :  { %v1582_v0 = vadd.f32 %v1581_v50, %v1580_v45  ;;  %v1600_v1 = vrot.slane %v1599_v52, 2  ;;  %v1607_v57 = vrot.slane %v1606_v53, 2  ;;  %v1613_v4 = vadd.f32 %v1612_v54, %v1611_v22 }
 0x11f   :  { %v1589_v59 = vadd.f32 %v1588_v63, %v1587_v41  ;;  %v1595_v38 = vrot.slane %v1594_v3, 1  ;;  %v1619_v60 = vrot.slane %v1618_v10, 4  ;;  %v1625_v42 = vsel %vm143_vm0, %v1215_v47, 0.0 }
 0x120   :  { %v1601_v62 = vadd.f32 %v1600_v1, %v1599_v52  ;;  %v1608_v2 = vadd.f32 %v1607_v57, %v1606_v53  ;;  %v1614_v12 = vrot.slane %v1613_v4, 2  ;;  %v1626_v6 = vrot.slane %v1625_v42, 4 }
 0x121   :  { %v1596_v15 = vadd.f32 %v1595_v38, %v1594_v3  ;;  %v1620_v23 = vadd.f32 %v1619_v60, %v1618_v10  ;;  %v2232_v5 = vmul.f32 0.125, %v1582_v0  ;;  %v2233_v11 = vmul.f32 0.125, %v1589_v59  ;;  %v2794_v0 = vld [vmem:[%s6971_s2 + $0x118] sm:$0xff] }
 0x122   :  { %v1602_v17 = vrot.slane %v1601_v62, 1  ;;  %v1609_v43 = vrot.slane %v1608_v2, 1  ;;  %v1615_v21 = vadd.f32 %v1614_v12, %v1613_v4  ;;  %v1627_v7 = vadd.f32 %v1626_v6, %v1625_v42  ;;  %v2795_v12 = vld [vmem:[%s6971_s2 + $0x120] sm:$0xff]  ;;  %v2796_v6 = vld [vmem:[%s6971_s2 + $0x128] sm:$0xff] }
 0x123   :  { %v1621_v24 = vrot.slane %v1620_v23, 2  ;;  %v2234_v36 = vmul.f32 0.125, %v1596_v15  ;;  %v2360_v19 = vmul.f32 %v2232_v5, %v5287_v39  ;;  %v2361_v27 = vmul.f32 %v2233_v11, %v5292_v58 }
 0x124   :  { %v1603_v28 = vadd.f32 %v1602_v17, %v1601_v62  ;;  %v1610_v37 = vadd.f32 %v1609_v43, %v1608_v2  ;;  %v1616_v30 = vrot.slane %v1615_v21, 1  ;;  %v1628_v29 = vrot.slane %v1627_v7, 2 }
 0x125   :  { %v1622_v35 = vadd.f32 %v1621_v24, %v1620_v23  ;;  %v2362_v14 = vmul.f32 %v2234_v36, %v5295_v61  ;;  %v2618_v56 = vsel %vm2576_vm1, %v2361_v27, %v2360_v19  ;;  %v3111_v45 = vsel %vm143_vm0, %v2791_v8, 0.0 }
 0x126   :  { %v1617_v49 = vadd.f32 %v1616_v30, %v1615_v21  ;;  %v1629_v9 = vadd.f32 %v1628_v29, %v1627_v7  ;;  %v2235_v20 = vmul.f32 0.125, %v1603_v28  ;;  %v2236_v41 = vmul.f32 0.125, %v1610_v37  ;;  %v2797_v30 = vld [vmem:[%s6971_s2 + $0x130] sm:$0xff] }
 0x127   :  { %v1623_v22 = vrot.slane %v1622_v35, 1  ;;  %v2619_v47 = vsel %vm2578_vm2, %v2362_v14, %v2618_v56  ;;  %v3112_v50 = vrot.slane %v3111_v45, 4  ;;  %v3118_v52 = vsel %vm143_vm0, %v2792_v34, 0.0  ;;  %v2798_v56 = vld [vmem:[%s6971_s2 + $0x138] sm:$0xff] }
 0x128   :  { %v1630_v53 = vrot.slane %v1629_v9, 1  ;;  %v2237_v54 = vmul.f32 0.125, %v1617_v49  ;;  %v2363_v63 = vmul.f32 %v2235_v20, %v5301_v16  ;;  %v2364_v3 = vmul.f32 %v2236_v41, %v5309_v51 }
 0x129   :  { %v1624_v10 = vadd.f32 %v1623_v22, %v1622_v35  ;;  %v3113_v1 = vadd.f32 %v3112_v50, %v3111_v45  ;;  %v3119_v57 = vrot.slane %v3118_v52, 4  ;;  %v3125_v4 = vsel %vm143_vm0, %v2793_v44, 0.0 }
 0x12a   :  { %v1631_v59 = vadd.f32 %v1630_v53, %v1629_v9  ;;  %v2365_v38 = vmul.f32 %v2237_v54, %v5317_v31  ;;  %v2620_v60 = vsel %vm2580_vm3, %v2363_v63, %v2619_v47  ;;  %v3126_v42 = vrot.slane %v3125_v4, 4 }
 0x12b   :  { %v2238_v62 = vmul.f32 0.125, %v1624_v10  ;;  %v2621_v2 = vsel %vm2582_vm4, %v2364_v3, %v2620_v60  ;;  %v3114_v15 = vrot.slane %v3113_v1, 2  ;;  %v3120_v23 = vadd.f32 %v3119_v57, %v3118_v52 }
 0x12c   :  { %v2239_v5 = vmul.f32 0.125, %v1631_v59  ;;  %v2622_v11 = vsel %vm2584_vm5, %v2365_v38, %v2621_v2  ;;  %v3127_v17 = vadd.f32 %v3126_v42, %v3125_v4  ;;  %v3132_v43 = vsel %vm143_vm0, %v2794_v0, 0.0 }
 0x12d   :  { %v2366_v21 = vmul.f32 %v2238_v62, %v5319_v40  ;;  %v3115_v7 = vadd.f32 %v3114_v15, %v3113_v1  ;;  %v3121_v8 = vrot.slane %v3120_v23, 2  ;;  %v3133_v24 = vrot.slane %v3132_v43, 4  ;;  %v63_v15 = vld [vmem:[%s6969_s0 + $0x180] sm:$0xff] }
 0x12e   :  { %v2367_v36 = vmul.f32 %v2239_v5, %v5328_v55  ;;  %v3128_v19 = vrot.slane %v3127_v17, 2  ;;  %v3139_v27 = vsel %vm143_vm0, %v2795_v12, 0.0  ;;  %v3146_v28 = vsel %vm143_vm0, %v2796_v6, 0.0 }
 0x12f   :  { %v2623_v37 = vsel %vm2586_vm6, %v2366_v21, %v2622_v11  ;;  %v3116_v29 = vrot.slane %v3115_v7, 1  ;;  %v3122_v34 = vadd.f32 %v3121_v8, %v3120_v23  ;;  %v3134_v35 = vadd.f32 %v3133_v24, %v3132_v43  ;;  %v64_v24 = vld [vmem:[%s6969_s0 + $0x188] sm:$0xff] }
 0x130   :  { %v2624_v14 = vsel %vm2588_vm7, %v2367_v36, %v2623_v37  ;;  %v3129_v45 = vadd.f32 %v3128_v19, %v3127_v17  ;;  %v3140_v49 = vrot.slane %v3139_v27, 4  ;;  %v3147_v9 = vrot.slane %v3146_v28, 4 }
 0x131   :  { %v2726_v20 = vsel %vm143_vm0, %v2624_v14, 0.0  ;;  %v3117_v41 = vadd.f32 %v3116_v29, %v3115_v7  ;;  %v3123_v44 = vrot.slane %v3122_v34, 1  ;;  %v3135_v22 = vrot.slane %v3134_v35, 2  ;;  %v65_v29 = vld [vmem:[%s6969_s0 + $0x190] sm:$0xff] }
 0x132   :  { %2727 = vadd.xlane.f32.xlu0 %v2726_v20  ;;  %v3130_v47 = vrot.slane %v3129_v45, 1  ;;  %v3141_v50 = vadd.f32 %v3140_v49, %v3139_v27  ;;  %v3148_v52 = vadd.f32 %v3147_v9, %v3146_v28  ;;  %v3153_v53 = vsel %vm143_vm0, %v2797_v30, 0.0  ;;  %v66_v9 = vld [vmem:[%s6969_s0 + $0x198] sm:$0xff] }
 0x133   :  { %v3124_v54 = vadd.f32 %v3123_v44, %v3122_v34  ;;  %v3136_v63 = vadd.f32 %v3135_v22, %v3134_v35  ;;  %v3154_v3 = vrot.slane %v3153_v53, 4  ;;  %v3160_v10 = vsel %vm143_vm0, %v2798_v56, 0.0 }
 0x134   :  { %v3131_v0 = vadd.f32 %v3130_v47, %v3129_v45  ;;  %v3142_v1 = vrot.slane %v3141_v50, 2  ;;  %v3149_v57 = vrot.slane %v3148_v52, 2  ;;  %v3161_v4 = vrot.slane %v3160_v10, 4 }
 0x135   :  { %v3137_v59 = vrot.slane %v3136_v63, 1  ;;  %v3155_v38 = vadd.f32 %v3154_v3, %v3153_v53  ;;  %v3815_v60 = vmul.f32 0.125, %v3117_v41  ;;  %v3816_v42 = vmul.f32 0.125, %v3124_v54 }
 0x136   :  { %v3143_v62 = vadd.f32 %v3142_v1, %v3141_v50  ;;  %v3150_v2 = vadd.f32 %v3149_v57, %v3148_v52  ;;  %v3162_v12 = vadd.f32 %v3161_v4, %v3160_v10  ;;  %v3817_v6 = vmul.f32 0.125, %v3131_v0 }
 0x137   :  { %v3138_v23 = vadd.f32 %v3137_v59, %v3136_v63  ;;  %v3156_v5 = vrot.slane %v3155_v38, 2  ;;  %v3943_v11 = vmul.f32 %v3815_v60, %v5146_v26  ;;  %v3944_v17 = vmul.f32 %v3816_v42, %v5148_v48  ;;  %v67_v63 = vld [vmem:[%s6969_s0 + $0x1a0] sm:$0xff] }
 0x138   :  { %v3144_v43 = vrot.slane %v3143_v62, 1  ;;  %v3151_v21 = vrot.slane %v3150_v2, 1  ;;  %v3163_v7 = vrot.slane %v3162_v12, 2  ;;  %v3945_v8 = vmul.f32 %v3817_v6, %v5155_v18 }
 0x139   :  { %v3157_v36 = vadd.f32 %v3156_v5, %v3155_v38  ;;  %v3818_v19 = vmul.f32 0.125, %v3138_v23  ;;  %v4195_v27 = vsel %vm2576_vm1, %v3944_v17, %v3943_v11  ;;  %v480_v28 = vsel %vm143_vm0, %v63_v15, 0.0 }
 0x13a   :  { %v3145_v37 = vadd.f32 %v3144_v43, %v3143_v62  ;;  %v3152_v30 = vadd.f32 %v3151_v21, %v3150_v2  ;;  %v3164_v26 = vadd.f32 %v3163_v7, %v3162_v12  ;;  %v4196_v48 = vsel %vm2578_vm2, %v3945_v8, %v4195_v27  ;;  %v70_v43 = vld [vmem:[%s6969_s0 + $0x1b8] sm:$0xff] }
 0x13b   :  { %v3158_v18 = vrot.slane %v3157_v36, 1  ;;  %v3946_v34 = vmul.f32 %v3818_v19, %v5160_v25  ;;  %v481_v35 = vrot.slane %v480_v28, 4  ;;  %v487_v14 = vsel %vm143_vm0, %v64_v24, 0.0 }
 0x13c   :  { %v3165_v56 = vrot.slane %v3164_v26, 1  ;;  %v3819_v45 = vmul.f32 0.125, %v3145_v37  ;;  %v3820_v49 = vmul.f32 0.125, %v3152_v30  ;;  %v488_v20 = vrot.slane %v487_v14, 4 }
 0x13d   :  { %v3159_v41 = vadd.f32 %v3158_v18, %v3157_v36  ;;  %v4197_v44 = vsel %vm2580_vm3, %v3946_v34, %v4196_v48  ;;  %v482_v22 = vadd.f32 %v481_v35, %v480_v28  ;;  %v494_v47 = vsel %vm143_vm0, %v65_v29, 0.0  ;;  %v1216_v34 = vld [vmem:[%s6970_s1 + $0x180] sm:$0xff] }
 0x13e   :  { %v3166_v50 = vadd.f32 %v3165_v56, %v3164_v26  ;;  %v3947_v25 = vmul.f32 %v3819_v45, %v5166_v13  ;;  %v3948_v52 = vmul.f32 %v3820_v49, %v5173_v32  ;;  %v489_v53 = vadd.f32 %v488_v20, %v487_v14  ;;  %v68_v32 = vld [vmem:[%s6969_s0 + $0x1a8] sm:$0xff] }
 0x13f   :  { %v3821_v54 = vmul.f32 0.125, %v3159_v41  ;;  %v483_v3 = vrot.slane %v482_v22, 2  ;;  %v495_v10 = vrot.slane %v494_v47, 4  ;;  %v501_v0 = vsel %vm143_vm0, %v66_v9, 0.0 }
 0x140   :  { %v3822_v1 = vmul.f32 0.125, %v3166_v50  ;;  %v4198_v57 = vsel %vm2582_vm4, %v3947_v25, %v4197_v44  ;;  %v490_v4 = vrot.slane %v489_v53, 2  ;;  %v502_v59 = vrot.slane %v501_v0, 4  ;;  %v1217_v44 = vld [vmem:[%s6970_s1 + $0x188] sm:$0xff] }
 0x141   :  { %v3949_v38 = vmul.f32 %v3821_v54, %v5175_v33  ;;  %v4199_v13 = vsel %vm2584_vm5, %v3948_v52, %v4198_v57  ;;  %v484_v60 = vadd.f32 %v483_v3, %v482_v22  ;;  %v496_v42 = vadd.f32 %v495_v10, %v494_v47  ;;  %v69_v33 = vld [vmem:[%s6969_s0 + $0x1b0] sm:$0xff]  ;;  %v1219_v3 = vld [vmem:[%s6970_s1 + $0x198] sm:$0xff] }
 0x142   :  { %v3950_v62 = vmul.f32 %v3822_v1, %v5183_v46  ;;  %v491_v2 = vadd.f32 %v490_v4, %v489_v53  ;;  %v503_v12 = vadd.f32 %v502_v59, %v501_v0  ;;  %v508_v6 = vsel %vm143_vm0, %v67_v63, 0.0  ;;  %v1218_v63 = vld [vmem:[%s6970_s1 + $0x190] sm:$0xff] }
 0x143   :  { %v4200_v15 = vsel %vm2586_vm6, %v3949_v38, %v4199_v13  ;;  %v485_v23 = vrot.slane %v484_v60, 1  ;;  %v497_v5 = vrot.slane %v496_v42, 2  ;;  %v509_v11 = vrot.slane %v508_v6, 4 }
 0x144   :  { %v4201_v17 = vsel %vm2588_vm7, %v3950_v62, %v4200_v15  ;;  %v492_v46 = vrot.slane %v491_v2, 1  ;;  %v504_v21 = vrot.slane %v503_v12, 2  ;;  %v515_v7 = vsel %vm143_vm0, %v68_v32, 0.0  ;;  %v1220_v62 = vld [vmem:[%s6970_s1 + $0x1a0] sm:$0xff] }
 0x145   :  { %v4307_v8 = vsel %vm143_vm0, %v4201_v17, 0.0  ;;  %v486_v24 = vadd.f32 %v485_v23, %v484_v60  ;;  %v498_v36 = vadd.f32 %v497_v5, %v496_v42  ;;  %v510_v19 = vadd.f32 %v509_v11, %v508_v6 }
 0x146   :  { %4308 = vadd.xlane.f32.xlu1 %v4307_v8  ;;  %v493_v27 = vadd.f32 %v492_v46, %v491_v2  ;;  %v505_v28 = vadd.f32 %v504_v21, %v503_v12  ;;  %v516_v37 = vrot.slane %v515_v7, 4  ;;  %v522_v30 = vsel %vm143_vm0, %v69_v33, 0.0  ;;  %v1221_v21 = vld [vmem:[%s6970_s1 + $0x1a8] sm:$0xff] }
 0x147   :  { %v499_v26 = vrot.slane %v498_v36, 1  ;;  %v511_v48 = vrot.slane %v510_v19, 2  ;;  %v523_v29 = vrot.slane %v522_v30, 4  ;;  %v529_v18 = vsel %vm143_vm0, %v70_v43, 0.0 }
 0x148   :  { %v506_v35 = vrot.slane %v505_v28, 1  ;;  %v517_v14 = vadd.f32 %v516_v37, %v515_v7  ;;  %v530_v56 = vrot.slane %v529_v18, 4  ;;  %v5431_v45 = vmul.f32 0.125, %v486_v24 }
 0x149   :  { %v500_v49 = vadd.f32 %v499_v26, %v498_v36  ;;  %v512_v9 = vadd.f32 %v511_v48, %v510_v19  ;;  %v524_v20 = vadd.f32 %v523_v29, %v522_v30  ;;  %v5433_v41 = vmul.f32 0.125, %v493_v27  ;;  %v1222_v30 = vld [vmem:[%s6970_s1 + $0x1b0] sm:$0xff]  ;;  %v1223_v26 = vld [vmem:[%s6970_s1 + $0x1b8] sm:$0xff] }
 0x14a   :  { %v507_v22 = vadd.f32 %v506_v35, %v505_v28  ;;  %v518_v47 = vrot.slane %v517_v14, 2  ;;  %v531_v50 = vadd.f32 %v530_v56, %v529_v18  ;;  %v1632_v25 = vsel %vm143_vm0, %v1216_v34, 0.0 }
 0x14b   :  { %v513_v52 = vrot.slane %v512_v9, 1  ;;  %v525_v53 = vrot.slane %v524_v20, 2  ;;  %v5439_v54 = vmul.f32 0.125, %v500_v49  ;;  %v1633_v10 = vrot.slane %v1632_v25, 4 }
 0x14c   :  { %v519_v0 = vadd.f32 %v518_v47, %v517_v14  ;;  %v532_v1 = vrot.slane %v531_v50, 2  ;;  %v5447_v57 = vmul.f32 0.125, %v507_v22  ;;  %v1639_v4 = vsel %vm143_vm0, %v1217_v44, 0.0 }
 0x14d   :  { %v514_v59 = vadd.f32 %v513_v52, %v512_v9  ;;  %v526_v38 = vadd.f32 %v525_v53, %v524_v20  ;;  %v1634_v13 = vadd.f32 %v1633_v10, %v1632_v25  ;;  %v1640_v32 = vrot.slane %v1639_v4, 4 }
 0x14e   :  { %v520_v60 = vrot.slane %v519_v0, 1  ;;  %v533_v42 = vadd.f32 %v532_v1, %v531_v50  ;;  %v1646_v2 = vsel %vm143_vm0, %v1218_v63, 0.0  ;;  %v1653_v12 = vsel %vm143_vm0, %v1219_v3, 0.0 }
 0x14f   :  { %v527_v6 = vrot.slane %v526_v38, 1  ;;  %v5455_v15 = vmul.f32 0.125, %v514_v59  ;;  %v1635_v33 = vrot.slane %v1634_v13, 2  ;;  %v1641_v23 = vadd.f32 %v1640_v32, %v1639_v4 }
 0x150   :  { %v521_v5 = vadd.f32 %v520_v60, %v519_v0  ;;  %v534_v11 = vrot.slane %v533_v42, 1  ;;  %v1647_v17 = vrot.slane %v1646_v2, 4  ;;  %v1654_v43 = vrot.slane %v1653_v12, 4  ;;  %v2799_v60 = vld [vmem:[%s6971_s2 + $0x140] sm:$0xff] }
 0x151   :  { %v528_v46 = vadd.f32 %v527_v6, %v526_v38  ;;  %v1636_v7 = vadd.f32 %v1635_v33, %v1634_v13  ;;  %v1642_v8 = vrot.slane %v1641_v23, 2  ;;  %v1660_v24 = vsel %vm143_vm0, %v1220_v62, 0.0 }
 0x152   :  { %v535_v36 = vadd.f32 %v534_v11, %v533_v42  ;;  %v5461_v19 = vmul.f32 0.125, %v521_v5  ;;  %v1648_v27 = vadd.f32 %v1647_v17, %v1646_v2  ;;  %v1655_v28 = vadd.f32 %v1654_v43, %v1653_v12 }
 0x153   :  { %v5463_v37 = vmul.f32 0.125, %v528_v46  ;;  %v1637_v48 = vrot.slane %v1636_v7, 1  ;;  %v1643_v29 = vadd.f32 %v1642_v8, %v1641_v23  ;;  %v1661_v18 = vrot.slane %v1660_v24, 4  ;;  %v2800_v46 = vld [vmem:[%s6971_s2 + $0x148] sm:$0xff] }
 0x154   :  { %v5471_v34 = vmul.f32 0.125, %v535_v36  ;;  %v1649_v35 = vrot.slane %v1648_v27, 2  ;;  %v1656_v14 = vrot.slane %v1655_v28, 2  ;;  %v1667_v56 = vsel %vm143_vm0, %v1221_v21, 0.0 }
 0x155   :  { %v1638_v49 = vadd.f32 %v1637_v48, %v1636_v7  ;;  %v1644_v9 = vrot.slane %v1643_v29, 1  ;;  %v1662_v20 = vadd.f32 %v1661_v18, %v1660_v24  ;;  %v1668_v44 = vrot.slane %v1667_v56, 4 }
 0x156   :  { %v1650_v22 = vadd.f32 %v1649_v35, %v1648_v27  ;;  %v1657_v47 = vadd.f32 %v1656_v14, %v1655_v28  ;;  %v1674_v50 = vsel %vm143_vm0, %v1222_v30, 0.0  ;;  %v1681_v25 = vsel %vm143_vm0, %v1223_v26, 0.0  ;;  %v2801_v35 = vld [vmem:[%s6971_s2 + $0x150] sm:$0xff] }
 0x157   :  { %v1645_v52 = vadd.f32 %v1644_v9, %v1643_v29  ;;  %v1663_v53 = vrot.slane %v1662_v20, 2  ;;  %v1669_v63 = vadd.f32 %v1668_v44, %v1667_v56  ;;  %v1675_v3 = vrot.slane %v1674_v50, 4 }
 0x158   :  { %v1651_v10 = vrot.slane %v1650_v22, 1  ;;  %v1658_v0 = vrot.slane %v1657_v47, 1  ;;  %v1682_v1 = vrot.slane %v1681_v25, 4  ;;  %v2240_v4 = vmul.f32 0.125, %v1638_v49 }
 0x159   :  { %v1664_v59 = vadd.f32 %v1663_v53, %v1662_v20  ;;  %v1670_v38 = vrot.slane %v1669_v63, 2  ;;  %v1676_v13 = vadd.f32 %v1675_v3, %v1674_v50  ;;  %v2241_v32 = vmul.f32 0.125, %v1645_v52 }
 0x15a   :  { %v1652_v42 = vadd.f32 %v1651_v10, %v1650_v22  ;;  %v1659_v62 = vadd.f32 %v1658_v0, %v1657_v47  ;;  %v1683_v2 = vadd.f32 %v1682_v1, %v1681_v25  ;;  %v2368_v12 = vmul.f32 %v2240_v4, %v5431_v45  ;;  %v2802_v25 = vld [vmem:[%s6971_s2 + $0x158] sm:$0xff]  ;;  %v2803_v4 = vld [vmem:[%s6971_s2 + $0x160] sm:$0xff] }
 0x15b   :  { %v1665_v6 = vrot.slane %v1664_v59, 1  ;;  %v1671_v33 = vadd.f32 %v1670_v38, %v1669_v63  ;;  %v1677_v23 = vrot.slane %v1676_v13, 2  ;;  %v2369_v5 = vmul.f32 %v2241_v32, %v5433_v41 }
 0x15c   :  { %v1684_v11 = vrot.slane %v1683_v2, 2  ;;  %v2242_v17 = vmul.f32 0.125, %v1652_v42  ;;  %v2243_v43 = vmul.f32 0.125, %v1659_v62  ;;  %v3167_v21 = vsel %vm143_vm0, %v2799_v60, 0.0 }
 0x15d   :  { %v1666_v7 = vadd.f32 %v1665_v6, %v1664_v59  ;;  %v1672_v8 = vrot.slane %v1671_v33, 1  ;;  %v1678_v24 = vadd.f32 %v1677_v23, %v1676_v13  ;;  %v2625_v36 = vsel %vm2576_vm1, %v2369_v5, %v2368_v12 }
 0x15e   :  { %v1685_v27 = vadd.f32 %v1684_v11, %v1683_v2  ;;  %v2370_v28 = vmul.f32 %v2242_v17, %v5439_v54  ;;  %v2371_v30 = vmul.f32 %v2243_v43, %v5447_v57  ;;  %v3168_v26 = vrot.slane %v3167_v21, 4  ;;  %v2804_v2 = vld [vmem:[%s6971_s2 + $0x168] sm:$0xff]  ;;  %v2805_v43 = vld [vmem:[%s6971_s2 + $0x170] sm:$0xff] }
 0x15f   :  { %v1673_v48 = vadd.f32 %v1672_v8, %v1671_v33  ;;  %v1679_v29 = vrot.slane %v1678_v24, 1  ;;  %v2244_v18 = vmul.f32 0.125, %v1666_v7  ;;  %v3174_v14 = vsel %vm143_vm0, %v2800_v46, 0.0  ;;  %v2806_v46 = vld [vmem:[%s6971_s2 + $0x178] sm:$0xff] }
 0x160   :  { %v1686_v56 = vrot.slane %v1685_v27, 1  ;;  %v2626_v49 = vsel %vm2578_vm2, %v2370_v28, %v2625_v36  ;;  %v3169_v9 = vadd.f32 %v3168_v26, %v3167_v21  ;;  %v3175_v20 = vrot.slane %v3174_v14, 4 }
 0x161   :  { %v1680_v44 = vadd.f32 %v1679_v29, %v1678_v24  ;;  %v2245_v22 = vmul.f32 0.125, %v1673_v48  ;;  %v2372_v47 = vmul.f32 %v2244_v18, %v5455_v15  ;;  %v2627_v50 = vsel %vm2580_vm3, %v2371_v30, %v2626_v49 }
 0x162   :  { %v1687_v52 = vadd.f32 %v1686_v56, %v1685_v27  ;;  %v3170_v53 = vrot.slane %v3169_v9, 2  ;;  %v3176_v63 = vadd.f32 %v3175_v20, %v3174_v14  ;;  %v3181_v3 = vsel %vm143_vm0, %v2801_v35, 0.0 }
 0x163   :  { %v2246_v10 = vmul.f32 0.125, %v1680_v44  ;;  %v2373_v0 = vmul.f32 %v2245_v22, %v5461_v19  ;;  %v2628_v1 = vsel %vm2582_vm4, %v2372_v47, %v2627_v50  ;;  %v3182_v59 = vrot.slane %v3181_v3, 4 }
 0x164   :  { %v2247_v38 = vmul.f32 0.125, %v1687_v52  ;;  %v3171_v13 = vadd.f32 %v3170_v53, %v3169_v9  ;;  %v3177_v32 = vrot.slane %v3176_v63, 2  ;;  %v3188_v60 = vsel %vm143_vm0, %v2802_v25, 0.0 }
 0x165   :  { %v2374_v42 = vmul.f32 %v2246_v10, %v5463_v37  ;;  %v2629_v62 = vsel %vm2584_vm5, %v2373_v0, %v2628_v1  ;;  %v3183_v12 = vadd.f32 %v3182_v59, %v3181_v3  ;;  %v3189_v6 = vrot.slane %v3188_v60, 4  ;;  %v71_v10 = vld [vmem:[%s6969_s0 + $0x1c0] sm:$0xff] }
 0x166   :  { %v2375_v33 = vmul.f32 %v2247_v38, %v5471_v34  ;;  %v3172_v23 = vrot.slane %v3171_v13, 1  ;;  %v3178_v5 = vadd.f32 %v3177_v32, %v3176_v63  ;;  %v3195_v11 = vsel %vm143_vm0, %v2803_v4, 0.0 }
 0x167   :  { %v2630_v17 = vsel %vm2586_vm6, %v2374_v42, %v2629_v62  ;;  %v3184_v21 = vrot.slane %v3183_v12, 2  ;;  %v3190_v7 = vadd.f32 %v3189_v6, %v3188_v60  ;;  %v3196_v8 = vrot.slane %v3195_v11, 4  ;;  %v72_v42 = vld [vmem:[%s6969_s0 + $0x1c8] sm:$0xff] }
 0x168   :  { %v2631_v24 = vsel %vm2588_vm7, %v2375_v33, %v2630_v17  ;;  %v3173_v36 = vadd.f32 %v3172_v23, %v3171_v13  ;;  %v3179_v27 = vrot.slane %v3178_v5, 1  ;;  %v3202_v28 = vsel %vm143_vm0, %v2804_v2, 0.0  ;;  %v73_v17 = vld [vmem:[%s6969_s0 + $0x1d0] sm:$0xff] }
 0x169   :  { %v2729_v30 = vsel %vm143_vm0, %v2631_v24, 0.0  ;;  %v3185_v26 = vadd.f32 %v3184_v21, %v3183_v12  ;;  %v3191_v48 = vrot.slane %v3190_v7, 2  ;;  %v3197_v29 = vadd.f32 %v3196_v8, %v3195_v11 }
 0x16a   :  { %2730 = vadd.xlane.f32.xlu0 %v2729_v30  ;;  %v3180_v18 = vadd.f32 %v3179_v27, %v3178_v5  ;;  %v3203_v35 = vrot.slane %v3202_v28, 4  ;;  %v3209_v14 = vsel %vm143_vm0, %v2805_v43, 0.0  ;;  %v3216_v56 = vsel %vm143_vm0, %v2806_v46, 0.0 }
 0x16b   :  { %v3186_v49 = vrot.slane %v3185_v26, 1  ;;  %v3192_v9 = vadd.f32 %v3191_v48, %v3190_v7  ;;  %v3198_v20 = vrot.slane %v3197_v29, 2  ;;  %v3210_v44 = vrot.slane %v3209_v14, 4 }
 0x16c   :  { %v3204_v22 = vadd.f32 %v3203_v35, %v3202_v28  ;;  %v3217_v47 = vrot.slane %v3216_v56, 4  ;;  %v3823_v50 = vmul.f32 0.125, %v3173_v36  ;;  %v3824_v25 = vmul.f32 0.125, %v3180_v18 }
 0x16d   :  { %v3187_v52 = vadd.f32 %v3186_v49, %v3185_v26  ;;  %v3193_v53 = vrot.slane %v3192_v9, 1  ;;  %v3199_v63 = vadd.f32 %v3198_v20, %v3197_v29  ;;  %v3211_v3 = vadd.f32 %v3210_v44, %v3209_v14 }
 0x16e   :  { %v3205_v0 = vrot.slane %v3204_v22, 2  ;;  %v3218_v1 = vadd.f32 %v3217_v47, %v3216_v56  ;;  %v3951_v4 = vmul.f32 %v3823_v50, %v5287_v39  ;;  %v3952_v59 = vmul.f32 %v3824_v25, %v5292_v58 }
 0x16f   :  { %v3194_v38 = vadd.f32 %v3193_v53, %v3192_v9  ;;  %v3200_v13 = vrot.slane %v3199_v63, 1  ;;  %v3212_v32 = vrot.slane %v3211_v3, 2  ;;  %v3825_v60 = vmul.f32 0.125, %v3187_v52  ;;  %v76_v53 = vld [vmem:[%s6969_s0 + $0x1e8] sm:$0xff] }
 0x170   :  { %v3206_v62 = vadd.f32 %v3205_v0, %v3204_v22  ;;  %v3219_v2 = vrot.slane %v3218_v1, 2  ;;  %v4202_v12 = vsel %vm2576_vm1, %v3952_v59, %v3951_v4  ;;  %v536_v6 = vsel %vm143_vm0, %v71_v10, 0.0 }
 0x171   :  { %v3201_v33 = vadd.f32 %v3200_v13, %v3199_v63  ;;  %v3213_v23 = vadd.f32 %v3212_v32, %v3211_v3  ;;  %v3826_v5 = vmul.f32 0.125, %v3194_v38  ;;  %v3953_v39 = vmul.f32 %v3825_v60, %v5295_v61  ;;  %v74_v61 = vld [vmem:[%s6969_s0 + $0x1d8] sm:$0xff] }
 0x172   :  { %v3207_v58 = vrot.slane %v3206_v62, 1  ;;  %v3220_v11 = vadd.f32 %v3219_v2, %v3218_v1  ;;  %v537_v43 = vrot.slane %v536_v6, 4  ;;  %v543_v46 = vsel %vm143_vm0, %v72_v42, 0.0  ;;  %v78_v38 = vld [vmem:[%s6969_s0 + $0x1f8] sm:$0xff] }
 0x173   :  { %v3214_v21 = vrot.slane %v3213_v23, 1  ;;  %v3827_v7 = vmul.f32 0.125, %v3201_v33  ;;  %v3954_v8 = vmul.f32 %v3826_v5, %v5301_v16  ;;  %v4203_v24 = vsel %vm2578_vm2, %v3953_v39, %v4202_v12  ;;  %v75_v16 = vld [vmem:[%s6969_s0 + $0x1e0] sm:$0xff] }
 0x174   :  { %v3208_v36 = vadd.f32 %v3207_v58, %v3206_v62  ;;  %v3221_v27 = vrot.slane %v3220_v11, 1  ;;  %v538_v28 = vadd.f32 %v537_v43, %v536_v6  ;;  %v544_v30 = vrot.slane %v543_v46, 4 }
 0x175   :  { %v3215_v26 = vadd.f32 %v3214_v21, %v3213_v23  ;;  %v3955_v48 = vmul.f32 %v3827_v7, %v5309_v51  ;;  %v4204_v29 = vsel %vm2580_vm3, %v3954_v8, %v4203_v24  ;;  %v550_v18 = vsel %vm143_vm0, %v73_v17, 0.0  ;;  %v1224_v7 = vld [vmem:[%s6970_s1 + $0x1c0] sm:$0xff]  ;;  %v1225_v8 = vld [vmem:[%s6970_s1 + $0x1c8] sm:$0xff] }
 0x176   :  { %v3222_v35 = vadd.f32 %v3221_v27, %v3220_v11  ;;  %v3828_v14 = vmul.f32 0.125, %v3208_v36  ;;  %v539_v56 = vrot.slane %v538_v28, 2  ;;  %v545_v49 = vadd.f32 %v544_v30, %v543_v46 }
 0x177   :  { %v3829_v9 = vmul.f32 0.125, %v3215_v26  ;;  %v4205_v20 = vsel %vm2582_vm4, %v3955_v48, %v4204_v29  ;;  %v551_v44 = vrot.slane %v550_v18, 4  ;;  %v557_v22 = vsel %vm143_vm0, %v74_v61, 0.0 }
 0x178   :  { %v3830_v47 = vmul.f32 0.125, %v3222_v35  ;;  %v3956_v51 = vmul.f32 %v3828_v14, %v5317_v31  ;;  %v540_v50 = vadd.f32 %v539_v56, %v538_v28  ;;  %v546_v25 = vrot.slane %v545_v49, 2  ;;  %v1226_v35 = vld [vmem:[%s6970_s1 + $0x1d0] sm:$0xff] }
 0x179   :  { %v3957_v52 = vmul.f32 %v3829_v9, %v5319_v40  ;;  %v552_v63 = vadd.f32 %v551_v44, %v550_v18  ;;  %v558_v3 = vrot.slane %v557_v22, 4  ;;  %v564_v10 = vsel %vm143_vm0, %v75_v16, 0.0  ;;  %v77_v40 = vld [vmem:[%s6969_s0 + $0x1f0] sm:$0xff] }
 0x17a   :  { %v3958_v0 = vmul.f32 %v3830_v47, %v5328_v55  ;;  %v4206_v1 = vsel %vm2584_vm5, %v3956_v51, %v4205_v20  ;;  %v541_v4 = vrot.slane %v540_v50, 1  ;;  %v547_v59 = vadd.f32 %v546_v25, %v545_v49  ;;  %v1227_v47 = vld [vmem:[%s6970_s1 + $0x1d8] sm:$0xff] }
 0x17b   :  { %v4207_v31 = vsel %vm2586_vm6, %v3957_v52, %v4206_v1  ;;  %v553_v13 = vrot.slane %v552_v63, 2  ;;  %v559_v32 = vadd.f32 %v558_v3, %v557_v22  ;;  %v565_v60 = vrot.slane %v564_v10, 4 }
 0x17c   :  { %v4208_v42 = vsel %vm2588_vm7, %v3958_v0, %v4207_v31  ;;  %v542_v55 = vadd.f32 %v541_v4, %v540_v50  ;;  %v548_v62 = vrot.slane %v547_v59, 1  ;;  %v571_v2 = vsel %vm143_vm0, %v76_v53, 0.0  ;;  %v1228_v0 = vld [vmem:[%s6970_s1 + $0x1e0] sm:$0xff] }
 0x17d   :  { %v4310_v12 = vsel %vm143_vm0, %v4208_v42, 0.0  ;;  %v554_v6 = vadd.f32 %v553_v13, %v552_v63  ;;  %v560_v33 = vrot.slane %v559_v32, 2  ;;  %v566_v23 = vadd.f32 %v565_v60, %v564_v10 }
 0x17e   :  { %4311 = vadd.xlane.f32.xlu1 %v4310_v12  ;;  %v549_v5 = vadd.f32 %v548_v62, %v547_v59  ;;  %v572_v39 = vrot.slane %v571_v2, 4  ;;  %v578_v58 = vsel %vm143_vm0, %v77_v40, 0.0  ;;  %v585_v11 = vsel %vm143_vm0, %v78_v38, 0.0  ;;  %v1229_v62 = vld [vmem:[%s6970_s1 + $0x1e8] sm:$0xff] }
 0x17f   :  { %v555_v17 = vrot.slane %v554_v6, 1  ;;  %v561_v43 = vadd.f32 %v560_v33, %v559_v32  ;;  %v567_v46 = vrot.slane %v566_v23, 2  ;;  %v579_v21 = vrot.slane %v578_v58, 4 }
 0x180   :  { %v573_v24 = vadd.f32 %v572_v39, %v571_v2  ;;  %v586_v36 = vrot.slane %v585_v11, 4  ;;  %v5578_v27 = vmul.f32 0.125, %v542_v55  ;;  %v5580_v61 = vmul.f32 0.125, %v549_v5 }
 0x181   :  { %v556_v28 = vadd.f32 %v555_v17, %v554_v6  ;;  %v562_v30 = vrot.slane %v561_v43, 1  ;;  %v568_v26 = vadd.f32 %v567_v46, %v566_v23  ;;  %v580_v48 = vadd.f32 %v579_v21, %v578_v58  ;;  %v1231_v17 = vld [vmem:[%s6970_s1 + $0x1f8] sm:$0xff] }
 0x182   :  { %v574_v29 = vrot.slane %v573_v24, 2  ;;  %v587_v18 = vadd.f32 %v586_v36, %v585_v11  ;;  %v1688_v14 = vsel %vm143_vm0, %v1224_v7, 0.0  ;;  %v1695_v16 = vsel %vm143_vm0, %v1225_v8, 0.0  ;;  %v1230_v11 = vld [vmem:[%s6970_s1 + $0x1f0] sm:$0xff] }
 0x183   :  { %v563_v56 = vadd.f32 %v562_v30, %v561_v43  ;;  %v569_v49 = vrot.slane %v568_v26, 1  ;;  %v581_v9 = vrot.slane %v580_v48, 2  ;;  %v5587_v20 = vmul.f32 0.125, %v556_v28 }
 0x184   :  { %v575_v44 = vadd.f32 %v574_v29, %v573_v24  ;;  %v588_v22 = vrot.slane %v587_v18, 2  ;;  %v1689_v51 = vrot.slane %v1688_v14, 4  ;;  %v1696_v50 = vrot.slane %v1695_v16, 4 }
 0x185   :  { %v570_v25 = vadd.f32 %v569_v49, %v568_v26  ;;  %v582_v52 = vadd.f32 %v581_v9, %v580_v48  ;;  %v5592_v53 = vmul.f32 0.125, %v563_v56  ;;  %v1702_v63 = vsel %vm143_vm0, %v1226_v35, 0.0 }
 0x186   :  { %v576_v3 = vrot.slane %v575_v44, 1  ;;  %v589_v10 = vadd.f32 %v588_v22, %v587_v18  ;;  %v1690_v1 = vadd.f32 %v1689_v51, %v1688_v14  ;;  %v1697_v4 = vadd.f32 %v1696_v50, %v1695_v16 }
 0x187   :  { %v583_v59 = vrot.slane %v582_v52, 1  ;;  %v5598_v31 = vmul.f32 0.125, %v570_v25  ;;  %v1703_v40 = vrot.slane %v1702_v63, 4  ;;  %v1709_v38 = vsel %vm143_vm0, %v1227_v47, 0.0 }
 0x188   :  { %v577_v13 = vadd.f32 %v576_v3, %v575_v44  ;;  %v590_v32 = vrot.slane %v589_v10, 1  ;;  %v1691_v60 = vrot.slane %v1690_v1, 2  ;;  %v1698_v42 = vrot.slane %v1697_v4, 2  ;;  %v2807_v3 = vld [vmem:[%s6971_s2 + $0x180] sm:$0xff] }
 0x189   :  { %v584_v55 = vadd.f32 %v583_v59, %v582_v52  ;;  %v1704_v2 = vadd.f32 %v1703_v40, %v1702_v63  ;;  %v1710_v12 = vrot.slane %v1709_v38, 4  ;;  %v1716_v6 = vsel %vm143_vm0, %v1228_v0, 0.0 }
 0x18a   :  { %v591_v33 = vadd.f32 %v590_v32, %v589_v10  ;;  %v5605_v23 = vmul.f32 0.125, %v577_v13  ;;  %v1692_v5 = vadd.f32 %v1691_v60, %v1690_v1  ;;  %v1699_v39 = vadd.f32 %v1698_v42, %v1697_v4  ;;  %v2808_v32 = vld [vmem:[%s6971_s2 + $0x188] sm:$0xff] }
 0x18b   :  { %v5607_v58 = vmul.f32 0.125, %v584_v55  ;;  %v1705_v43 = vrot.slane %v1704_v2, 2  ;;  %v1711_v46 = vadd.f32 %v1710_v12, %v1709_v38  ;;  %v1717_v21 = vrot.slane %v1716_v6, 4 }
 0x18c   :  { %v5615_v7 = vmul.f32 0.125, %v591_v33  ;;  %v1693_v8 = vrot.slane %v1692_v5, 1  ;;  %v1700_v24 = vrot.slane %v1699_v39, 1  ;;  %v1723_v36 = vsel %vm143_vm0, %v1229_v62, 0.0 }
 0x18d   :  { %v1706_v28 = vadd.f32 %v1705_v43, %v1704_v2  ;;  %v1712_v30 = vrot.slane %v1711_v46, 2  ;;  %v1718_v26 = vadd.f32 %v1717_v21, %v1716_v6  ;;  %v1724_v48 = vrot.slane %v1723_v36, 4 }
 0x18e   :  { %v1694_v29 = vadd.f32 %v1693_v8, %v1692_v5  ;;  %v1701_v18 = vadd.f32 %v1700_v24, %v1699_v39  ;;  %v1730_v35 = vsel %vm143_vm0, %v1230_v11, 0.0  ;;  %v1737_v14 = vsel %vm143_vm0, %v1231_v17, 0.0  ;;  %v2809_v11 = vld [vmem:[%s6971_s2 + $0x190] sm:$0xff] }
 0x18f   :  { %v1707_v16 = vrot.slane %v1706_v28, 1  ;;  %v1713_v56 = vadd.f32 %v1712_v30, %v1711_v46  ;;  %v1719_v49 = vrot.slane %v1718_v26, 2  ;;  %v1725_v9 = vadd.f32 %v1724_v48, %v1723_v36  ;;  %v2810_v30 = vld [vmem:[%s6971_s2 + $0x198] sm:$0xff] }
 0x190   :  { %v1731_v44 = vrot.slane %v1730_v35, 4  ;;  %v1738_v22 = vrot.slane %v1737_v14, 4  ;;  %v2248_v47 = vmul.f32 0.125, %v1694_v29  ;;  %v2249_v51 = vmul.f32 0.125, %v1701_v18 }
 0x191   :  { %v1708_v50 = vadd.f32 %v1707_v16, %v1706_v28  ;;  %v1714_v25 = vrot.slane %v1713_v56, 1  ;;  %v1720_v52 = vadd.f32 %v1719_v49, %v1718_v26  ;;  %v1726_v63 = vrot.slane %v1725_v9, 2  ;;  %v2811_v49 = vld [vmem:[%s6971_s2 + $0x1a0] sm:$0xff] }
 0x192   :  { %v1732_v10 = vadd.f32 %v1731_v44, %v1730_v35  ;;  %v1739_v0 = vadd.f32 %v1738_v22, %v1737_v14  ;;  %v2376_v1 = vmul.f32 %v2248_v47, %v5578_v27  ;;  %v2377_v4 = vmul.f32 %v2249_v51, %v5580_v61 }
 0x193   :  { %v1715_v59 = vadd.f32 %v1714_v25, %v1713_v56  ;;  %v1721_v40 = vrot.slane %v1720_v52, 1  ;;  %v1727_v38 = vadd.f32 %v1726_v63, %v1725_v9  ;;  %v2250_v13 = vmul.f32 0.125, %v1708_v50  ;;  %v2812_v63 = vld [vmem:[%s6971_s2 + $0x1a8] sm:$0xff] }
 0x194   :  { %v1733_v60 = vrot.slane %v1732_v10, 2  ;;  %v1740_v42 = vrot.slane %v1739_v0, 2  ;;  %v2632_v55 = vsel %vm2576_vm1, %v2377_v4, %v2376_v1  ;;  %v3223_v62 = vsel %vm143_vm0, %v2807_v3, 0.0 }
 0x195   :  { %v1722_v2 = vadd.f32 %v1721_v40, %v1720_v52  ;;  %v1728_v12 = vrot.slane %v1727_v38, 1  ;;  %v2251_v6 = vmul.f32 0.125, %v1715_v59  ;;  %v2378_v33 = vmul.f32 %v2250_v13, %v5587_v20 }
 0x196   :  { %v1734_v5 = vadd.f32 %v1733_v60, %v1732_v10  ;;  %v1741_v39 = vadd.f32 %v1740_v42, %v1739_v0  ;;  %v3224_v17 = vrot.slane %v3223_v62, 4  ;;  %v3230_v43 = vsel %vm143_vm0, %v2808_v32, 0.0  ;;  %v2813_v60 = vld [vmem:[%s6971_s2 + $0x1b0] sm:$0xff] }
 0x197   :  { %v1729_v46 = vadd.f32 %v1728_v12, %v1727_v38  ;;  %v2252_v21 = vmul.f32 0.125, %v1722_v2  ;;  %v2379_v8 = vmul.f32 %v2251_v6, %v5592_v53  ;;  %v2633_v24 = vsel %vm2578_vm2, %v2378_v33, %v2632_v55 }
 0x198   :  { %v1735_v36 = vrot.slane %v1734_v5, 1  ;;  %v1742_v28 = vrot.slane %v1741_v39, 1  ;;  %v3225_v26 = vadd.f32 %v3224_v17, %v3223_v62  ;;  %v3231_v48 = vrot.slane %v3230_v43, 4 }
 0x199   :  { %v2253_v29 = vmul.f32 0.125, %v1729_v46  ;;  %v2380_v18 = vmul.f32 %v2252_v21, %v5598_v31  ;;  %v2634_v35 = vsel %vm2580_vm3, %v2379_v8, %v2633_v24  ;;  %v3237_v14 = vsel %vm143_vm0, %v2809_v11, 0.0  ;;  %v2814_v11 = vld [vmem:[%s6971_s2 + $0x1b8] sm:$0xff] }
 0x19a   :  { %v1736_v16 = vadd.f32 %v1735_v36, %v1734_v5  ;;  %v1743_v56 = vadd.f32 %v1742_v28, %v1741_v39  ;;  %v3226_v9 = vrot.slane %v3225_v26, 2  ;;  %v3232_v44 = vadd.f32 %v3231_v48, %v3230_v43 }
 0x19b   :  { %v2381_v22 = vmul.f32 %v2253_v29, %v5605_v23  ;;  %v2635_v47 = vsel %vm2582_vm4, %v2380_v18, %v2634_v35  ;;  %v3238_v51 = vrot.slane %v3237_v14, 4  ;;  %v3244_v50 = vsel %vm143_vm0, %v2810_v30, 0.0 }
 0x19c   :  { %v2254_v25 = vmul.f32 0.125, %v1736_v16  ;;  %v2255_v52 = vmul.f32 0.125, %v1743_v56  ;;  %v3227_v3 = vadd.f32 %v3226_v9, %v3225_v26  ;;  %v3233_v10 = vrot.slane %v3232_v44, 2 }
 0x19d   :  { %v2636_v0 = vsel %vm2584_vm5, %v2381_v22, %v2635_v47  ;;  %v3239_v1 = vadd.f32 %v3238_v51, %v3237_v14  ;;  %v3245_v4 = vrot.slane %v3244_v50, 4  ;;  %v3251_v59 = vsel %vm143_vm0, %v2811_v49, 0.0 }
 0x19e   :  { %v2382_v40 = vmul.f32 %v2254_v25, %v5607_v58  ;;  %v2383_v38 = vmul.f32 %v2255_v52, %v5615_v7  ;;  %v3228_v13 = vrot.slane %v3227_v3, 1  ;;  %v3234_v32 = vadd.f32 %v3233_v10, %v3232_v44  ;;  %v79_v44 = vld [vmem:[%s6969_s0 + $0x200] sm:$0xff]  ;;  %v80_v10 = vld [vmem:[%s6969_s0 + $0x208] sm:$0xff] }
 0x19f   :  { %v3240_v42 = vrot.slane %v3239_v1, 2  ;;  %v3246_v55 = vadd.f32 %v3245_v4, %v3244_v50  ;;  %v3252_v62 = vrot.slane %v3251_v59, 4  ;;  %v3258_v2 = vsel %vm143_vm0, %v2812_v63, 0.0 }
 0x1a0   :  { %v2637_v12 = vsel %vm2586_vm6, %v2382_v40, %v2636_v0  ;;  %v3229_v6 = vadd.f32 %v3228_v13, %v3227_v3  ;;  %v3235_v33 = vrot.slane %v3234_v32, 1  ;;  %v3259_v5 = vrot.slane %v3258_v2, 4 }
 0x1a1   :  { %v2638_v39 = vsel %vm2588_vm7, %v2383_v38, %v2637_v12  ;;  %v3241_v17 = vadd.f32 %v3240_v42, %v3239_v1  ;;  %v3247_v43 = vrot.slane %v3246_v55, 2  ;;  %v3253_v46 = vadd.f32 %v3252_v62, %v3251_v59 }
 0x1a2   :  { %v2732_v21 = vsel %vm143_vm0, %v2638_v39, 0.0  ;;  %v3236_v8 = vadd.f32 %v3235_v33, %v3234_v32  ;;  %v3260_v24 = vadd.f32 %v3259_v5, %v3258_v2  ;;  %v3265_v36 = vsel %vm143_vm0, %v2813_v60, 0.0  ;;  %v81_v60 = vld [vmem:[%s6969_s0 + $0x210] sm:$0xff] }
 0x1a3   :  { %2733 = vadd.xlane.f32.xlu0 %v2732_v21  ;;  %v3242_v28 = vrot.slane %v3241_v17, 1  ;;  %v3248_v30 = vadd.f32 %v3247_v43, %v3246_v55  ;;  %v3254_v26 = vrot.slane %v3253_v46, 2  ;;  %v3266_v48 = vrot.slane %v3265_v36, 4 }
 0x1a4   :  { %v3261_v29 = vrot.slane %v3260_v24, 2  ;;  %v3272_v18 = vsel %vm143_vm0, %v2814_v11, 0.0  ;;  %v3831_v35 = vmul.f32 0.125, %v3229_v6  ;;  %v3832_v14 = vmul.f32 0.125, %v3236_v8 }
 0x1a5   :  { %v3243_v16 = vadd.f32 %v3242_v28, %v3241_v17  ;;  %v3249_v56 = vrot.slane %v3248_v30, 1  ;;  %v3255_v49 = vadd.f32 %v3254_v26, %v3253_v46  ;;  %v3267_v9 = vadd.f32 %v3266_v48, %v3265_v36 }
 0x1a6   :  { %v3262_v22 = vadd.f32 %v3261_v29, %v3260_v24  ;;  %v3273_v47 = vrot.slane %v3272_v18, 4  ;;  %v3959_v51 = vmul.f32 %v3831_v35, %v5431_v45  ;;  %v3960_v50 = vmul.f32 %v3832_v14, %v5433_v41  ;;  %v83_v24 = vld [vmem:[%s6969_s0 + $0x220] sm:$0xff]  ;;  %v84_v35 = vld [vmem:[%s6969_s0 + $0x228] sm:$0xff] }
 0x1a7   :  { %v3250_v25 = vadd.f32 %v3249_v56, %v3248_v30  ;;  %v3256_v52 = vrot.slane %v3255_v49, 1  ;;  %v3268_v63 = vrot.slane %v3267_v9, 2  ;;  %v3833_v3 = vmul.f32 0.125, %v3243_v16 }
 0x1a8   :  { %v3263_v0 = vrot.slane %v3262_v22, 1  ;;  %v3274_v1 = vadd.f32 %v3273_v47, %v3272_v18  ;;  %v4209_v4 = vsel %vm2576_vm1, %v3960_v50, %v3959_v51  ;;  %v592_v59 = vsel %vm143_vm0, %v79_v44, 0.0 }
 0x1a9   :  { %v3257_v40 = vadd.f32 %v3256_v52, %v3255_v49  ;;  %v3269_v38 = vadd.f32 %v3268_v63, %v3267_v9  ;;  %v3834_v13 = vmul.f32 0.125, %v3250_v25  ;;  %v3961_v45 = vmul.f32 %v3833_v3, %v5439_v54  ;;  %v82_v54 = vld [vmem:[%s6969_s0 + $0x218] sm:$0xff] }
 0x1aa   :  { %v3264_v41 = vadd.f32 %v3263_v0, %v3262_v22  ;;  %v3275_v32 = vrot.slane %v3274_v1, 2  ;;  %v593_v42 = vrot.slane %v592_v59, 4  ;;  %v599_v55 = vsel %vm143_vm0, %v80_v10, 0.0  ;;  %v85_v22 = vld [vmem:[%s6969_s0 + $0x230] sm:$0xff] }
 0x1ab   :  { %v3270_v62 = vrot.slane %v3269_v38, 1  ;;  %v3835_v2 = vmul.f32 0.125, %v3257_v40  ;;  %v3962_v12 = vmul.f32 %v3834_v13, %v5447_v57  ;;  %v4210_v6 = vsel %vm2578_vm2, %v3961_v45, %v4209_v4  ;;  %v86_v4 = vld [vmem:[%s6969_s0 + $0x238] sm:$0xff] }
 0x1ac   :  { %v3276_v33 = vadd.f32 %v3275_v32, %v3274_v1  ;;  %v3836_v5 = vmul.f32 0.125, %v3264_v41  ;;  %v594_v39 = vadd.f32 %v593_v42, %v592_v59  ;;  %v600_v11 = vrot.slane %v599_v55, 4 }
 0x1ad   :  { %v3271_v17 = vadd.f32 %v3270_v62, %v3269_v38  ;;  %v3963_v43 = vmul.f32 %v3835_v2, %v5455_v15  ;;  %v4211_v46 = vsel %vm2580_vm3, %v3962_v12, %v4210_v6  ;;  %v606_v21 = vsel %vm143_vm0, %v81_v60, 0.0  ;;  %v1232_v2 = vld [vmem:[%s6970_s1 + $0x200] sm:$0xff] }
 0x1ae   :  { %v3277_v8 = vrot.slane %v3276_v33, 1  ;;  %v3964_v57 = vmul.f32 %v3836_v5, %v5461_v19  ;;  %v595_v36 = vrot.slane %v594_v39, 2  ;;  %v601_v28 = vadd.f32 %v600_v11, %v599_v55 }
 0x1af   :  { %v3837_v30 = vmul.f32 0.125, %v3271_v17  ;;  %v4212_v26 = vsel %vm2582_vm4, %v3963_v43, %v4211_v46  ;;  %v607_v48 = vrot.slane %v606_v21, 4  ;;  %v613_v29 = vsel %vm143_vm0, %v82_v54, 0.0  ;;  %v1233_v43 = vld [vmem:[%s6970_s1 + $0x208] sm:$0xff] }
 0x1b0   :  { %v3278_v15 = vadd.f32 %v3277_v8, %v3276_v33  ;;  %v4213_v18 = vsel %vm2584_vm5, %v3964_v57, %v4212_v26  ;;  %v596_v19 = vadd.f32 %v595_v36, %v594_v39  ;;  %v602_v14 = vrot.slane %v601_v28, 2  ;;  %v1234_v26 = vld [vmem:[%s6970_s1 + $0x210] sm:$0xff] }
 0x1b1   :  { %v3965_v16 = vmul.f32 %v3837_v30, %v5463_v37  ;;  %v608_v56 = vadd.f32 %v607_v48, %v606_v21  ;;  %v614_v49 = vrot.slane %v613_v29, 4  ;;  %v620_v9 = vsel %vm143_vm0, %v83_v24, 0.0 }
 0x1b2   :  { %v3838_v44 = vmul.f32 0.125, %v3278_v15  ;;  %v597_v47 = vrot.slane %v596_v19, 1  ;;  %v603_v51 = vadd.f32 %v602_v14, %v601_v28  ;;  %v621_v50 = vrot.slane %v620_v9, 4 }
 0x1b3   :  { %v4214_v25 = vsel %vm2586_vm6, %v3965_v16, %v4213_v18  ;;  %v609_v52 = vrot.slane %v608_v56, 2  ;;  %v615_v63 = vadd.f32 %v614_v49, %v613_v29  ;;  %v627_v3 = vsel %vm143_vm0, %v84_v35, 0.0  ;;  %v1235_v16 = vld [vmem:[%s6970_s1 + $0x218] sm:$0xff] }
 0x1b4   :  { %v3966_v37 = vmul.f32 %v3838_v44, %v5471_v34  ;;  %v598_v10 = vadd.f32 %v597_v47, %v596_v19  ;;  %v604_v0 = vrot.slane %v603_v51, 1  ;;  %v622_v1 = vadd.f32 %v621_v50, %v620_v9 }
 0x1b5   :  { %v610_v59 = vadd.f32 %v609_v52, %v608_v56  ;;  %v616_v40 = vrot.slane %v615_v63, 2  ;;  %v628_v38 = vrot.slane %v627_v3, 4  ;;  %v634_v13 = vsel %vm143_vm0, %v85_v22, 0.0  ;;  %v1236_v56 = vld [vmem:[%s6970_s1 + $0x220] sm:$0xff] }
 0x1b6   :  { %v4215_v45 = vsel %vm2588_vm7, %v3966_v37, %v4214_v25  ;;  %v605_v41 = vadd.f32 %v604_v0, %v603_v51  ;;  %v623_v32 = vrot.slane %v622_v1, 2  ;;  %v635_v60 = vrot.slane %v634_v13, 4 }
 0x1b7   :  { %v4313_v42 = vsel %vm143_vm0, %v4215_v45, 0.0  ;;  %v611_v34 = vrot.slane %v610_v59, 1  ;;  %v617_v55 = vadd.f32 %v616_v40, %v615_v63  ;;  %v629_v62 = vadd.f32 %v628_v38, %v627_v3  ;;  %v1237_v3 = vld [vmem:[%s6970_s1 + $0x228] sm:$0xff] }
 0x1b8   :  { %4314 = vadd.xlane.f32.xlu1 %v4313_v42  ;;  %v624_v12 = vadd.f32 %v623_v32, %v622_v1  ;;  %v636_v6 = vadd.f32 %v635_v60, %v634_v13  ;;  %v641_v33 = vsel %vm143_vm0, %v86_v4, 0.0  ;;  %v5719_v5 = vmul.f32 0.125, %v598_v10  ;;  %v1238_v13 = vld [vmem:[%s6970_s1 + $0x230] sm:$0xff] }
 0x1b9   :  { %v612_v54 = vadd.f32 %v611_v34, %v610_v59  ;;  %v618_v39 = vrot.slane %v617_v55, 1  ;;  %v630_v11 = vrot.slane %v629_v62, 2  ;;  %v642_v17 = vrot.slane %v641_v33, 4 }
 0x1ba   :  { %v625_v46 = vrot.slane %v624_v12, 1  ;;  %v637_v21 = vrot.slane %v636_v6, 2  ;;  %v5724_v8 = vmul.f32 0.125, %v605_v41  ;;  %v1744_v57 = vsel %vm143_vm0, %v1232_v2, 0.0 }
 0x1bb   :  { %v619_v24 = vadd.f32 %v618_v39, %v617_v55  ;;  %v631_v36 = vadd.f32 %v630_v11, %v629_v62  ;;  %v643_v28 = vadd.f32 %v642_v17, %v641_v33  ;;  %v5727_v30 = vmul.f32 0.125, %v612_v54  ;;  %v1239_v62 = vld [vmem:[%s6970_s1 + $0x238] sm:$0xff] }
 0x1bc   :  { %v626_v48 = vadd.f32 %v625_v46, %v624_v12  ;;  %v638_v29 = vadd.f32 %v637_v21, %v636_v6  ;;  %v1745_v15 = vrot.slane %v1744_v57, 4  ;;  %v1751_v18 = vsel %vm143_vm0, %v1233_v43, 0.0 }
 0x1bd   :  { %v632_v35 = vrot.slane %v631_v36, 1  ;;  %v644_v19 = vrot.slane %v643_v28, 2  ;;  %v5733_v14 = vmul.f32 0.125, %v619_v24  ;;  %v1752_v49 = vrot.slane %v1751_v18, 4 }
 0x1be   :  { %v639_v9 = vrot.slane %v638_v29, 1  ;;  %v5741_v44 = vmul.f32 0.125, %v626_v48  ;;  %v1746_v22 = vadd.f32 %v1745_v15, %v1744_v57  ;;  %v1758_v47 = vsel %vm143_vm0, %v1234_v26, 0.0 }
 0x1bf   :  { %v633_v51 = vadd.f32 %v632_v35, %v631_v36  ;;  %v645_v50 = vadd.f32 %v644_v19, %v643_v28  ;;  %v1753_v25 = vadd.f32 %v1752_v49, %v1751_v18  ;;  %v1759_v52 = vrot.slane %v1758_v47, 4 }
 0x1c0   :  { %v640_v63 = vadd.f32 %v639_v9, %v638_v29  ;;  %v1747_v37 = vrot.slane %v1746_v22, 2  ;;  %v1765_v10 = vsel %vm143_vm0, %v1235_v16, 0.0  ;;  %v1772_v0 = vsel %vm143_vm0, %v1236_v56, 0.0 }
 0x1c1   :  { %v646_v1 = vrot.slane %v645_v50, 1  ;;  %v5749_v4 = vmul.f32 0.125, %v633_v51  ;;  %v1754_v59 = vrot.slane %v1753_v25, 2  ;;  %v1760_v40 = vadd.f32 %v1759_v52, %v1758_v47  ;;  %v2815_v51 = vld [vmem:[%s6971_s2 + $0x1c0] sm:$0xff] }
 0x1c2   :  { %v5751_v38 = vmul.f32 0.125, %v640_v63  ;;  %v1748_v45 = vadd.f32 %v1747_v37, %v1746_v22  ;;  %v1766_v41 = vrot.slane %v1765_v10, 4  ;;  %v1773_v32 = vrot.slane %v1772_v0, 4 }
 0x1c3   :  { %v647_v60 = vadd.f32 %v646_v1, %v645_v50  ;;  %v1755_v42 = vadd.f32 %v1754_v59, %v1753_v25  ;;  %v1761_v34 = vrot.slane %v1760_v40, 2  ;;  %v1779_v55 = vsel %vm143_vm0, %v1237_v3, 0.0  ;;  %v2816_v1 = vld [vmem:[%s6971_s2 + $0x1c8] sm:$0xff] }
 0x1c4   :  { %v1749_v2 = vrot.slane %v1748_v45, 1  ;;  %v1767_v12 = vadd.f32 %v1766_v41, %v1765_v10  ;;  %v1774_v6 = vadd.f32 %v1773_v32, %v1772_v0  ;;  %v1780_v33 = vrot.slane %v1779_v55, 4 }
 0x1c5   :  { %v5760_v54 = vmul.f32 0.125, %v647_v60  ;;  %v1756_v39 = vrot.slane %v1755_v42, 1  ;;  %v1762_v11 = vadd.f32 %v1761_v34, %v1760_v40  ;;  %v1786_v17 = vsel %vm143_vm0, %v1238_v13, 0.0  ;;  %v2817_v34 = vld [vmem:[%s6971_s2 + $0x1d0] sm:$0xff] }
 0x1c6   :  { %v1750_v43 = vadd.f32 %v1749_v2, %v1748_v45  ;;  %v1768_v46 = vrot.slane %v1767_v12, 2  ;;  %v1775_v21 = vrot.slane %v1774_v6, 2  ;;  %v1781_v57 = vadd.f32 %v1780_v33, %v1779_v55 }
 0x1c7   :  { %v1757_v24 = vadd.f32 %v1756_v39, %v1755_v42  ;;  %v1763_v36 = vrot.slane %v1762_v11, 1  ;;  %v1787_v28 = vrot.slane %v1786_v17, 4  ;;  %v1793_v26 = vsel %vm143_vm0, %v1239_v62, 0.0 }
 0x1c8   :  { %v1769_v48 = vadd.f32 %v1768_v46, %v1767_v12  ;;  %v1776_v29 = vadd.f32 %v1775_v21, %v1774_v6  ;;  %v1782_v15 = vrot.slane %v1781_v57, 2  ;;  %v1794_v18 = vrot.slane %v1793_v26, 4 }
 0x1c9   :  { %v1764_v35 = vadd.f32 %v1763_v36, %v1762_v11  ;;  %v1788_v19 = vadd.f32 %v1787_v28, %v1786_v17  ;;  %v2256_v16 = vmul.f32 0.125, %v1750_v43  ;;  %v2257_v56 = vmul.f32 0.125, %v1757_v24  ;;  %v2818_v43 = vld [vmem:[%s6971_s2 + $0x1d8] sm:$0xff] }
 0x1ca   :  { %v1770_v49 = vrot.slane %v1769_v48, 1  ;;  %v1777_v9 = vrot.slane %v1776_v29, 1  ;;  %v1783_v22 = vadd.f32 %v1782_v15, %v1781_v57  ;;  %v1795_v47 = vadd.f32 %v1794_v18, %v1793_v26  ;;  %v2819_v15 = vld [vmem:[%s6971_s2 + $0x1e0] sm:$0xff]  ;;  %v2820_v18 = vld [vmem:[%s6971_s2 + $0x1e8] sm:$0xff] }
 0x1cb   :  { %v1789_v50 = vrot.slane %v1788_v19, 2  ;;  %v2258_v25 = vmul.f32 0.125, %v1764_v35  ;;  %v2384_v52 = vmul.f32 %v2256_v16, %v5719_v5  ;;  %v2385_v63 = vmul.f32 %v2257_v56, %v5724_v8 }
 0x1cc   :  { %v1771_v3 = vadd.f32 %v1770_v49, %v1769_v48  ;;  %v1778_v37 = vadd.f32 %v1777_v9, %v1776_v29  ;;  %v1784_v10 = vrot.slane %v1783_v22, 1  ;;  %v1796_v0 = vrot.slane %v1795_v47, 2 }
 0x1cd   :  { %v1790_v59 = vadd.f32 %v1789_v50, %v1788_v19  ;;  %v2386_v40 = vmul.f32 %v2258_v25, %v5727_v30  ;;  %v2639_v13 = vsel %vm2576_vm1, %v2385_v63, %v2384_v52  ;;  %v3279_v45 = vsel %vm143_vm0, %v2815_v51, 0.0 }
 0x1ce   :  { %v1785_v41 = vadd.f32 %v1784_v10, %v1783_v22  ;;  %v1797_v32 = vadd.f32 %v1796_v0, %v1795_v47  ;;  %v2259_v60 = vmul.f32 0.125, %v1771_v3  ;;  %v2260_v42 = vmul.f32 0.125, %v1778_v37  ;;  %v2821_v10 = vld [vmem:[%s6971_s2 + $0x1f0] sm:$0xff] }
 0x1cf   :  { %v1791_v55 = vrot.slane %v1790_v59, 1  ;;  %v2640_v62 = vsel %vm2578_vm2, %v2386_v40, %v2639_v13  ;;  %v3280_v2 = vrot.slane %v3279_v45, 4  ;;  %v3286_v12 = vsel %vm143_vm0, %v2816_v1, 0.0  ;;  %v2822_v13 = vld [vmem:[%s6971_s2 + $0x1f8] sm:$0xff] }
 0x1d0   :  { %v1798_v6 = vrot.slane %v1797_v32, 1  ;;  %v2261_v33 = vmul.f32 0.125, %v1785_v41  ;;  %v2387_v39 = vmul.f32 %v2259_v60, %v5733_v14  ;;  %v2388_v11 = vmul.f32 %v2260_v42, %v5741_v44 }
 0x1d1   :  { %v1792_v17 = vadd.f32 %v1791_v55, %v1790_v59  ;;  %v3281_v46 = vadd.f32 %v3280_v2, %v3279_v45  ;;  %v3287_v21 = vrot.slane %v3286_v12, 4  ;;  %v3293_v57 = vsel %vm143_vm0, %v2817_v34, 0.0 }
 0x1d2   :  { %v1799_v24 = vadd.f32 %v1798_v6, %v1797_v32  ;;  %v2389_v36 = vmul.f32 %v2261_v33, %v5749_v4  ;;  %v2641_v28 = vsel %vm2580_vm3, %v2387_v39, %v2640_v62  ;;  %v3294_v26 = vrot.slane %v3293_v57, 4 }
 0x1d3   :  { %v2262_v48 = vmul.f32 0.125, %v1792_v17  ;;  %v2642_v29 = vsel %vm2582_vm4, %v2388_v11, %v2641_v28  ;;  %v3282_v35 = vrot.slane %v3281_v46, 2  ;;  %v3288_v19 = vadd.f32 %v3287_v21, %v3286_v12 }
 0x1d4   :  { %v2263_v16 = vmul.f32 0.125, %v1799_v24  ;;  %v2643_v56 = vsel %vm2584_vm5, %v2389_v36, %v2642_v29  ;;  %v3295_v49 = vadd.f32 %v3294_v26, %v3293_v57  ;;  %v3300_v9 = vsel %vm143_vm0, %v2818_v43, 0.0 }
 0x1d5   :  { %v2390_v22 = vmul.f32 %v2262_v48, %v5751_v38  ;;  %v3283_v47 = vadd.f32 %v3282_v35, %v3281_v46  ;;  %v3289_v51 = vrot.slane %v3288_v19, 2  ;;  %v3301_v50 = vrot.slane %v3300_v9, 4  ;;  %v87_v35 = vld [vmem:[%s6969_s0 + $0x240] sm:$0xff] }
 0x1d6   :  { %v2391_v25 = vmul.f32 %v2263_v16, %v5760_v54  ;;  %v3296_v52 = vrot.slane %v3295_v49, 2  ;;  %v3307_v63 = vsel %vm143_vm0, %v2819_v15, 0.0  ;;  %v3314_v3 = vsel %vm143_vm0, %v2820_v18, 0.0 }
 0x1d7   :  { %v2644_v37 = vsel %vm2586_vm6, %v2390_v22, %v2643_v56  ;;  %v3284_v0 = vrot.slane %v3283_v47, 1  ;;  %v3290_v1 = vadd.f32 %v3289_v51, %v3288_v19  ;;  %v3302_v59 = vadd.f32 %v3301_v50, %v3300_v9  ;;  %v88_v50 = vld [vmem:[%s6969_s0 + $0x248] sm:$0xff] }
 0x1d8   :  { %v2645_v40 = vsel %vm2588_vm7, %v2391_v25, %v2644_v37  ;;  %v3297_v45 = vadd.f32 %v3296_v52, %v3295_v49  ;;  %v3308_v41 = vrot.slane %v3307_v63, 4  ;;  %v3315_v32 = vrot.slane %v3314_v3, 4 }
 0x1d9   :  { %v2735_v60 = vsel %vm143_vm0, %v2645_v40, 0.0  ;;  %v3285_v42 = vadd.f32 %v3284_v0, %v3283_v47  ;;  %v3291_v34 = vrot.slane %v3290_v1, 1  ;;  %v3303_v55 = vrot.slane %v3302_v59, 2  ;;  %v89_v0 = vld [vmem:[%s6969_s0 + $0x250] sm:$0xff] }
 0x1da   :  { %2736 = vadd.xlane.f32.xlu0 %v2735_v60  ;;  %v3298_v62 = vrot.slane %v3297_v45, 1  ;;  %v3309_v2 = vadd.f32 %v3308_v41, %v3307_v63  ;;  %v3316_v12 = vadd.f32 %v3315_v32, %v3314_v3  ;;  %v3321_v6 = vsel %vm143_vm0, %v2821_v10, 0.0  ;;  %v90_v32 = vld [vmem:[%s6969_s0 + $0x258] sm:$0xff] }
 0x1db   :  { %v3292_v33 = vadd.f32 %v3291_v34, %v3290_v1  ;;  %v3304_v39 = vadd.f32 %v3303_v55, %v3302_v59  ;;  %v3322_v11 = vrot.slane %v3321_v6, 4  ;;  %v3328_v17 = vsel %vm143_vm0, %v2822_v13, 0.0 }
 0x1dc   :  { %v3299_v43 = vadd.f32 %v3298_v62, %v3297_v45  ;;  %v3310_v46 = vrot.slane %v3309_v2, 2  ;;  %v3317_v21 = vrot.slane %v3316_v12, 2  ;;  %v3329_v57 = vrot.slane %v3328_v17, 4 }
 0x1dd   :  { %v3305_v24 = vrot.slane %v3304_v39, 1  ;;  %v3323_v36 = vadd.f32 %v3322_v11, %v3321_v6  ;;  %v3839_v28 = vmul.f32 0.125, %v3285_v42  ;;  %v3840_v26 = vmul.f32 0.125, %v3292_v33 }
 0x1de   :  { %v3311_v48 = vadd.f32 %v3310_v46, %v3309_v2  ;;  %v3318_v29 = vadd.f32 %v3317_v21, %v3316_v12  ;;  %v3330_v15 = vadd.f32 %v3329_v57, %v3328_v17  ;;  %v3841_v18 = vmul.f32 0.125, %v3299_v43 }
 0x1df   :  { %v3306_v19 = vadd.f32 %v3305_v24, %v3304_v39  ;;  %v3324_v16 = vrot.slane %v3323_v36, 2  ;;  %v3967_v56 = vmul.f32 %v3839_v28, %v5578_v27  ;;  %v3968_v49 = vmul.f32 %v3840_v26, %v5580_v61  ;;  %v91_v39 = vld [vmem:[%s6969_s0 + $0x260] sm:$0xff] }
 0x1e0   :  { %v3312_v9 = vrot.slane %v3311_v48, 1  ;;  %v3319_v22 = vrot.slane %v3318_v29, 1  ;;  %v3331_v47 = vrot.slane %v3330_v15, 2  ;;  %v3969_v51 = vmul.f32 %v3841_v18, %v5587_v20 }
 0x1e1   :  { %v3325_v25 = vadd.f32 %v3324_v16, %v3323_v36  ;;  %v3842_v52 = vmul.f32 0.125, %v3306_v19  ;;  %v4216_v63 = vsel %vm2576_vm1, %v3968_v49, %v3967_v56  ;;  %v648_v3 = vsel %vm143_vm0, %v87_v35, 0.0 }
 0x1e2   :  { %v3313_v37 = vadd.f32 %v3312_v9, %v3311_v48  ;;  %v3320_v10 = vadd.f32 %v3319_v22, %v3318_v29  ;;  %v3332_v27 = vadd.f32 %v3331_v47, %v3330_v15  ;;  %v4217_v61 = vsel %vm2578_vm2, %v3969_v51, %v4216_v63  ;;  %v94_v9 = vld [vmem:[%s6969_s0 + $0x278] sm:$0xff] }
 0x1e3   :  { %v3326_v20 = vrot.slane %v3325_v25, 1  ;;  %v3970_v1 = vmul.f32 %v3842_v52, %v5592_v53  ;;  %v649_v59 = vrot.slane %v648_v3, 4  ;;  %v655_v40 = vsel %vm143_vm0, %v88_v50, 0.0 }
 0x1e4   :  { %v3333_v13 = vrot.slane %v3332_v27, 1  ;;  %v3843_v45 = vmul.f32 0.125, %v3313_v37  ;;  %v3844_v41 = vmul.f32 0.125, %v3320_v10  ;;  %v656_v60 = vrot.slane %v655_v40, 4 }
 0x1e5   :  { %v3327_v42 = vadd.f32 %v3326_v20, %v3325_v25  ;;  %v4218_v34 = vsel %vm2580_vm3, %v3970_v1, %v4217_v61  ;;  %v650_v55 = vadd.f32 %v649_v59, %v648_v3  ;;  %v662_v62 = vsel %vm143_vm0, %v89_v0, 0.0  ;;  %v1240_v1 = vld [vmem:[%s6970_s1 + $0x240] sm:$0xff] }
 0x1e6   :  { %v3334_v2 = vadd.f32 %v3333_v13, %v3332_v27  ;;  %v3971_v53 = vmul.f32 %v3843_v45, %v5598_v31  ;;  %v3972_v12 = vmul.f32 %v3844_v41, %v5605_v23  ;;  %v657_v6 = vadd.f32 %v656_v60, %v655_v40  ;;  %v92_v23 = vld [vmem:[%s6969_s0 + $0x268] sm:$0xff] }
 0x1e7   :  { %v3845_v33 = vmul.f32 0.125, %v3327_v42  ;;  %v651_v11 = vrot.slane %v650_v55, 2  ;;  %v663_v17 = vrot.slane %v662_v62, 4  ;;  %v669_v43 = vsel %vm143_vm0, %v90_v32, 0.0 }
 0x1e8   :  { %v3846_v46 = vmul.f32 0.125, %v3334_v2  ;;  %v4219_v21 = vsel %vm2582_vm4, %v3971_v53, %v4218_v34  ;;  %v658_v57 = vrot.slane %v657_v6, 2  ;;  %v670_v24 = vrot.slane %v669_v43, 4  ;;  %v1241_v34 = vld [vmem:[%s6970_s1 + $0x248] sm:$0xff] }
 0x1e9   :  { %v3973_v36 = vmul.f32 %v3845_v33, %v5607_v58  ;;  %v4220_v31 = vsel %vm2584_vm5, %v3972_v12, %v4219_v21  ;;  %v652_v28 = vadd.f32 %v651_v11, %v650_v55  ;;  %v664_v26 = vadd.f32 %v663_v17, %v662_v62  ;;  %v93_v58 = vld [vmem:[%s6969_s0 + $0x270] sm:$0xff]  ;;  %v1243_v11 = vld [vmem:[%s6970_s1 + $0x258] sm:$0xff] }
 0x1ea   :  { %v3974_v48 = vmul.f32 %v3846_v46, %v5615_v7  ;;  %v659_v29 = vadd.f32 %v658_v57, %v657_v6  ;;  %v671_v15 = vadd.f32 %v670_v24, %v669_v43  ;;  %v676_v18 = vsel %vm143_vm0, %v91_v39, 0.0  ;;  %v1242_v39 = vld [vmem:[%s6970_s1 + $0x250] sm:$0xff] }
 0x1eb   :  { %v4221_v35 = vsel %vm2586_vm6, %v3973_v36, %v4220_v31  ;;  %v653_v19 = vrot.slane %v652_v28, 1  ;;  %v665_v16 = vrot.slane %v664_v26, 2  ;;  %v677_v56 = vrot.slane %v676_v18, 4 }
 0x1ec   :  { %v4222_v49 = vsel %vm2588_vm7, %v3974_v48, %v4221_v35  ;;  %v660_v7 = vrot.slane %v659_v29, 1  ;;  %v672_v22 = vrot.slane %v671_v15, 2  ;;  %v683_v47 = vsel %vm143_vm0, %v92_v23, 0.0  ;;  %v1244_v48 = vld [vmem:[%s6970_s1 + $0x260] sm:$0xff] }
 0x1ed   :  { %v4316_v51 = vsel %vm143_vm0, %v4222_v49, 0.0  ;;  %v654_v50 = vadd.f32 %v653_v19, %v652_v28  ;;  %v666_v25 = vadd.f32 %v665_v16, %v664_v26  ;;  %v678_v52 = vadd.f32 %v677_v56, %v676_v18 }
 0x1ee   :  { %4317 = vadd.xlane.f32.xlu1 %v4316_v51  ;;  %v661_v63 = vadd.f32 %v660_v7, %v659_v29  ;;  %v673_v3 = vadd.f32 %v672_v22, %v671_v15  ;;  %v684_v37 = vrot.slane %v683_v47, 4  ;;  %v690_v10 = vsel %vm143_vm0, %v93_v58, 0.0  ;;  %v1245_v22 = vld [vmem:[%s6970_s1 + $0x268] sm:$0xff] }
 0x1ef   :  { %v667_v27 = vrot.slane %v666_v25, 1  ;;  %v679_v61 = vrot.slane %v678_v52, 2  ;;  %v691_v0 = vrot.slane %v690_v10, 4  ;;  %v697_v20 = vsel %vm143_vm0, %v94_v9, 0.0 }
 0x1f0   :  { %v674_v59 = vrot.slane %v673_v3, 1  ;;  %v685_v40 = vadd.f32 %v684_v37, %v683_v47  ;;  %v698_v13 = vrot.slane %v697_v20, 4  ;;  %v5863_v45 = vmul.f32 0.125, %v654_v50 }
 0x1f1   :  { %v668_v41 = vadd.f32 %v667_v27, %v666_v25  ;;  %v680_v32 = vadd.f32 %v679_v61, %v678_v52  ;;  %v692_v60 = vadd.f32 %v691_v0, %v690_v10  ;;  %v5865_v42 = vmul.f32 0.125, %v661_v63  ;;  %v1246_v10 = vld [vmem:[%s6970_s1 + $0x270] sm:$0xff]  ;;  %v1247_v27 = vld [vmem:[%s6970_s1 + $0x278] sm:$0xff] }
 0x1f2   :  { %v675_v55 = vadd.f32 %v674_v59, %v673_v3  ;;  %v686_v62 = vrot.slane %v685_v40, 2  ;;  %v699_v2 = vadd.f32 %v698_v13, %v697_v20  ;;  %v1800_v53 = vsel %vm143_vm0, %v1240_v1, 0.0 }
 0x1f3   :  { %v681_v12 = vrot.slane %v680_v32, 1  ;;  %v693_v6 = vrot.slane %v692_v60, 2  ;;  %v5871_v33 = vmul.f32 0.125, %v668_v41  ;;  %v1801_v17 = vrot.slane %v1800_v53, 4 }
 0x1f4   :  { %v687_v43 = vadd.f32 %v686_v62, %v685_v40  ;;  %v700_v46 = vrot.slane %v699_v2, 2  ;;  %v5879_v21 = vmul.f32 0.125, %v675_v55  ;;  %v1807_v57 = vsel %vm143_vm0, %v1241_v34, 0.0 }
 0x1f5   :  { %v682_v24 = vadd.f32 %v681_v12, %v680_v32  ;;  %v694_v36 = vadd.f32 %v693_v6, %v692_v60  ;;  %v1802_v31 = vadd.f32 %v1801_v17, %v1800_v53  ;;  %v1808_v23 = vrot.slane %v1807_v57, 4 }
 0x1f6   :  { %v688_v28 = vrot.slane %v687_v43, 1  ;;  %v701_v26 = vadd.f32 %v700_v46, %v699_v2  ;;  %v1814_v29 = vsel %vm143_vm0, %v1242_v39, 0.0  ;;  %v1821_v15 = vsel %vm143_vm0, %v1243_v11, 0.0 }
 0x1f7   :  { %v695_v18 = vrot.slane %v694_v36, 1  ;;  %v5887_v35 = vmul.f32 0.125, %v682_v24  ;;  %v1803_v58 = vrot.slane %v1802_v31, 2  ;;  %v1809_v19 = vadd.f32 %v1808_v23, %v1807_v57 }
 0x1f8   :  { %v689_v16 = vadd.f32 %v688_v28, %v687_v43  ;;  %v702_v56 = vrot.slane %v701_v26, 1  ;;  %v1815_v49 = vrot.slane %v1814_v29, 4  ;;  %v1822_v9 = vrot.slane %v1821_v15, 4  ;;  %v2823_v28 = vld [vmem:[%s6971_s2 + $0x200] sm:$0xff] }
 0x1f9   :  { %v696_v7 = vadd.f32 %v695_v18, %v694_v36  ;;  %v1804_v47 = vadd.f32 %v1803_v58, %v1802_v31  ;;  %v1810_v51 = vrot.slane %v1809_v19, 2  ;;  %v1828_v50 = vsel %vm143_vm0, %v1244_v48, 0.0 }
 0x1fa   :  { %v703_v25 = vadd.f32 %v702_v56, %v701_v26  ;;  %v5893_v52 = vmul.f32 0.125, %v689_v16  ;;  %v1816_v63 = vadd.f32 %v1815_v49, %v1814_v29  ;;  %v1823_v3 = vadd.f32 %v1822_v9, %v1821_v15 }
 0x1fb   :  { %v5895_v37 = vmul.f32 0.125, %v696_v7  ;;  %v1805_v61 = vrot.slane %v1804_v47, 1  ;;  %v1811_v0 = vadd.f32 %v1810_v51, %v1809_v19  ;;  %v1829_v20 = vrot.slane %v1828_v50, 4  ;;  %v2824_v7 = vld [vmem:[%s6971_s2 + $0x208] sm:$0xff] }
 0x1fc   :  { %v5903_v1 = vmul.f32 0.125, %v703_v25  ;;  %v1817_v59 = vrot.slane %v1816_v63, 2  ;;  %v1824_v40 = vrot.slane %v1823_v3, 2  ;;  %v1835_v13 = vsel %vm143_vm0, %v1245_v22, 0.0 }
 0x1fd   :  { %v1806_v41 = vadd.f32 %v1805_v61, %v1804_v47  ;;  %v1812_v32 = vrot.slane %v1811_v0, 1  ;;  %v1830_v60 = vadd.f32 %v1829_v20, %v1828_v50  ;;  %v1836_v34 = vrot.slane %v1835_v13, 4 }
 0x1fe   :  { %v1818_v55 = vadd.f32 %v1817_v59, %v1816_v63  ;;  %v1825_v62 = vadd.f32 %v1824_v40, %v1823_v3  ;;  %v1842_v2 = vsel %vm143_vm0, %v1246_v10, 0.0  ;;  %v1849_v53 = vsel %vm143_vm0, %v1247_v27, 0.0  ;;  %v2825_v59 = vld [vmem:[%s6971_s2 + $0x210] sm:$0xff] }
 0x1ff   :  { %v1813_v12 = vadd.f32 %v1812_v32, %v1811_v0  ;;  %v1831_v6 = vrot.slane %v1830_v60, 2  ;;  %v1837_v39 = vadd.f32 %v1836_v34, %v1835_v13  ;;  %v1843_v11 = vrot.slane %v1842_v2, 4 }
 0x200   :  { %v1819_v17 = vrot.slane %v1818_v55, 1  ;;  %v1826_v43 = vrot.slane %v1825_v62, 1  ;;  %v1850_v46 = vrot.slane %v1849_v53, 4  ;;  %v2264_v57 = vmul.f32 0.125, %v1806_v41 }
 0x201   :  { %v1832_v24 = vadd.f32 %v1831_v6, %v1830_v60  ;;  %v1838_v36 = vrot.slane %v1837_v39, 2  ;;  %v1844_v31 = vadd.f32 %v1843_v11, %v1842_v2  ;;  %v2265_v23 = vmul.f32 0.125, %v1813_v12 }
 0x202   :  { %v1820_v26 = vadd.f32 %v1819_v17, %v1818_v55  ;;  %v1827_v48 = vadd.f32 %v1826_v43, %v1825_v62  ;;  %v1851_v29 = vadd.f32 %v1850_v46, %v1849_v53  ;;  %v2392_v15 = vmul.f32 %v2264_v57, %v5863_v45  ;;  %v2826_v53 = vld [vmem:[%s6971_s2 + $0x218] sm:$0xff]  ;;  %v2827_v57 = vld [vmem:[%s6971_s2 + $0x220] sm:$0xff] }
 0x203   :  { %v1833_v18 = vrot.slane %v1832_v24, 1  ;;  %v1839_v58 = vadd.f32 %v1838_v36, %v1837_v39  ;;  %v1845_v19 = vrot.slane %v1844_v31, 2  ;;  %v2393_v16 = vmul.f32 %v2265_v23, %v5865_v42 }
 0x204   :  { %v1852_v56 = vrot.slane %v1851_v29, 2  ;;  %v2266_v49 = vmul.f32 0.125, %v1820_v26  ;;  %v2267_v9 = vmul.f32 0.125, %v1827_v48  ;;  %v3335_v22 = vsel %vm143_vm0, %v2823_v28, 0.0 }
 0x205   :  { %v1834_v47 = vadd.f32 %v1833_v18, %v1832_v24  ;;  %v1840_v51 = vrot.slane %v1839_v58, 1  ;;  %v1846_v50 = vadd.f32 %v1845_v19, %v1844_v31  ;;  %v2646_v25 = vsel %vm2576_vm1, %v2393_v16, %v2392_v15 }
 0x206   :  { %v1853_v63 = vadd.f32 %v1852_v56, %v1851_v29  ;;  %v2394_v3 = vmul.f32 %v2266_v49, %v5871_v33  ;;  %v2395_v10 = vmul.f32 %v2267_v9, %v5879_v21  ;;  %v3336_v27 = vrot.slane %v3335_v22, 4  ;;  %v2828_v29 = vld [vmem:[%s6971_s2 + $0x228] sm:$0xff]  ;;  %v2829_v9 = vld [vmem:[%s6971_s2 + $0x230] sm:$0xff] }
 0x207   :  { %v1841_v61 = vadd.f32 %v1840_v51, %v1839_v58  ;;  %v1847_v0 = vrot.slane %v1846_v50, 1  ;;  %v2268_v20 = vmul.f32 0.125, %v1834_v47  ;;  %v3342_v40 = vsel %vm143_vm0, %v2824_v7, 0.0  ;;  %v2830_v7 = vld [vmem:[%s6971_s2 + $0x238] sm:$0xff] }
 0x208   :  { %v1854_v13 = vrot.slane %v1853_v63, 1  ;;  %v2647_v41 = vsel %vm2578_vm2, %v2394_v3, %v2646_v25  ;;  %v3337_v32 = vadd.f32 %v3336_v27, %v3335_v22  ;;  %v3343_v60 = vrot.slane %v3342_v40, 4 }
 0x209   :  { %v1848_v34 = vadd.f32 %v1847_v0, %v1846_v50  ;;  %v2269_v55 = vmul.f32 0.125, %v1841_v61  ;;  %v2396_v62 = vmul.f32 %v2268_v20, %v5887_v35  ;;  %v2648_v2 = vsel %vm2580_vm3, %v2395_v10, %v2647_v41 }
 0x20a   :  { %v1855_v12 = vadd.f32 %v1854_v13, %v1853_v63  ;;  %v3338_v6 = vrot.slane %v3337_v32, 2  ;;  %v3344_v39 = vadd.f32 %v3343_v60, %v3342_v40  ;;  %v3349_v11 = vsel %vm143_vm0, %v2825_v59, 0.0 }
 0x20b   :  { %v2270_v17 = vmul.f32 0.125, %v1848_v34  ;;  %v2397_v43 = vmul.f32 %v2269_v55, %v5893_v52  ;;  %v2649_v46 = vsel %vm2582_vm4, %v2396_v62, %v2648_v2  ;;  %v3350_v24 = vrot.slane %v3349_v11, 4 }
 0x20c   :  { %v2271_v36 = vmul.f32 0.125, %v1855_v12  ;;  %v3339_v31 = vadd.f32 %v3338_v6, %v3337_v32  ;;  %v3345_v23 = vrot.slane %v3344_v39, 2  ;;  %v3356_v28 = vsel %vm143_vm0, %v2826_v53, 0.0 }
 0x20d   :  { %v2398_v26 = vmul.f32 %v2270_v17, %v5895_v37  ;;  %v2650_v48 = vsel %vm2584_vm5, %v2397_v43, %v2649_v46  ;;  %v3351_v15 = vadd.f32 %v3350_v24, %v3349_v11  ;;  %v3357_v18 = vrot.slane %v3356_v28, 4  ;;  %v95_v17 = vld [vmem:[%s6969_s0 + $0x280] sm:$0xff] }
 0x20e   :  { %v2399_v58 = vmul.f32 %v2271_v36, %v5903_v1  ;;  %v3340_v19 = vrot.slane %v3339_v31, 1  ;;  %v3346_v16 = vadd.f32 %v3345_v23, %v3344_v39  ;;  %v3363_v56 = vsel %vm143_vm0, %v2827_v57, 0.0 }
 0x20f   :  { %v2651_v49 = vsel %vm2586_vm6, %v2398_v26, %v2650_v48  ;;  %v3352_v22 = vrot.slane %v3351_v15, 2  ;;  %v3358_v47 = vadd.f32 %v3357_v18, %v3356_v28  ;;  %v3364_v51 = vrot.slane %v3363_v56, 4  ;;  %v96_v26 = vld [vmem:[%s6969_s0 + $0x288] sm:$0xff] }
 0x210   :  { %v2652_v50 = vsel %vm2588_vm7, %v2399_v58, %v2651_v49  ;;  %v3341_v25 = vadd.f32 %v3340_v19, %v3339_v31  ;;  %v3347_v63 = vrot.slane %v3346_v16, 1  ;;  %v3370_v3 = vsel %vm143_vm0, %v2828_v29, 0.0  ;;  %v97_v49 = vld [vmem:[%s6969_s0 + $0x290] sm:$0xff] }
 0x211   :  { %v2738_v10 = vsel %vm143_vm0, %v2652_v50, 0.0  ;;  %v3353_v27 = vadd.f32 %v3352_v22, %v3351_v15  ;;  %v3359_v61 = vrot.slane %v3358_v47, 2  ;;  %v3365_v0 = vadd.f32 %v3364_v51, %v3363_v56 }
 0x212   :  { %2739 = vadd.xlane.f32.xlu0 %v2738_v10  ;;  %v3348_v20 = vadd.f32 %v3347_v63, %v3346_v16  ;;  %v3371_v59 = vrot.slane %v3370_v3, 4  ;;  %v3377_v40 = vsel %vm143_vm0, %v2829_v9, 0.0  ;;  %v3384_v13 = vsel %vm143_vm0, %v2830_v7, 0.0 }
 0x213   :  { %v3354_v41 = vrot.slane %v3353_v27, 1  ;;  %v3360_v32 = vadd.f32 %v3359_v61, %v3358_v47  ;;  %v3366_v60 = vrot.slane %v3365_v0, 2  ;;  %v3378_v34 = vrot.slane %v3377_v40, 4 }
 0x214   :  { %v3372_v55 = vadd.f32 %v3371_v59, %v3370_v3  ;;  %v3385_v62 = vrot.slane %v3384_v13, 4  ;;  %v3847_v2 = vmul.f32 0.125, %v3341_v25  ;;  %v3848_v53 = vmul.f32 0.125, %v3348_v20 }
 0x215   :  { %v3355_v12 = vadd.f32 %v3354_v41, %v3353_v27  ;;  %v3361_v6 = vrot.slane %v3360_v32, 1  ;;  %v3367_v39 = vadd.f32 %v3366_v60, %v3365_v0  ;;  %v3379_v11 = vadd.f32 %v3378_v34, %v3377_v40 }
 0x216   :  { %v3373_v43 = vrot.slane %v3372_v55, 2  ;;  %v3386_v46 = vadd.f32 %v3385_v62, %v3384_v13  ;;  %v3975_v57 = vmul.f32 %v3847_v2, %v5719_v5  ;;  %v3976_v24 = vmul.f32 %v3848_v53, %v5724_v8 }
 0x217   :  { %v3362_v36 = vadd.f32 %v3361_v6, %v3360_v32  ;;  %v3368_v31 = vrot.slane %v3367_v39, 1  ;;  %v3380_v23 = vrot.slane %v3379_v11, 2  ;;  %v3849_v28 = vmul.f32 0.125, %v3355_v12  ;;  %v100_v6 = vld [vmem:[%s6969_s0 + $0x2a8] sm:$0xff] }
 0x218   :  { %v3374_v48 = vadd.f32 %v3373_v43, %v3372_v55  ;;  %v3387_v29 = vrot.slane %v3386_v46, 2  ;;  %v4223_v15 = vsel %vm2576_vm1, %v3976_v24, %v3975_v57  ;;  %v704_v18 = vsel %vm143_vm0, %v95_v17, 0.0 }
 0x219   :  { %v3369_v58 = vadd.f32 %v3368_v31, %v3367_v39  ;;  %v3381_v19 = vadd.f32 %v3380_v23, %v3379_v11  ;;  %v3850_v16 = vmul.f32 0.125, %v3362_v36  ;;  %v3977_v5 = vmul.f32 %v3849_v28, %v5727_v30  ;;  %v98_v30 = vld [vmem:[%s6969_s0 + $0x298] sm:$0xff] }
 0x21a   :  { %v3375_v8 = vrot.slane %v3374_v48, 1  ;;  %v3388_v56 = vadd.f32 %v3387_v29, %v3386_v46  ;;  %v705_v9 = vrot.slane %v704_v18, 4  ;;  %v711_v7 = vsel %vm143_vm0, %v96_v26, 0.0  ;;  %v102_v36 = vld [vmem:[%s6969_s0 + $0x2b8] sm:$0xff] }
 0x21b   :  { %v3382_v22 = vrot.slane %v3381_v19, 1  ;;  %v3851_v47 = vmul.f32 0.125, %v3369_v58  ;;  %v3978_v51 = vmul.f32 %v3850_v16, %v5733_v14  ;;  %v4224_v50 = vsel %vm2578_vm2, %v3977_v5, %v4223_v15  ;;  %v99_v14 = vld [vmem:[%s6969_s0 + $0x2a0] sm:$0xff] }
 0x21c   :  { %v3376_v25 = vadd.f32 %v3375_v8, %v3374_v48  ;;  %v3389_v63 = vrot.slane %v3388_v56, 1  ;;  %v706_v3 = vadd.f32 %v705_v9, %v704_v18  ;;  %v712_v10 = vrot.slane %v711_v7, 4 }
 0x21d   :  { %v3383_v27 = vadd.f32 %v3382_v22, %v3381_v19  ;;  %v3979_v61 = vmul.f32 %v3851_v47, %v5741_v44  ;;  %v4225_v0 = vsel %vm2580_vm3, %v3978_v51, %v4224_v50  ;;  %v718_v20 = vsel %vm143_vm0, %v97_v49, 0.0  ;;  %v1248_v47 = vld [vmem:[%s6970_s1 + $0x280] sm:$0xff]  ;;  %v1249_v51 = vld [vmem:[%s6970_s1 + $0x288] sm:$0xff] }
 0x21e   :  { %v3390_v59 = vadd.f32 %v3389_v63, %v3388_v56  ;;  %v3852_v40 = vmul.f32 0.125, %v3376_v25  ;;  %v707_v13 = vrot.slane %v706_v3, 2  ;;  %v713_v41 = vadd.f32 %v712_v10, %v711_v7 }
 0x21f   :  { %v3853_v32 = vmul.f32 0.125, %v3383_v27  ;;  %v4226_v60 = vsel %vm2582_vm4, %v3979_v61, %v4225_v0  ;;  %v719_v34 = vrot.slane %v718_v20, 4  ;;  %v725_v55 = vsel %vm143_vm0, %v98_v30, 0.0 }
 0x220   :  { %v3854_v62 = vmul.f32 0.125, %v3390_v59  ;;  %v3980_v44 = vmul.f32 %v3852_v40, %v5749_v4  ;;  %v708_v2 = vadd.f32 %v707_v13, %v706_v3  ;;  %v714_v53 = vrot.slane %v713_v41, 2  ;;  %v1250_v59 = vld [vmem:[%s6970_s1 + $0x290] sm:$0xff] }
 0x221   :  { %v3981_v12 = vmul.f32 %v3853_v32, %v5751_v38  ;;  %v720_v39 = vadd.f32 %v719_v34, %v718_v20  ;;  %v726_v11 = vrot.slane %v725_v55, 4  ;;  %v732_v17 = vsel %vm143_vm0, %v99_v14, 0.0  ;;  %v101_v38 = vld [vmem:[%s6969_s0 + $0x2b0] sm:$0xff] }
 0x222   :  { %v3982_v43 = vmul.f32 %v3854_v62, %v5760_v54  ;;  %v4227_v46 = vsel %vm2584_vm5, %v3980_v44, %v4226_v60  ;;  %v709_v57 = vrot.slane %v708_v2, 1  ;;  %v715_v24 = vadd.f32 %v714_v53, %v713_v41  ;;  %v1251_v62 = vld [vmem:[%s6970_s1 + $0x298] sm:$0xff] }
 0x223   :  { %v4228_v4 = vsel %vm2586_vm6, %v3981_v12, %v4227_v46  ;;  %v721_v31 = vrot.slane %v720_v39, 2  ;;  %v727_v23 = vadd.f32 %v726_v11, %v725_v55  ;;  %v733_v28 = vrot.slane %v732_v17, 4 }
 0x224   :  { %v4229_v26 = vsel %vm2588_vm7, %v3982_v43, %v4228_v4  ;;  %v710_v54 = vadd.f32 %v709_v57, %v708_v2  ;;  %v716_v48 = vrot.slane %v715_v24, 1  ;;  %v739_v29 = vsel %vm143_vm0, %v100_v6, 0.0  ;;  %v1252_v43 = vld [vmem:[%s6970_s1 + $0x2a0] sm:$0xff] }
 0x225   :  { %v4319_v15 = vsel %vm143_vm0, %v4229_v26, 0.0  ;;  %v722_v18 = vadd.f32 %v721_v31, %v720_v39  ;;  %v728_v58 = vrot.slane %v727_v23, 2  ;;  %v734_v19 = vadd.f32 %v733_v28, %v732_v17 }
 0x226   :  { %4320 = vadd.xlane.f32.xlu1 %v4319_v15  ;;  %v717_v16 = vadd.f32 %v716_v48, %v715_v24  ;;  %v740_v5 = vrot.slane %v739_v29, 4  ;;  %v746_v8 = vsel %vm143_vm0, %v101_v38, 0.0  ;;  %v753_v56 = vsel %vm143_vm0, %v102_v36, 0.0  ;;  %v1253_v48 = vld [vmem:[%s6970_s1 + $0x2a8] sm:$0xff] }
 0x227   :  { %v723_v49 = vrot.slane %v722_v18, 1  ;;  %v729_v9 = vadd.f32 %v728_v58, %v727_v23  ;;  %v735_v7 = vrot.slane %v734_v19, 2  ;;  %v747_v22 = vrot.slane %v746_v8, 4 }
 0x228   :  { %v741_v50 = vadd.f32 %v740_v5, %v739_v29  ;;  %v754_v25 = vrot.slane %v753_v56, 4  ;;  %v6010_v63 = vmul.f32 0.125, %v710_v54  ;;  %v6012_v30 = vmul.f32 0.125, %v717_v16 }
 0x229   :  { %v724_v3 = vadd.f32 %v723_v49, %v722_v18  ;;  %v730_v10 = vrot.slane %v729_v9, 1  ;;  %v736_v27 = vadd.f32 %v735_v7, %v734_v19  ;;  %v748_v61 = vadd.f32 %v747_v22, %v746_v8  ;;  %v1255_v49 = vld [vmem:[%s6970_s1 + $0x2b8] sm:$0xff] }
 0x22a   :  { %v742_v0 = vrot.slane %v741_v50, 2  ;;  %v755_v20 = vadd.f32 %v754_v25, %v753_v56  ;;  %v1856_v40 = vsel %vm143_vm0, %v1248_v47, 0.0  ;;  %v1863_v14 = vsel %vm143_vm0, %v1249_v51, 0.0  ;;  %v1254_v56 = vld [vmem:[%s6970_s1 + $0x2b0] sm:$0xff] }
 0x22b   :  { %v731_v13 = vadd.f32 %v730_v10, %v729_v9  ;;  %v737_v41 = vrot.slane %v736_v27, 1  ;;  %v749_v32 = vrot.slane %v748_v61, 2  ;;  %v6019_v60 = vmul.f32 0.125, %v724_v3 }
 0x22c   :  { %v743_v34 = vadd.f32 %v742_v0, %v741_v50  ;;  %v756_v55 = vrot.slane %v755_v20, 2  ;;  %v1857_v44 = vrot.slane %v1856_v40, 4  ;;  %v1864_v2 = vrot.slane %v1863_v14, 4 }
 0x22d   :  { %v738_v53 = vadd.f32 %v737_v41, %v736_v27  ;;  %v750_v12 = vadd.f32 %v749_v32, %v748_v61  ;;  %v6024_v6 = vmul.f32 0.125, %v731_v13  ;;  %v1870_v39 = vsel %vm143_vm0, %v1250_v59, 0.0 }
 0x22e   :  { %v744_v11 = vrot.slane %v743_v34, 1  ;;  %v757_v17 = vadd.f32 %v756_v55, %v755_v20  ;;  %v1858_v46 = vadd.f32 %v1857_v44, %v1856_v40  ;;  %v1865_v57 = vadd.f32 %v1864_v2, %v1863_v14 }
 0x22f   :  { %v751_v24 = vrot.slane %v750_v12, 1  ;;  %v6030_v4 = vmul.f32 0.125, %v738_v53  ;;  %v1871_v38 = vrot.slane %v1870_v39, 4  ;;  %v1877_v36 = vsel %vm143_vm0, %v1251_v62, 0.0 }
 0x230   :  { %v745_v31 = vadd.f32 %v744_v11, %v743_v34  ;;  %v758_v23 = vrot.slane %v757_v17, 1  ;;  %v1859_v28 = vrot.slane %v1858_v46, 2  ;;  %v1866_v26 = vrot.slane %v1865_v57, 2  ;;  %v2831_v11 = vld [vmem:[%s6971_s2 + $0x240] sm:$0xff] }
 0x231   :  { %v752_v54 = vadd.f32 %v751_v24, %v750_v12  ;;  %v1872_v29 = vadd.f32 %v1871_v38, %v1870_v39  ;;  %v1878_v15 = vrot.slane %v1877_v36, 4  ;;  %v1884_v18 = vsel %vm143_vm0, %v1252_v43, 0.0 }
 0x232   :  { %v759_v58 = vadd.f32 %v758_v23, %v757_v17  ;;  %v6037_v19 = vmul.f32 0.125, %v745_v31  ;;  %v1860_v16 = vadd.f32 %v1859_v28, %v1858_v46  ;;  %v1867_v5 = vadd.f32 %v1866_v26, %v1865_v57  ;;  %v2832_v23 = vld [vmem:[%s6971_s2 + $0x248] sm:$0xff] }
 0x233   :  { %v6039_v8 = vmul.f32 0.125, %v752_v54  ;;  %v1873_v9 = vrot.slane %v1872_v29, 2  ;;  %v1879_v7 = vadd.f32 %v1878_v15, %v1877_v36  ;;  %v1885_v22 = vrot.slane %v1884_v18, 4 }
 0x234   :  { %v6047_v47 = vmul.f32 0.125, %v759_v58  ;;  %v1861_v51 = vrot.slane %v1860_v16, 1  ;;  %v1868_v50 = vrot.slane %v1867_v5, 1  ;;  %v1891_v25 = vsel %vm143_vm0, %v1253_v48, 0.0 }
 0x235   :  { %v1874_v3 = vadd.f32 %v1873_v9, %v1872_v29  ;;  %v1880_v10 = vrot.slane %v1879_v7, 2  ;;  %v1886_v27 = vadd.f32 %v1885_v22, %v1884_v18  ;;  %v1892_v61 = vrot.slane %v1891_v25, 4 }
 0x236   :  { %v1862_v0 = vadd.f32 %v1861_v51, %v1860_v16  ;;  %v1869_v20 = vadd.f32 %v1868_v50, %v1867_v5  ;;  %v1898_v59 = vsel %vm143_vm0, %v1254_v56, 0.0  ;;  %v1905_v40 = vsel %vm143_vm0, %v1255_v49, 0.0  ;;  %v2833_v56 = vld [vmem:[%s6971_s2 + $0x250] sm:$0xff] }
 0x237   :  { %v1875_v14 = vrot.slane %v1874_v3, 1  ;;  %v1881_v13 = vadd.f32 %v1880_v10, %v1879_v7  ;;  %v1887_v41 = vrot.slane %v1886_v27, 2  ;;  %v1893_v32 = vadd.f32 %v1892_v61, %v1891_v25  ;;  %v2834_v10 = vld [vmem:[%s6971_s2 + $0x258] sm:$0xff] }
 0x238   :  { %v1899_v34 = vrot.slane %v1898_v59, 4  ;;  %v1906_v55 = vrot.slane %v1905_v40, 4  ;;  %v2272_v62 = vmul.f32 0.125, %v1862_v0  ;;  %v2273_v44 = vmul.f32 0.125, %v1869_v20 }
 0x239   :  { %v1876_v2 = vadd.f32 %v1875_v14, %v1874_v3  ;;  %v1882_v53 = vrot.slane %v1881_v13, 1  ;;  %v1888_v12 = vadd.f32 %v1887_v41, %v1886_v27  ;;  %v1894_v39 = vrot.slane %v1893_v32, 2  ;;  %v2835_v41 = vld [vmem:[%s6971_s2 + $0x260] sm:$0xff] }
 0x23a   :  { %v1900_v17 = vadd.f32 %v1899_v34, %v1898_v59  ;;  %v1907_v43 = vadd.f32 %v1906_v55, %v1905_v40  ;;  %v2400_v46 = vmul.f32 %v2272_v62, %v6010_v63  ;;  %v2401_v57 = vmul.f32 %v2273_v44, %v6012_v30 }
 0x23b   :  { %v1883_v24 = vadd.f32 %v1882_v53, %v1881_v13  ;;  %v1889_v38 = vrot.slane %v1888_v12, 1  ;;  %v1895_v36 = vadd.f32 %v1894_v39, %v1893_v32  ;;  %v2274_v31 = vmul.f32 0.125, %v1876_v2  ;;  %v2836_v39 = vld [vmem:[%s6971_s2 + $0x268] sm:$0xff] }
 0x23c   :  { %v1901_v28 = vrot.slane %v1900_v17, 2  ;;  %v1908_v26 = vrot.slane %v1907_v43, 2  ;;  %v2653_v54 = vsel %vm2576_vm1, %v2401_v57, %v2400_v46  ;;  %v3391_v48 = vsel %vm143_vm0, %v2831_v11, 0.0 }
 0x23d   :  { %v1890_v29 = vadd.f32 %v1889_v38, %v1888_v12  ;;  %v1896_v15 = vrot.slane %v1895_v36, 1  ;;  %v2275_v18 = vmul.f32 0.125, %v1883_v24  ;;  %v2402_v58 = vmul.f32 %v2274_v31, %v6019_v60 }
 0x23e   :  { %v1902_v16 = vadd.f32 %v1901_v28, %v1900_v17  ;;  %v1909_v5 = vadd.f32 %v1908_v26, %v1907_v43  ;;  %v3392_v49 = vrot.slane %v3391_v48, 4  ;;  %v3398_v9 = vsel %vm143_vm0, %v2832_v23, 0.0  ;;  %v2837_v28 = vld [vmem:[%s6971_s2 + $0x270] sm:$0xff] }
 0x23f   :  { %v1897_v7 = vadd.f32 %v1896_v15, %v1895_v36  ;;  %v2276_v22 = vmul.f32 0.125, %v1890_v29  ;;  %v2403_v51 = vmul.f32 %v2275_v18, %v6024_v6  ;;  %v2654_v50 = vsel %vm2578_vm2, %v2402_v58, %v2653_v54 }
 0x240   :  { %v1903_v25 = vrot.slane %v1902_v16, 1  ;;  %v1910_v3 = vrot.slane %v1909_v5, 1  ;;  %v3393_v27 = vadd.f32 %v3392_v49, %v3391_v48  ;;  %v3399_v61 = vrot.slane %v3398_v9, 4 }
 0x241   :  { %v2277_v0 = vmul.f32 0.125, %v1897_v7  ;;  %v2404_v20 = vmul.f32 %v2276_v22, %v6030_v4  ;;  %v2655_v59 = vsel %vm2580_vm3, %v2403_v51, %v2654_v50  ;;  %v3405_v40 = vsel %vm143_vm0, %v2833_v56, 0.0  ;;  %v2838_v56 = vld [vmem:[%s6971_s2 + $0x278] sm:$0xff] }
 0x242   :  { %v1904_v14 = vadd.f32 %v1903_v25, %v1902_v16  ;;  %v1911_v13 = vadd.f32 %v1910_v3, %v1909_v5  ;;  %v3394_v32 = vrot.slane %v3393_v27, 2  ;;  %v3400_v34 = vadd.f32 %v3399_v61, %v3398_v9 }
 0x243   :  { %v2405_v55 = vmul.f32 %v2277_v0, %v6037_v19  ;;  %v2656_v62 = vsel %vm2582_vm4, %v2404_v20, %v2655_v59  ;;  %v3406_v44 = vrot.slane %v3405_v40, 4  ;;  %v3412_v2 = vsel %vm143_vm0, %v2834_v10, 0.0 }
 0x244   :  { %v2278_v53 = vmul.f32 0.125, %v1904_v14  ;;  %v2279_v12 = vmul.f32 0.125, %v1911_v13  ;;  %v3395_v11 = vadd.f32 %v3394_v32, %v3393_v27  ;;  %v3401_v17 = vrot.slane %v3400_v34, 2 }
 0x245   :  { %v2657_v43 = vsel %vm2584_vm5, %v2405_v55, %v2656_v62  ;;  %v3407_v46 = vadd.f32 %v3406_v44, %v3405_v40  ;;  %v3413_v57 = vrot.slane %v3412_v2, 4  ;;  %v3419_v24 = vsel %vm143_vm0, %v2835_v41, 0.0 }
 0x246   :  { %v2406_v38 = vmul.f32 %v2278_v53, %v6039_v8  ;;  %v2407_v36 = vmul.f32 %v2279_v12, %v6047_v47  ;;  %v3396_v31 = vrot.slane %v3395_v11, 1  ;;  %v3402_v23 = vadd.f32 %v3401_v17, %v3400_v34  ;;  %v103_v34 = vld [vmem:[%s6969_s0 + $0x2c0] sm:$0xff]  ;;  %v104_v17 = vld [vmem:[%s6969_s0 + $0x2c8] sm:$0xff] }
 0x247   :  { %v3408_v26 = vrot.slane %v3407_v46, 2  ;;  %v3414_v54 = vadd.f32 %v3413_v57, %v3412_v2  ;;  %v3420_v48 = vrot.slane %v3419_v24, 4  ;;  %v3426_v29 = vsel %vm143_vm0, %v2836_v39, 0.0 }
 0x248   :  { %v2658_v15 = vsel %vm2586_vm6, %v2406_v38, %v2657_v43  ;;  %v3397_v18 = vadd.f32 %v3396_v31, %v3395_v11  ;;  %v3403_v58 = vrot.slane %v3402_v23, 1  ;;  %v3427_v16 = vrot.slane %v3426_v29, 4 }
 0x249   :  { %v2659_v5 = vsel %vm2588_vm7, %v2407_v36, %v2658_v15  ;;  %v3409_v49 = vadd.f32 %v3408_v26, %v3407_v46  ;;  %v3415_v9 = vrot.slane %v3414_v54, 2  ;;  %v3421_v7 = vadd.f32 %v3420_v48, %v3419_v24 }
 0x24a   :  { %v2741_v22 = vsel %vm143_vm0, %v2659_v5, 0.0  ;;  %v3404_v51 = vadd.f32 %v3403_v58, %v3402_v23  ;;  %v3428_v50 = vadd.f32 %v3427_v16, %v3426_v29  ;;  %v3433_v25 = vsel %vm143_vm0, %v2837_v28, 0.0  ;;  %v105_v28 = vld [vmem:[%s6969_s0 + $0x2d0] sm:$0xff] }
 0x24b   :  { %2742 = vadd.xlane.f32.xlu0 %v2741_v22  ;;  %v3410_v3 = vrot.slane %v3409_v49, 1  ;;  %v3416_v10 = vadd.f32 %v3415_v9, %v3414_v54  ;;  %v3422_v27 = vrot.slane %v3421_v7, 2  ;;  %v3434_v61 = vrot.slane %v3433_v25, 4 }
 0x24c   :  { %v3429_v0 = vrot.slane %v3428_v50, 2  ;;  %v3440_v20 = vsel %vm143_vm0, %v2838_v56, 0.0  ;;  %v3855_v59 = vmul.f32 0.125, %v3397_v18  ;;  %v3856_v40 = vmul.f32 0.125, %v3404_v51 }
 0x24d   :  { %v3411_v14 = vadd.f32 %v3410_v3, %v3409_v49  ;;  %v3417_v13 = vrot.slane %v3416_v10, 1  ;;  %v3423_v41 = vadd.f32 %v3422_v27, %v3421_v7  ;;  %v3435_v32 = vadd.f32 %v3434_v61, %v3433_v25 }
 0x24e   :  { %v3430_v55 = vadd.f32 %v3429_v0, %v3428_v50  ;;  %v3441_v62 = vrot.slane %v3440_v20, 4  ;;  %v3983_v44 = vmul.f32 %v3855_v59, %v5863_v45  ;;  %v3984_v2 = vmul.f32 %v3856_v40, %v5865_v42  ;;  %v107_v50 = vld [vmem:[%s6969_s0 + $0x2e0] sm:$0xff]  ;;  %v108_v59 = vld [vmem:[%s6969_s0 + $0x2e8] sm:$0xff] }
 0x24f   :  { %v3418_v53 = vadd.f32 %v3417_v13, %v3416_v10  ;;  %v3424_v12 = vrot.slane %v3423_v41, 1  ;;  %v3436_v39 = vrot.slane %v3435_v32, 2  ;;  %v3857_v11 = vmul.f32 0.125, %v3411_v14 }
 0x250   :  { %v3431_v43 = vrot.slane %v3430_v55, 1  ;;  %v3442_v46 = vadd.f32 %v3441_v62, %v3440_v20  ;;  %v4230_v57 = vsel %vm2576_vm1, %v3984_v2, %v3983_v44  ;;  %v760_v24 = vsel %vm143_vm0, %v103_v34, 0.0 }
 0x251   :  { %v3425_v38 = vadd.f32 %v3424_v12, %v3423_v41  ;;  %v3437_v36 = vadd.f32 %v3436_v39, %v3435_v32  ;;  %v3858_v31 = vmul.f32 0.125, %v3418_v53  ;;  %v3985_v45 = vmul.f32 %v3857_v11, %v5871_v33  ;;  %v106_v33 = vld [vmem:[%s6969_s0 + $0x2d8] sm:$0xff] }
 0x252   :  { %v3432_v42 = vadd.f32 %v3431_v43, %v3430_v55  ;;  %v3443_v23 = vrot.slane %v3442_v46, 2  ;;  %v761_v26 = vrot.slane %v760_v24, 4  ;;  %v767_v54 = vsel %vm143_vm0, %v104_v17, 0.0  ;;  %v109_v55 = vld [vmem:[%s6969_s0 + $0x2f0] sm:$0xff] }
 0x253   :  { %v3438_v48 = vrot.slane %v3437_v36, 1  ;;  %v3859_v29 = vmul.f32 0.125, %v3425_v38  ;;  %v3986_v15 = vmul.f32 %v3858_v31, %v5879_v21  ;;  %v4231_v18 = vsel %vm2578_vm2, %v3985_v45, %v4230_v57  ;;  %v110_v57 = vld [vmem:[%s6969_s0 + $0x2f8] sm:$0xff] }
 0x254   :  { %v3444_v58 = vadd.f32 %v3443_v23, %v3442_v46  ;;  %v3860_v16 = vmul.f32 0.125, %v3432_v42  ;;  %v762_v5 = vadd.f32 %v761_v26, %v760_v24  ;;  %v768_v56 = vrot.slane %v767_v54, 4 }
 0x255   :  { %v3439_v49 = vadd.f32 %v3438_v48, %v3437_v36  ;;  %v3987_v9 = vmul.f32 %v3859_v29, %v5887_v35  ;;  %v4232_v7 = vsel %vm2580_vm3, %v3986_v15, %v4231_v18  ;;  %v774_v22 = vsel %vm143_vm0, %v105_v28, 0.0  ;;  %v1256_v29 = vld [vmem:[%s6970_s1 + $0x2c0] sm:$0xff] }
 0x256   :  { %v3445_v51 = vrot.slane %v3444_v58, 1  ;;  %v3988_v21 = vmul.f32 %v3860_v16, %v5893_v52  ;;  %v763_v25 = vrot.slane %v762_v5, 2  ;;  %v769_v3 = vadd.f32 %v768_v56, %v767_v54 }
 0x257   :  { %v3861_v10 = vmul.f32 0.125, %v3439_v49  ;;  %v4233_v27 = vsel %vm2582_vm4, %v3987_v9, %v4232_v7  ;;  %v775_v61 = vrot.slane %v774_v22, 4  ;;  %v781_v0 = vsel %vm143_vm0, %v106_v33, 0.0  ;;  %v1257_v9 = vld [vmem:[%s6970_s1 + $0x2c8] sm:$0xff] }
 0x258   :  { %v3446_v35 = vadd.f32 %v3445_v51, %v3444_v58  ;;  %v4234_v20 = vsel %vm2584_vm5, %v3988_v21, %v4233_v27  ;;  %v764_v52 = vadd.f32 %v763_v25, %v762_v5  ;;  %v770_v40 = vrot.slane %v769_v3, 2  ;;  %v1258_v27 = vld [vmem:[%s6970_s1 + $0x2d0] sm:$0xff] }
 0x259   :  { %v3989_v14 = vmul.f32 %v3861_v10, %v5895_v37  ;;  %v776_v13 = vadd.f32 %v775_v61, %v774_v22  ;;  %v782_v41 = vrot.slane %v781_v0, 4  ;;  %v788_v32 = vsel %vm143_vm0, %v107_v50, 0.0 }
 0x25a   :  { %v3862_v34 = vmul.f32 0.125, %v3446_v35  ;;  %v765_v62 = vrot.slane %v764_v52, 1  ;;  %v771_v44 = vadd.f32 %v770_v40, %v769_v3  ;;  %v789_v2 = vrot.slane %v788_v32, 4 }
 0x25b   :  { %v4235_v53 = vsel %vm2586_vm6, %v3989_v14, %v4234_v20  ;;  %v777_v12 = vrot.slane %v776_v13, 2  ;;  %v783_v39 = vadd.f32 %v782_v41, %v781_v0  ;;  %v795_v11 = vsel %vm143_vm0, %v108_v59, 0.0  ;;  %v1259_v14 = vld [vmem:[%s6970_s1 + $0x2d8] sm:$0xff] }
 0x25c   :  { %v3990_v37 = vmul.f32 %v3862_v34, %v5903_v1  ;;  %v766_v17 = vadd.f32 %v765_v62, %v764_v52  ;;  %v772_v43 = vrot.slane %v771_v44, 1  ;;  %v790_v46 = vadd.f32 %v789_v2, %v788_v32 }
 0x25d   :  { %v778_v24 = vadd.f32 %v777_v12, %v776_v13  ;;  %v784_v38 = vrot.slane %v783_v39, 2  ;;  %v796_v36 = vrot.slane %v795_v11, 4  ;;  %v802_v31 = vsel %vm143_vm0, %v109_v55, 0.0  ;;  %v1260_v13 = vld [vmem:[%s6970_s1 + $0x2e0] sm:$0xff] }
 0x25e   :  { %v4236_v45 = vsel %vm2588_vm7, %v3990_v37, %v4235_v53  ;;  %v773_v42 = vadd.f32 %v772_v43, %v771_v44  ;;  %v791_v23 = vrot.slane %v790_v46, 2  ;;  %v803_v28 = vrot.slane %v802_v31, 4 }
 0x25f   :  { %v4322_v26 = vsel %vm143_vm0, %v4236_v45, 0.0  ;;  %v779_v1 = vrot.slane %v778_v24, 1  ;;  %v785_v54 = vadd.f32 %v784_v38, %v783_v39  ;;  %v797_v48 = vadd.f32 %v796_v36, %v795_v11  ;;  %v1261_v11 = vld [vmem:[%s6970_s1 + $0x2e8] sm:$0xff] }
 0x260   :  { %4323 = vadd.xlane.f32.xlu1 %v4322_v26  ;;  %v792_v15 = vadd.f32 %v791_v23, %v790_v46  ;;  %v804_v18 = vadd.f32 %v803_v28, %v802_v31  ;;  %v809_v58 = vsel %vm143_vm0, %v110_v57, 0.0  ;;  %v6151_v16 = vmul.f32 0.125, %v766_v17  ;;  %v1262_v31 = vld [vmem:[%s6970_s1 + $0x2f0] sm:$0xff] }
 0x261   :  { %v780_v33 = vadd.f32 %v779_v1, %v778_v24  ;;  %v786_v5 = vrot.slane %v785_v54, 1  ;;  %v798_v56 = vrot.slane %v797_v48, 2  ;;  %v810_v49 = vrot.slane %v809_v58, 4 }
 0x262   :  { %v793_v7 = vrot.slane %v792_v15, 1  ;;  %v805_v22 = vrot.slane %v804_v18, 2  ;;  %v6156_v51 = vmul.f32 0.125, %v773_v42  ;;  %v1912_v21 = vsel %vm143_vm0, %v1256_v29, 0.0 }
 0x263   :  { %v787_v50 = vadd.f32 %v786_v5, %v785_v54  ;;  %v799_v25 = vadd.f32 %v798_v56, %v797_v48  ;;  %v811_v3 = vadd.f32 %v810_v49, %v809_v58  ;;  %v6159_v10 = vmul.f32 0.125, %v780_v33  ;;  %v1263_v48 = vld [vmem:[%s6970_s1 + $0x2f8] sm:$0xff] }
 0x264   :  { %v794_v61 = vadd.f32 %v793_v7, %v792_v15  ;;  %v806_v0 = vadd.f32 %v805_v22, %v804_v18  ;;  %v1913_v35 = vrot.slane %v1912_v21, 4  ;;  %v1919_v20 = vsel %vm143_vm0, %v1257_v9, 0.0 }
 0x265   :  { %v800_v59 = vrot.slane %v799_v25, 1  ;;  %v812_v52 = vrot.slane %v811_v3, 2  ;;  %v6165_v40 = vmul.f32 0.125, %v787_v50  ;;  %v1920_v41 = vrot.slane %v1919_v20, 4 }
 0x266   :  { %v807_v32 = vrot.slane %v806_v0, 1  ;;  %v6173_v34 = vmul.f32 0.125, %v794_v61  ;;  %v1914_v55 = vadd.f32 %v1913_v35, %v1912_v21  ;;  %v1926_v62 = vsel %vm143_vm0, %v1258_v27, 0.0 }
 0x267   :  { %v801_v44 = vadd.f32 %v800_v59, %v799_v25  ;;  %v813_v2 = vadd.f32 %v812_v52, %v811_v3  ;;  %v1921_v53 = vadd.f32 %v1920_v41, %v1919_v20  ;;  %v1927_v12 = vrot.slane %v1926_v62, 4 }
 0x268   :  { %v808_v39 = vadd.f32 %v807_v32, %v806_v0  ;;  %v1915_v37 = vrot.slane %v1914_v55, 2  ;;  %v1933_v17 = vsel %vm143_vm0, %v1259_v14, 0.0  ;;  %v1940_v43 = vsel %vm143_vm0, %v1260_v13, 0.0 }
 0x269   :  { %v814_v46 = vrot.slane %v813_v2, 1  ;;  %v6181_v57 = vmul.f32 0.125, %v801_v44  ;;  %v1922_v24 = vrot.slane %v1921_v53, 2  ;;  %v1928_v38 = vadd.f32 %v1927_v12, %v1926_v62  ;;  %v2839_v44 = vld [vmem:[%s6971_s2 + $0x280] sm:$0xff] }
 0x26a   :  { %v6183_v36 = vmul.f32 0.125, %v808_v39  ;;  %v1916_v45 = vadd.f32 %v1915_v37, %v1914_v55  ;;  %v1934_v42 = vrot.slane %v1933_v17, 4  ;;  %v1941_v23 = vrot.slane %v1940_v43, 4 }
 0x26b   :  { %v815_v28 = vadd.f32 %v814_v46, %v813_v2  ;;  %v1923_v26 = vadd.f32 %v1922_v24, %v1921_v53  ;;  %v1929_v1 = vrot.slane %v1928_v38, 2  ;;  %v1947_v54 = vsel %vm143_vm0, %v1261_v11, 0.0  ;;  %v2840_v46 = vld [vmem:[%s6971_s2 + $0x288] sm:$0xff] }
 0x26c   :  { %v1917_v29 = vrot.slane %v1916_v45, 1  ;;  %v1935_v15 = vadd.f32 %v1934_v42, %v1933_v17  ;;  %v1942_v18 = vadd.f32 %v1941_v23, %v1940_v43  ;;  %v1948_v58 = vrot.slane %v1947_v54, 4 }
 0x26d   :  { %v6192_v33 = vmul.f32 0.125, %v815_v28  ;;  %v1924_v5 = vrot.slane %v1923_v26, 1  ;;  %v1930_v56 = vadd.f32 %v1929_v1, %v1928_v38  ;;  %v1954_v49 = vsel %vm143_vm0, %v1262_v31, 0.0  ;;  %v2841_v1 = vld [vmem:[%s6971_s2 + $0x290] sm:$0xff] }
 0x26e   :  { %v1918_v9 = vadd.f32 %v1917_v29, %v1916_v45  ;;  %v1936_v7 = vrot.slane %v1935_v15, 2  ;;  %v1943_v22 = vrot.slane %v1942_v18, 2  ;;  %v1949_v21 = vadd.f32 %v1948_v58, %v1947_v54 }
 0x26f   :  { %v1925_v50 = vadd.f32 %v1924_v5, %v1923_v26  ;;  %v1931_v25 = vrot.slane %v1930_v56, 1  ;;  %v1955_v3 = vrot.slane %v1954_v49, 4  ;;  %v1961_v27 = vsel %vm143_vm0, %v1263_v48, 0.0 }
 0x270   :  { %v1937_v61 = vadd.f32 %v1936_v7, %v1935_v15  ;;  %v1944_v0 = vadd.f32 %v1943_v22, %v1942_v18  ;;  %v1950_v35 = vrot.slane %v1949_v21, 2  ;;  %v1962_v20 = vrot.slane %v1961_v27, 4 }
 0x271   :  { %v1932_v59 = vadd.f32 %v1931_v25, %v1930_v56  ;;  %v1956_v52 = vadd.f32 %v1955_v3, %v1954_v49  ;;  %v2280_v14 = vmul.f32 0.125, %v1918_v9  ;;  %v2281_v13 = vmul.f32 0.125, %v1925_v50  ;;  %v2842_v9 = vld [vmem:[%s6971_s2 + $0x298] sm:$0xff] }
 0x272   :  { %v1938_v41 = vrot.slane %v1937_v61, 1  ;;  %v1945_v32 = vrot.slane %v1944_v0, 1  ;;  %v1951_v55 = vadd.f32 %v1950_v35, %v1949_v21  ;;  %v1963_v62 = vadd.f32 %v1962_v20, %v1961_v27  ;;  %v2843_v35 = vld [vmem:[%s6971_s2 + $0x2a0] sm:$0xff]  ;;  %v2844_v20 = vld [vmem:[%s6971_s2 + $0x2a8] sm:$0xff] }
 0x273   :  { %v1957_v2 = vrot.slane %v1956_v52, 2  ;;  %v2282_v53 = vmul.f32 0.125, %v1932_v59  ;;  %v2408_v12 = vmul.f32 %v2280_v14, %v6151_v16  ;;  %v2409_v39 = vmul.f32 %v2281_v13, %v6156_v51 }
 0x274   :  { %v1939_v11 = vadd.f32 %v1938_v41, %v1937_v61  ;;  %v1946_v37 = vadd.f32 %v1945_v32, %v1944_v0  ;;  %v1952_v17 = vrot.slane %v1951_v55, 1  ;;  %v1964_v43 = vrot.slane %v1963_v62, 2 }
 0x275   :  { %v1958_v24 = vadd.f32 %v1957_v2, %v1956_v52  ;;  %v2410_v38 = vmul.f32 %v2282_v53, %v6159_v10  ;;  %v2660_v31 = vsel %vm2576_vm1, %v2409_v39, %v2408_v12  ;;  %v3447_v45 = vsel %vm143_vm0, %v2839_v44, 0.0 }
 0x276   :  { %v1953_v42 = vadd.f32 %v1952_v17, %v1951_v55  ;;  %v1965_v23 = vadd.f32 %v1964_v43, %v1963_v62  ;;  %v2283_v28 = vmul.f32 0.125, %v1939_v11  ;;  %v2284_v26 = vmul.f32 0.125, %v1946_v37  ;;  %v2845_v17 = vld [vmem:[%s6971_s2 + $0x2b0] sm:$0xff] }
 0x277   :  { %v1959_v54 = vrot.slane %v1958_v24, 1  ;;  %v2661_v48 = vsel %vm2578_vm2, %v2410_v38, %v2660_v31  ;;  %v3448_v29 = vrot.slane %v3447_v45, 4  ;;  %v3454_v15 = vsel %vm143_vm0, %v2840_v46, 0.0  ;;  %v2846_v31 = vld [vmem:[%s6971_s2 + $0x2b8] sm:$0xff] }
 0x278   :  { %v1966_v18 = vrot.slane %v1965_v23, 1  ;;  %v2285_v58 = vmul.f32 0.125, %v1953_v42  ;;  %v2411_v5 = vmul.f32 %v2283_v28, %v6165_v40  ;;  %v2412_v56 = vmul.f32 %v2284_v26, %v6173_v34 }
 0x279   :  { %v1960_v49 = vadd.f32 %v1959_v54, %v1958_v24  ;;  %v3449_v7 = vadd.f32 %v3448_v29, %v3447_v45  ;;  %v3455_v22 = vrot.slane %v3454_v15, 4  ;;  %v3461_v21 = vsel %vm143_vm0, %v2841_v1, 0.0 }
 0x27a   :  { %v1967_v50 = vadd.f32 %v1966_v18, %v1965_v23  ;;  %v2413_v25 = vmul.f32 %v2285_v58, %v6181_v57  ;;  %v2662_v3 = vsel %vm2580_vm3, %v2411_v5, %v2661_v48  ;;  %v3462_v27 = vrot.slane %v3461_v21, 4 }
 0x27b   :  { %v2286_v61 = vmul.f32 0.125, %v1960_v49  ;;  %v2663_v0 = vsel %vm2582_vm4, %v2412_v56, %v2662_v3  ;;  %v3450_v59 = vrot.slane %v3449_v7, 2  ;;  %v3456_v52 = vadd.f32 %v3455_v22, %v3454_v15 }
 0x27c   :  { %v2287_v14 = vmul.f32 0.125, %v1967_v50  ;;  %v2664_v13 = vsel %vm2584_vm5, %v2413_v25, %v2663_v0  ;;  %v3463_v41 = vadd.f32 %v3462_v27, %v3461_v21  ;;  %v3468_v32 = vsel %vm143_vm0, %v2842_v9, 0.0 }
 0x27d   :  { %v2414_v55 = vmul.f32 %v2286_v61, %v6183_v36  ;;  %v3451_v62 = vadd.f32 %v3450_v59, %v3449_v7  ;;  %v3457_v44 = vrot.slane %v3456_v52, 2  ;;  %v3469_v2 = vrot.slane %v3468_v32, 4  ;;  %v111_v59 = vld [vmem:[%s6969_s0 + $0x300] sm:$0xff] }
 0x27e   :  { %v2415_v53 = vmul.f32 %v2287_v14, %v6192_v33  ;;  %v3464_v12 = vrot.slane %v3463_v41, 2  ;;  %v3475_v39 = vsel %vm143_vm0, %v2843_v35, 0.0  ;;  %v3482_v11 = vsel %vm143_vm0, %v2844_v20, 0.0 }
 0x27f   :  { %v2665_v37 = vsel %vm2586_vm6, %v2414_v55, %v2664_v13  ;;  %v3452_v43 = vrot.slane %v3451_v62, 1  ;;  %v3458_v46 = vadd.f32 %v3457_v44, %v3456_v52  ;;  %v3470_v24 = vadd.f32 %v3469_v2, %v3468_v32  ;;  %v112_v2 = vld [vmem:[%s6969_s0 + $0x308] sm:$0xff] }
 0x280   :  { %v2666_v38 = vsel %vm2588_vm7, %v2415_v53, %v2665_v37  ;;  %v3465_v45 = vadd.f32 %v3464_v12, %v3463_v41  ;;  %v3476_v42 = vrot.slane %v3475_v39, 4  ;;  %v3483_v23 = vrot.slane %v3482_v11, 4 }
 0x281   :  { %v2744_v28 = vsel %vm143_vm0, %v2666_v38, 0.0  ;;  %v3453_v26 = vadd.f32 %v3452_v43, %v3451_v62  ;;  %v3459_v1 = vrot.slane %v3458_v46, 1  ;;  %v3471_v54 = vrot.slane %v3470_v24, 2  ;;  %v113_v43 = vld [vmem:[%s6969_s0 + $0x310] sm:$0xff] }
 0x282   :  { %2745 = vadd.xlane.f32.xlu0 %v2744_v28  ;;  %v3466_v48 = vrot.slane %v3465_v45, 1  ;;  %v3477_v29 = vadd.f32 %v3476_v42, %v3475_v39  ;;  %v3484_v15 = vadd.f32 %v3483_v23, %v3482_v11  ;;  %v3489_v18 = vsel %vm143_vm0, %v2845_v17, 0.0  ;;  %v114_v23 = vld [vmem:[%s6969_s0 + $0x318] sm:$0xff] }
 0x283   :  { %v3460_v58 = vadd.f32 %v3459_v1, %v3458_v46  ;;  %v3472_v5 = vadd.f32 %v3471_v54, %v3470_v24  ;;  %v3490_v56 = vrot.slane %v3489_v18, 4  ;;  %v3496_v49 = vsel %vm143_vm0, %v2846_v31, 0.0 }
 0x284   :  { %v3467_v9 = vadd.f32 %v3466_v48, %v3465_v45  ;;  %v3478_v7 = vrot.slane %v3477_v29, 2  ;;  %v3485_v22 = vrot.slane %v3484_v15, 2  ;;  %v3497_v21 = vrot.slane %v3496_v49, 4 }
 0x285   :  { %v3473_v50 = vrot.slane %v3472_v5, 1  ;;  %v3491_v25 = vadd.f32 %v3490_v56, %v3489_v18  ;;  %v3863_v3 = vmul.f32 0.125, %v3453_v26  ;;  %v3864_v27 = vmul.f32 0.125, %v3460_v58 }
 0x286   :  { %v3479_v61 = vadd.f32 %v3478_v7, %v3477_v29  ;;  %v3486_v0 = vadd.f32 %v3485_v22, %v3484_v15  ;;  %v3498_v35 = vadd.f32 %v3497_v21, %v3496_v49  ;;  %v3865_v20 = vmul.f32 0.125, %v3467_v9 }
 0x287   :  { %v3474_v52 = vadd.f32 %v3473_v50, %v3472_v5  ;;  %v3492_v14 = vrot.slane %v3491_v25, 2  ;;  %v3991_v13 = vmul.f32 %v3863_v3, %v6010_v63  ;;  %v3992_v41 = vmul.f32 %v3864_v27, %v6012_v30  ;;  %v115_v5 = vld [vmem:[%s6969_s0 + $0x320] sm:$0xff] }
 0x288   :  { %v3480_v32 = vrot.slane %v3479_v61, 1  ;;  %v3487_v55 = vrot.slane %v3486_v0, 1  ;;  %v3499_v62 = vrot.slane %v3498_v35, 2  ;;  %v3993_v44 = vmul.f32 %v3865_v20, %v6019_v60 }
 0x289   :  { %v3493_v53 = vadd.f32 %v3492_v14, %v3491_v25  ;;  %v3866_v12 = vmul.f32 0.125, %v3474_v52  ;;  %v4237_v39 = vsel %vm2576_vm1, %v3992_v41, %v3991_v13  ;;  %v816_v11 = vsel %vm143_vm0, %v111_v59, 0.0 }
 0x28a   :  { %v3481_v37 = vadd.f32 %v3480_v32, %v3479_v61  ;;  %v3488_v17 = vadd.f32 %v3487_v55, %v3486_v0  ;;  %v3500_v63 = vadd.f32 %v3499_v62, %v3498_v35  ;;  %v4238_v30 = vsel %vm2578_vm2, %v3993_v44, %v4237_v39  ;;  %v118_v32 = vld [vmem:[%s6969_s0 + $0x338] sm:$0xff] }
 0x28b   :  { %v3494_v60 = vrot.slane %v3493_v53, 1  ;;  %v3994_v46 = vmul.f32 %v3866_v12, %v6024_v6  ;;  %v817_v24 = vrot.slane %v816_v11, 4  ;;  %v823_v38 = vsel %vm143_vm0, %v112_v2, 0.0 }
 0x28c   :  { %v3501_v31 = vrot.slane %v3500_v63, 1  ;;  %v3867_v45 = vmul.f32 0.125, %v3481_v37  ;;  %v3868_v42 = vmul.f32 0.125, %v3488_v17  ;;  %v824_v28 = vrot.slane %v823_v38, 4 }
 0x28d   :  { %v3495_v26 = vadd.f32 %v3494_v60, %v3493_v53  ;;  %v4239_v1 = vsel %vm2580_vm3, %v3994_v46, %v4238_v30  ;;  %v818_v54 = vadd.f32 %v817_v24, %v816_v11  ;;  %v830_v48 = vsel %vm143_vm0, %v113_v43, 0.0  ;;  %v1264_v46 = vld [vmem:[%s6970_s1 + $0x300] sm:$0xff] }
 0x28e   :  { %v3502_v29 = vadd.f32 %v3501_v31, %v3500_v63  ;;  %v3995_v6 = vmul.f32 %v3867_v45, %v6030_v4  ;;  %v3996_v15 = vmul.f32 %v3868_v42, %v6037_v19  ;;  %v825_v18 = vadd.f32 %v824_v28, %v823_v38  ;;  %v116_v19 = vld [vmem:[%s6969_s0 + $0x328] sm:$0xff] }
 0x28f   :  { %v3869_v58 = vmul.f32 0.125, %v3495_v26  ;;  %v819_v56 = vrot.slane %v818_v54, 2  ;;  %v831_v49 = vrot.slane %v830_v48, 4  ;;  %v837_v9 = vsel %vm143_vm0, %v114_v23, 0.0 }
 0x290   :  { %v3870_v7 = vmul.f32 0.125, %v3502_v29  ;;  %v4240_v22 = vsel %vm2582_vm4, %v3995_v6, %v4239_v1  ;;  %v826_v21 = vrot.slane %v825_v18, 2  ;;  %v838_v50 = vrot.slane %v837_v9, 4  ;;  %v1265_v1 = vld [vmem:[%s6970_s1 + $0x308] sm:$0xff] }
 0x291   :  { %v3997_v25 = vmul.f32 %v3869_v58, %v6039_v8  ;;  %v4241_v4 = vsel %vm2584_vm5, %v3996_v15, %v4240_v22  ;;  %v820_v3 = vadd.f32 %v819_v56, %v818_v54  ;;  %v832_v27 = vadd.f32 %v831_v49, %v830_v48  ;;  %v117_v8 = vld [vmem:[%s6969_s0 + $0x330] sm:$0xff]  ;;  %v1267_v56 = vld [vmem:[%s6970_s1 + $0x318] sm:$0xff] }
 0x292   :  { %v3998_v61 = vmul.f32 %v3870_v7, %v6047_v47  ;;  %v827_v0 = vadd.f32 %v826_v21, %v825_v18  ;;  %v839_v35 = vadd.f32 %v838_v50, %v837_v9  ;;  %v844_v20 = vsel %vm143_vm0, %v115_v5, 0.0  ;;  %v1266_v5 = vld [vmem:[%s6970_s1 + $0x310] sm:$0xff] }
 0x293   :  { %v4242_v59 = vsel %vm2586_vm6, %v3997_v25, %v4241_v4  ;;  %v821_v52 = vrot.slane %v820_v3, 1  ;;  %v833_v14 = vrot.slane %v832_v27, 2  ;;  %v845_v13 = vrot.slane %v844_v20, 4 }
 0x294   :  { %v4243_v41 = vsel %vm2588_vm7, %v3998_v61, %v4242_v59  ;;  %v828_v47 = vrot.slane %v827_v0, 1  ;;  %v840_v55 = vrot.slane %v839_v35, 2  ;;  %v851_v62 = vsel %vm143_vm0, %v116_v19, 0.0  ;;  %v1268_v61 = vld [vmem:[%s6970_s1 + $0x320] sm:$0xff] }
 0x295   :  { %v4325_v44 = vsel %vm143_vm0, %v4243_v41, 0.0  ;;  %v822_v2 = vadd.f32 %v821_v52, %v820_v3  ;;  %v834_v53 = vadd.f32 %v833_v14, %v832_v27  ;;  %v846_v12 = vadd.f32 %v845_v13, %v844_v20 }
 0x296   :  { %4326 = vadd.xlane.f32.xlu1 %v4325_v44  ;;  %v829_v39 = vadd.f32 %v828_v47, %v827_v0  ;;  %v841_v11 = vadd.f32 %v840_v55, %v839_v35  ;;  %v852_v37 = vrot.slane %v851_v62, 4  ;;  %v858_v17 = vsel %vm143_vm0, %v117_v8, 0.0  ;;  %v1269_v55 = vld [vmem:[%s6970_s1 + $0x328] sm:$0xff] }
 0x297   :  { %v835_v63 = vrot.slane %v834_v53, 1  ;;  %v847_v30 = vrot.slane %v846_v12, 2  ;;  %v859_v43 = vrot.slane %v858_v17, 4  ;;  %v865_v60 = vsel %vm143_vm0, %v118_v32, 0.0 }
 0x298   :  { %v842_v24 = vrot.slane %v841_v11, 1  ;;  %v853_v38 = vadd.f32 %v852_v37, %v851_v62  ;;  %v866_v31 = vrot.slane %v865_v60, 4  ;;  %v6295_v45 = vmul.f32 0.125, %v822_v2 }
 0x299   :  { %v836_v42 = vadd.f32 %v835_v63, %v834_v53  ;;  %v848_v23 = vadd.f32 %v847_v30, %v846_v12  ;;  %v860_v28 = vadd.f32 %v859_v43, %v858_v17  ;;  %v6297_v26 = vmul.f32 0.125, %v829_v39  ;;  %v1270_v17 = vld [vmem:[%s6970_s1 + $0x330] sm:$0xff]  ;;  %v1271_v63 = vld [vmem:[%s6970_s1 + $0x338] sm:$0xff] }
 0x29a   :  { %v843_v54 = vadd.f32 %v842_v24, %v841_v11  ;;  %v854_v48 = vrot.slane %v853_v38, 2  ;;  %v867_v29 = vadd.f32 %v866_v31, %v865_v60  ;;  %v1968_v6 = vsel %vm143_vm0, %v1264_v46, 0.0 }
 0x29b   :  { %v849_v15 = vrot.slane %v848_v23, 1  ;;  %v861_v18 = vrot.slane %v860_v28, 2  ;;  %v6303_v58 = vmul.f32 0.125, %v836_v42  ;;  %v1969_v49 = vrot.slane %v1968_v6, 4 }
 0x29c   :  { %v855_v9 = vadd.f32 %v854_v48, %v853_v38  ;;  %v868_v7 = vrot.slane %v867_v29, 2  ;;  %v6311_v22 = vmul.f32 0.125, %v843_v54  ;;  %v1975_v21 = vsel %vm143_vm0, %v1265_v1, 0.0 }
 0x29d   :  { %v850_v50 = vadd.f32 %v849_v15, %v848_v23  ;;  %v862_v25 = vadd.f32 %v861_v18, %v860_v28  ;;  %v1970_v4 = vadd.f32 %v1969_v49, %v1968_v6  ;;  %v1976_v19 = vrot.slane %v1975_v21, 4 }
 0x29e   :  { %v856_v3 = vrot.slane %v855_v9, 1  ;;  %v869_v27 = vadd.f32 %v868_v7, %v867_v29  ;;  %v1982_v0 = vsel %vm143_vm0, %v1266_v5, 0.0  ;;  %v1989_v35 = vsel %vm143_vm0, %v1267_v56, 0.0 }
 0x29f   :  { %v863_v20 = vrot.slane %v862_v25, 1  ;;  %v6319_v59 = vmul.f32 0.125, %v850_v50  ;;  %v1971_v8 = vrot.slane %v1970_v4, 2  ;;  %v1977_v52 = vadd.f32 %v1976_v19, %v1975_v21 }
 0x2a0   :  { %v857_v14 = vadd.f32 %v856_v3, %v855_v9  ;;  %v870_v13 = vrot.slane %v869_v27, 1  ;;  %v1983_v41 = vrot.slane %v1982_v0, 4  ;;  %v1990_v32 = vrot.slane %v1989_v35, 4  ;;  %v2847_v3 = vld [vmem:[%s6971_s2 + $0x2c0] sm:$0xff] }
 0x2a1   :  { %v864_v47 = vadd.f32 %v863_v20, %v862_v25  ;;  %v1972_v62 = vadd.f32 %v1971_v8, %v1970_v4  ;;  %v1978_v44 = vrot.slane %v1977_v52, 2  ;;  %v1996_v2 = vsel %vm143_vm0, %v1268_v61, 0.0 }
 0x2a2   :  { %v871_v53 = vadd.f32 %v870_v13, %v869_v27  ;;  %v6325_v12 = vmul.f32 0.125, %v857_v14  ;;  %v1984_v39 = vadd.f32 %v1983_v41, %v1982_v0  ;;  %v1991_v11 = vadd.f32 %v1990_v32, %v1989_v35 }
 0x2a3   :  { %v6327_v37 = vmul.f32 0.125, %v864_v47  ;;  %v1973_v30 = vrot.slane %v1972_v62, 1  ;;  %v1979_v43 = vadd.f32 %v1978_v44, %v1977_v52  ;;  %v1997_v60 = vrot.slane %v1996_v2, 4  ;;  %v2848_v47 = vld [vmem:[%s6971_s2 + $0x2c8] sm:$0xff] }
 0x2a4   :  { %v6335_v46 = vmul.f32 0.125, %v871_v53  ;;  %v1985_v24 = vrot.slane %v1984_v39, 2  ;;  %v1992_v38 = vrot.slane %v1991_v11, 2  ;;  %v2003_v31 = vsel %vm143_vm0, %v1269_v55, 0.0 }
 0x2a5   :  { %v1974_v42 = vadd.f32 %v1973_v30, %v1972_v62  ;;  %v1980_v23 = vrot.slane %v1979_v43, 1  ;;  %v1998_v28 = vadd.f32 %v1997_v60, %v1996_v2  ;;  %v2004_v1 = vrot.slane %v2003_v31, 4 }
 0x2a6   :  { %v1986_v54 = vadd.f32 %v1985_v24, %v1984_v39  ;;  %v1993_v48 = vadd.f32 %v1992_v38, %v1991_v11  ;;  %v2010_v29 = vsel %vm143_vm0, %v1270_v17, 0.0  ;;  %v2017_v6 = vsel %vm143_vm0, %v1271_v63, 0.0  ;;  %v2849_v24 = vld [vmem:[%s6971_s2 + $0x2d0] sm:$0xff] }
 0x2a7   :  { %v1981_v15 = vadd.f32 %v1980_v23, %v1979_v43  ;;  %v1999_v18 = vrot.slane %v1998_v28, 2  ;;  %v2005_v5 = vadd.f32 %v2004_v1, %v2003_v31  ;;  %v2011_v56 = vrot.slane %v2010_v29, 4 }
 0x2a8   :  { %v1987_v49 = vrot.slane %v1986_v54, 1  ;;  %v1994_v9 = vrot.slane %v1993_v48, 1  ;;  %v2018_v7 = vrot.slane %v2017_v6, 4  ;;  %v2288_v21 = vmul.f32 0.125, %v1974_v42 }
 0x2a9   :  { %v2000_v50 = vadd.f32 %v1999_v18, %v1998_v28  ;;  %v2006_v25 = vrot.slane %v2005_v5, 2  ;;  %v2012_v4 = vadd.f32 %v2011_v56, %v2010_v29  ;;  %v2289_v19 = vmul.f32 0.125, %v1981_v15 }
 0x2aa   :  { %v1988_v27 = vadd.f32 %v1987_v49, %v1986_v54  ;;  %v1995_v61 = vadd.f32 %v1994_v9, %v1993_v48  ;;  %v2019_v0 = vadd.f32 %v2018_v7, %v2017_v6  ;;  %v2416_v35 = vmul.f32 %v2288_v21, %v6295_v45  ;;  %v2850_v6 = vld [vmem:[%s6971_s2 + $0x2d8] sm:$0xff]  ;;  %v2851_v21 = vld [vmem:[%s6971_s2 + $0x2e0] sm:$0xff] }
 0x2ab   :  { %v2001_v20 = vrot.slane %v2000_v50, 1  ;;  %v2007_v8 = vadd.f32 %v2006_v25, %v2005_v5  ;;  %v2013_v52 = vrot.slane %v2012_v4, 2  ;;  %v2417_v14 = vmul.f32 %v2289_v19, %v6297_v26 }
 0x2ac   :  { %v2020_v13 = vrot.slane %v2019_v0, 2  ;;  %v2290_v41 = vmul.f32 0.125, %v1988_v27  ;;  %v2291_v32 = vmul.f32 0.125, %v1995_v61  ;;  %v3503_v55 = vsel %vm143_vm0, %v2847_v3, 0.0 }
 0x2ad   :  { %v2002_v62 = vadd.f32 %v2001_v20, %v2000_v50  ;;  %v2008_v44 = vrot.slane %v2007_v8, 1  ;;  %v2014_v2 = vadd.f32 %v2013_v52, %v2012_v4  ;;  %v2667_v53 = vsel %vm2576_vm1, %v2417_v14, %v2416_v35 }
 0x2ae   :  { %v2021_v39 = vadd.f32 %v2020_v13, %v2019_v0  ;;  %v2418_v11 = vmul.f32 %v2290_v41, %v6303_v58  ;;  %v2419_v17 = vmul.f32 %v2291_v32, %v6311_v22  ;;  %v3504_v63 = vrot.slane %v3503_v55, 4  ;;  %v2852_v0 = vld [vmem:[%s6971_s2 + $0x2e8] sm:$0xff]  ;;  %v2853_v32 = vld [vmem:[%s6971_s2 + $0x2f0] sm:$0xff] }
 0x2af   :  { %v2009_v30 = vadd.f32 %v2008_v44, %v2007_v8  ;;  %v2015_v43 = vrot.slane %v2014_v2, 1  ;;  %v2292_v60 = vmul.f32 0.125, %v2002_v62  ;;  %v3510_v38 = vsel %vm143_vm0, %v2848_v47, 0.0  ;;  %v2854_v47 = vld [vmem:[%s6971_s2 + $0x2f8] sm:$0xff] }
 0x2b0   :  { %v2022_v31 = vrot.slane %v2021_v39, 1  ;;  %v2668_v42 = vsel %vm2578_vm2, %v2418_v11, %v2667_v53  ;;  %v3505_v23 = vadd.f32 %v3504_v63, %v3503_v55  ;;  %v3511_v28 = vrot.slane %v3510_v38, 4 }
 0x2b1   :  { %v2016_v1 = vadd.f32 %v2015_v43, %v2014_v2  ;;  %v2293_v54 = vmul.f32 0.125, %v2009_v30  ;;  %v2420_v48 = vmul.f32 %v2292_v60, %v6319_v59  ;;  %v2669_v29 = vsel %vm2580_vm3, %v2419_v17, %v2668_v42 }
 0x2b2   :  { %v2023_v15 = vadd.f32 %v2022_v31, %v2021_v39  ;;  %v3506_v18 = vrot.slane %v3505_v23, 2  ;;  %v3512_v5 = vadd.f32 %v3511_v28, %v3510_v38  ;;  %v3517_v56 = vsel %vm143_vm0, %v2849_v24, 0.0 }
 0x2b3   :  { %v2294_v49 = vmul.f32 0.125, %v2016_v1  ;;  %v2421_v9 = vmul.f32 %v2293_v54, %v6325_v12  ;;  %v2670_v7 = vsel %vm2582_vm4, %v2420_v48, %v2669_v29  ;;  %v3518_v50 = vrot.slane %v3517_v56, 4 }
 0x2b4   :  { %v2295_v25 = vmul.f32 0.125, %v2023_v15  ;;  %v3507_v4 = vadd.f32 %v3506_v18, %v3505_v23  ;;  %v3513_v19 = vrot.slane %v3512_v5, 2  ;;  %v3524_v3 = vsel %vm143_vm0, %v2850_v6, 0.0 }
 0x2b5   :  { %v2422_v27 = vmul.f32 %v2294_v49, %v6327_v37  ;;  %v2671_v61 = vsel %vm2584_vm5, %v2421_v9, %v2670_v7  ;;  %v3519_v35 = vadd.f32 %v3518_v50, %v3517_v56  ;;  %v3525_v20 = vrot.slane %v3524_v3, 4  ;;  %v119_v49 = vld [vmem:[%s6969_s0 + $0x340] sm:$0xff] }
 0x2b6   :  { %v2423_v8 = vmul.f32 %v2295_v25, %v6335_v46  ;;  %v3508_v52 = vrot.slane %v3507_v4, 1  ;;  %v3514_v14 = vadd.f32 %v3513_v19, %v3512_v5  ;;  %v3531_v13 = vsel %vm143_vm0, %v2851_v21, 0.0 }
 0x2b7   :  { %v2672_v41 = vsel %vm2586_vm6, %v2422_v27, %v2671_v61  ;;  %v3520_v55 = vrot.slane %v3519_v35, 2  ;;  %v3526_v62 = vadd.f32 %v3525_v20, %v3524_v3  ;;  %v3532_v44 = vrot.slane %v3531_v13, 4  ;;  %v120_v27 = vld [vmem:[%s6969_s0 + $0x348] sm:$0xff] }
 0x2b8   :  { %v2673_v2 = vsel %vm2588_vm7, %v2423_v8, %v2672_v41  ;;  %v3509_v53 = vadd.f32 %v3508_v52, %v3507_v4  ;;  %v3515_v39 = vrot.slane %v3514_v14, 1  ;;  %v3538_v11 = vsel %vm143_vm0, %v2852_v0, 0.0  ;;  %v121_v41 = vld [vmem:[%s6969_s0 + $0x350] sm:$0xff] }
 0x2b9   :  { %v2747_v17 = vsel %vm143_vm0, %v2673_v2, 0.0  ;;  %v3521_v63 = vadd.f32 %v3520_v55, %v3519_v35  ;;  %v3527_v30 = vrot.slane %v3526_v62, 2  ;;  %v3533_v43 = vadd.f32 %v3532_v44, %v3531_v13 }
 0x2ba   :  { %2748 = vadd.xlane.f32.xlu0 %v2747_v17  ;;  %v3516_v60 = vadd.f32 %v3515_v39, %v3514_v14  ;;  %v3539_v24 = vrot.slane %v3538_v11, 4  ;;  %v3545_v38 = vsel %vm143_vm0, %v2853_v32, 0.0  ;;  %v3552_v31 = vsel %vm143_vm0, %v2854_v47, 0.0 }
 0x2bb   :  { %v3522_v42 = vrot.slane %v3521_v63, 1  ;;  %v3528_v23 = vadd.f32 %v3527_v30, %v3526_v62  ;;  %v3534_v28 = vrot.slane %v3533_v43, 2  ;;  %v3546_v1 = vrot.slane %v3545_v38, 4 }
 0x2bc   :  { %v3540_v54 = vadd.f32 %v3539_v24, %v3538_v11  ;;  %v3553_v48 = vrot.slane %v3552_v31, 4  ;;  %v3871_v29 = vmul.f32 0.125, %v3509_v53  ;;  %v3872_v6 = vmul.f32 0.125, %v3516_v60 }
 0x2bd   :  { %v3523_v15 = vadd.f32 %v3522_v42, %v3521_v63  ;;  %v3529_v18 = vrot.slane %v3528_v23, 1  ;;  %v3535_v5 = vadd.f32 %v3534_v28, %v3533_v43  ;;  %v3547_v56 = vadd.f32 %v3546_v1, %v3545_v38 }
 0x2be   :  { %v3541_v9 = vrot.slane %v3540_v54, 2  ;;  %v3554_v7 = vadd.f32 %v3553_v48, %v3552_v31  ;;  %v3999_v21 = vmul.f32 %v3871_v29, %v6151_v16  ;;  %v4000_v50 = vmul.f32 %v3872_v6, %v6156_v51 }
 0x2bf   :  { %v3530_v25 = vadd.f32 %v3529_v18, %v3528_v23  ;;  %v3536_v4 = vrot.slane %v3535_v5, 1  ;;  %v3548_v19 = vrot.slane %v3547_v56, 2  ;;  %v3873_v3 = vmul.f32 0.125, %v3523_v15  ;;  %v124_v18 = vld [vmem:[%s6969_s0 + $0x368] sm:$0xff] }
 0x2c0   :  { %v3542_v61 = vadd.f32 %v3541_v9, %v3540_v54  ;;  %v3555_v0 = vrot.slane %v3554_v7, 2  ;;  %v4244_v35 = vsel %vm2576_vm1, %v4000_v50, %v3999_v21  ;;  %v872_v20 = vsel %vm143_vm0, %v119_v49, 0.0 }
 0x2c1   :  { %v3537_v8 = vadd.f32 %v3536_v4, %v3535_v5  ;;  %v3549_v52 = vadd.f32 %v3548_v19, %v3547_v56  ;;  %v3874_v14 = vmul.f32 0.125, %v3530_v25  ;;  %v4001_v16 = vmul.f32 %v3873_v3, %v6159_v10  ;;  %v122_v10 = vld [vmem:[%s6969_s0 + $0x358] sm:$0xff] }
 0x2c2   :  { %v3543_v51 = vrot.slane %v3542_v61, 1  ;;  %v3556_v13 = vadd.f32 %v3555_v0, %v3554_v7  ;;  %v873_v32 = vrot.slane %v872_v20, 4  ;;  %v879_v47 = vsel %vm143_vm0, %v120_v27, 0.0  ;;  %v126_v25 = vld [vmem:[%s6969_s0 + $0x378] sm:$0xff] }
 0x2c3   :  { %v3550_v55 = vrot.slane %v3549_v52, 1  ;;  %v3875_v62 = vmul.f32 0.125, %v3537_v8  ;;  %v4002_v44 = vmul.f32 %v3874_v14, %v6165_v40  ;;  %v4245_v2 = vsel %vm2578_vm2, %v4001_v16, %v4244_v35  ;;  %v123_v40 = vld [vmem:[%s6969_s0 + $0x360] sm:$0xff] }
 0x2c4   :  { %v3544_v53 = vadd.f32 %v3543_v51, %v3542_v61  ;;  %v3557_v39 = vrot.slane %v3556_v13, 1  ;;  %v874_v11 = vadd.f32 %v873_v32, %v872_v20  ;;  %v880_v17 = vrot.slane %v879_v47, 4 }
 0x2c5   :  { %v3551_v63 = vadd.f32 %v3550_v55, %v3549_v52  ;;  %v4003_v30 = vmul.f32 %v3875_v62, %v6173_v34  ;;  %v4246_v43 = vsel %vm2580_vm3, %v4002_v44, %v4245_v2  ;;  %v886_v60 = vsel %vm143_vm0, %v121_v41, 0.0  ;;  %v1272_v62 = vld [vmem:[%s6970_s1 + $0x340] sm:$0xff]  ;;  %v1273_v44 = vld [vmem:[%s6970_s1 + $0x348] sm:$0xff] }
 0x2c6   :  { %v3558_v24 = vadd.f32 %v3557_v39, %v3556_v13  ;;  %v3876_v38 = vmul.f32 0.125, %v3544_v53  ;;  %v875_v31 = vrot.slane %v874_v11, 2  ;;  %v881_v42 = vadd.f32 %v880_v17, %v879_v47 }
 0x2c7   :  { %v3877_v23 = vmul.f32 0.125, %v3551_v63  ;;  %v4247_v28 = vsel %vm2582_vm4, %v4003_v30, %v4246_v43  ;;  %v887_v1 = vrot.slane %v886_v60, 4  ;;  %v893_v54 = vsel %vm143_vm0, %v122_v10, 0.0 }
 0x2c8   :  { %v3878_v48 = vmul.f32 0.125, %v3558_v24  ;;  %v4004_v34 = vmul.f32 %v3876_v38, %v6181_v57  ;;  %v876_v29 = vadd.f32 %v875_v31, %v874_v11  ;;  %v882_v6 = vrot.slane %v881_v42, 2  ;;  %v1274_v24 = vld [vmem:[%s6970_s1 + $0x350] sm:$0xff] }
 0x2c9   :  { %v4005_v15 = vmul.f32 %v3877_v23, %v6183_v36  ;;  %v888_v5 = vadd.f32 %v887_v1, %v886_v60  ;;  %v894_v56 = vrot.slane %v893_v54, 4  ;;  %v900_v49 = vsel %vm143_vm0, %v123_v40, 0.0  ;;  %v125_v36 = vld [vmem:[%s6969_s0 + $0x370] sm:$0xff] }
 0x2ca   :  { %v4006_v9 = vmul.f32 %v3878_v48, %v6192_v33  ;;  %v4248_v7 = vsel %vm2584_vm5, %v4004_v34, %v4247_v28  ;;  %v877_v21 = vrot.slane %v876_v29, 1  ;;  %v883_v50 = vadd.f32 %v882_v6, %v881_v42  ;;  %v1275_v48 = vld [vmem:[%s6970_s1 + $0x358] sm:$0xff] }
 0x2cb   :  { %v4249_v57 = vsel %vm2586_vm6, %v4005_v15, %v4248_v7  ;;  %v889_v4 = vrot.slane %v888_v5, 2  ;;  %v895_v19 = vadd.f32 %v894_v56, %v893_v54  ;;  %v901_v3 = vrot.slane %v900_v49, 4 }
 0x2cc   :  { %v4250_v27 = vsel %vm2588_vm7, %v4006_v9, %v4249_v57  ;;  %v878_v33 = vadd.f32 %v877_v21, %v876_v29  ;;  %v884_v61 = vrot.slane %v883_v50, 1  ;;  %v907_v0 = vsel %vm143_vm0, %v124_v18, 0.0  ;;  %v1276_v9 = vld [vmem:[%s6970_s1 + $0x360] sm:$0xff] }
 0x2cd   :  { %v4328_v35 = vsel %vm143_vm0, %v4250_v27, 0.0  ;;  %v890_v20 = vadd.f32 %v889_v4, %v888_v5  ;;  %v896_v8 = vrot.slane %v895_v19, 2  ;;  %v902_v52 = vadd.f32 %v901_v3, %v900_v49 }
 0x2ce   :  { %4329 = vadd.xlane.f32.xlu1 %v4328_v35  ;;  %v885_v14 = vadd.f32 %v884_v61, %v883_v50  ;;  %v908_v16 = vrot.slane %v907_v0, 4  ;;  %v914_v51 = vsel %vm143_vm0, %v125_v36, 0.0  ;;  %v921_v13 = vsel %vm143_vm0, %v126_v25, 0.0  ;;  %v1277_v61 = vld [vmem:[%s6970_s1 + $0x368] sm:$0xff] }
 0x2cf   :  { %v891_v41 = vrot.slane %v890_v20, 1  ;;  %v897_v32 = vadd.f32 %v896_v8, %v895_v19  ;;  %v903_v47 = vrot.slane %v902_v52, 2  ;;  %v915_v55 = vrot.slane %v914_v51, 4 }
 0x2d0   :  { %v909_v2 = vadd.f32 %v908_v16, %v907_v0  ;;  %v922_v53 = vrot.slane %v921_v13, 4  ;;  %v6442_v39 = vmul.f32 0.125, %v878_v33  ;;  %v6444_v10 = vmul.f32 0.125, %v885_v14 }
 0x2d1   :  { %v892_v11 = vadd.f32 %v891_v41, %v890_v20  ;;  %v898_v17 = vrot.slane %v897_v32, 1  ;;  %v904_v63 = vadd.f32 %v903_v47, %v902_v52  ;;  %v916_v30 = vadd.f32 %v915_v55, %v914_v51  ;;  %v1279_v41 = vld [vmem:[%s6970_s1 + $0x378] sm:$0xff] }
 0x2d2   :  { %v910_v43 = vrot.slane %v909_v2, 2  ;;  %v923_v60 = vadd.f32 %v922_v53, %v921_v13  ;;  %v2024_v38 = vsel %vm143_vm0, %v1272_v62, 0.0  ;;  %v2031_v40 = vsel %vm143_vm0, %v1273_v44, 0.0  ;;  %v1278_v13 = vld [vmem:[%s6970_s1 + $0x370] sm:$0xff] }
 0x2d3   :  { %v899_v31 = vadd.f32 %v898_v17, %v897_v32  ;;  %v905_v42 = vrot.slane %v904_v63, 1  ;;  %v917_v23 = vrot.slane %v916_v30, 2  ;;  %v6451_v28 = vmul.f32 0.125, %v892_v11 }
 0x2d4   :  { %v911_v1 = vadd.f32 %v910_v43, %v909_v2  ;;  %v924_v54 = vrot.slane %v923_v60, 2  ;;  %v2025_v34 = vrot.slane %v2024_v38, 4  ;;  %v2032_v29 = vrot.slane %v2031_v40, 4 }
 0x2d5   :  { %v906_v6 = vadd.f32 %v905_v42, %v904_v63  ;;  %v918_v15 = vadd.f32 %v917_v23, %v916_v30  ;;  %v6456_v18 = vmul.f32 0.125, %v899_v31  ;;  %v2038_v5 = vsel %vm143_vm0, %v1274_v24, 0.0 }
 0x2d6   :  { %v912_v56 = vrot.slane %v911_v1, 1  ;;  %v925_v49 = vadd.f32 %v924_v54, %v923_v60  ;;  %v2026_v7 = vadd.f32 %v2025_v34, %v2024_v38  ;;  %v2033_v21 = vadd.f32 %v2032_v29, %v2031_v40 }
 0x2d7   :  { %v919_v50 = vrot.slane %v918_v15, 1  ;;  %v6462_v57 = vmul.f32 0.125, %v906_v6  ;;  %v2039_v36 = vrot.slane %v2038_v5, 4  ;;  %v2045_v25 = vsel %vm143_vm0, %v1275_v48, 0.0 }
 0x2d8   :  { %v913_v4 = vadd.f32 %v912_v56, %v911_v1  ;;  %v926_v19 = vrot.slane %v925_v49, 1  ;;  %v2027_v3 = vrot.slane %v2026_v7, 2  ;;  %v2034_v27 = vrot.slane %v2033_v21, 2  ;;  %v2855_v56 = vld [vmem:[%s6971_s2 + $0x300] sm:$0xff] }
 0x2d9   :  { %v920_v33 = vadd.f32 %v919_v50, %v918_v15  ;;  %v2040_v0 = vadd.f32 %v2039_v36, %v2038_v5  ;;  %v2046_v35 = vrot.slane %v2045_v25, 4  ;;  %v2052_v20 = vsel %vm143_vm0, %v1276_v9, 0.0 }
 0x2da   :  { %v927_v8 = vadd.f32 %v926_v19, %v925_v49  ;;  %v6469_v52 = vmul.f32 0.125, %v913_v4  ;;  %v2028_v14 = vadd.f32 %v2027_v3, %v2026_v7  ;;  %v2035_v16 = vadd.f32 %v2034_v27, %v2033_v21  ;;  %v2856_v19 = vld [vmem:[%s6971_s2 + $0x308] sm:$0xff] }
 0x2db   :  { %v6471_v51 = vmul.f32 0.125, %v920_v33  ;;  %v2041_v32 = vrot.slane %v2040_v0, 2  ;;  %v2047_v47 = vadd.f32 %v2046_v35, %v2045_v25  ;;  %v2053_v55 = vrot.slane %v2052_v20, 4 }
 0x2dc   :  { %v6479_v62 = vmul.f32 0.125, %v927_v8  ;;  %v2029_v44 = vrot.slane %v2028_v14, 1  ;;  %v2036_v2 = vrot.slane %v2035_v16, 1  ;;  %v2059_v53 = vsel %vm143_vm0, %v1277_v61, 0.0 }
 0x2dd   :  { %v2042_v11 = vadd.f32 %v2041_v32, %v2040_v0  ;;  %v2048_v17 = vrot.slane %v2047_v47, 2  ;;  %v2054_v63 = vadd.f32 %v2053_v55, %v2052_v20  ;;  %v2060_v30 = vrot.slane %v2059_v53, 4 }
 0x2de   :  { %v2030_v43 = vadd.f32 %v2029_v44, %v2028_v14  ;;  %v2037_v60 = vadd.f32 %v2036_v2, %v2035_v16  ;;  %v2066_v24 = vsel %vm143_vm0, %v1278_v13, 0.0  ;;  %v2073_v38 = vsel %vm143_vm0, %v1279_v41, 0.0  ;;  %v2857_v13 = vld [vmem:[%s6971_s2 + $0x310] sm:$0xff] }
 0x2df   :  { %v2043_v40 = vrot.slane %v2042_v11, 1  ;;  %v2049_v31 = vadd.f32 %v2048_v17, %v2047_v47  ;;  %v2055_v42 = vrot.slane %v2054_v63, 2  ;;  %v2061_v23 = vadd.f32 %v2060_v30, %v2059_v53  ;;  %v2858_v17 = vld [vmem:[%s6971_s2 + $0x318] sm:$0xff] }
 0x2e0   :  { %v2067_v1 = vrot.slane %v2066_v24, 4  ;;  %v2074_v54 = vrot.slane %v2073_v38, 4  ;;  %v2296_v48 = vmul.f32 0.125, %v2030_v43  ;;  %v2297_v34 = vmul.f32 0.125, %v2037_v60 }
 0x2e1   :  { %v2044_v29 = vadd.f32 %v2043_v40, %v2042_v11  ;;  %v2050_v6 = vrot.slane %v2049_v31, 1  ;;  %v2056_v15 = vadd.f32 %v2055_v42, %v2054_v63  ;;  %v2062_v5 = vrot.slane %v2061_v23, 2  ;;  %v2859_v42 = vld [vmem:[%s6971_s2 + $0x320] sm:$0xff] }
 0x2e2   :  { %v2068_v49 = vadd.f32 %v2067_v1, %v2066_v24  ;;  %v2075_v9 = vadd.f32 %v2074_v54, %v2073_v38  ;;  %v2424_v7 = vmul.f32 %v2296_v48, %v6442_v39  ;;  %v2425_v21 = vmul.f32 %v2297_v34, %v6444_v10 }
 0x2e3   :  { %v2051_v50 = vadd.f32 %v2050_v6, %v2049_v31  ;;  %v2057_v36 = vrot.slane %v2056_v15, 1  ;;  %v2063_v25 = vadd.f32 %v2062_v5, %v2061_v23  ;;  %v2298_v4 = vmul.f32 0.125, %v2044_v29  ;;  %v2860_v5 = vld [vmem:[%s6971_s2 + $0x328] sm:$0xff] }
 0x2e4   :  { %v2069_v3 = vrot.slane %v2068_v49, 2  ;;  %v2076_v27 = vrot.slane %v2075_v9, 2  ;;  %v2674_v33 = vsel %vm2576_vm1, %v2425_v21, %v2424_v7  ;;  %v3559_v61 = vsel %vm143_vm0, %v2855_v56, 0.0 }
 0x2e5   :  { %v2058_v0 = vadd.f32 %v2057_v36, %v2056_v15  ;;  %v2064_v35 = vrot.slane %v2063_v25, 1  ;;  %v2299_v20 = vmul.f32 0.125, %v2051_v50  ;;  %v2426_v8 = vmul.f32 %v2298_v4, %v6451_v28 }
 0x2e6   :  { %v2070_v14 = vadd.f32 %v2069_v3, %v2068_v49  ;;  %v2077_v16 = vadd.f32 %v2076_v27, %v2075_v9  ;;  %v3560_v41 = vrot.slane %v3559_v61, 4  ;;  %v3566_v32 = vsel %vm143_vm0, %v2856_v19, 0.0  ;;  %v2861_v3 = vld [vmem:[%s6971_s2 + $0x330] sm:$0xff] }
 0x2e7   :  { %v2065_v47 = vadd.f32 %v2064_v35, %v2063_v25  ;;  %v2300_v55 = vmul.f32 0.125, %v2058_v0  ;;  %v2427_v44 = vmul.f32 %v2299_v20, %v6456_v18  ;;  %v2675_v2 = vsel %vm2578_vm2, %v2426_v8, %v2674_v33 }
 0x2e8   :  { %v2071_v53 = vrot.slane %v2070_v14, 1  ;;  %v2078_v11 = vrot.slane %v2077_v16, 1  ;;  %v3561_v63 = vadd.f32 %v3560_v41, %v3559_v61  ;;  %v3567_v30 = vrot.slane %v3566_v32, 4 }
 0x2e9   :  { %v2301_v43 = vmul.f32 0.125, %v2065_v47  ;;  %v2428_v60 = vmul.f32 %v2300_v55, %v6462_v57  ;;  %v2676_v24 = vsel %vm2580_vm3, %v2427_v44, %v2675_v2  ;;  %v3573_v38 = vsel %vm143_vm0, %v2857_v13, 0.0  ;;  %v2862_v13 = vld [vmem:[%s6971_s2 + $0x338] sm:$0xff] }
 0x2ea   :  { %v2072_v40 = vadd.f32 %v2071_v53, %v2070_v14  ;;  %v2079_v31 = vadd.f32 %v2078_v11, %v2077_v16  ;;  %v3562_v23 = vrot.slane %v3561_v63, 2  ;;  %v3568_v1 = vadd.f32 %v3567_v30, %v3566_v32 }
 0x2eb   :  { %v2429_v54 = vmul.f32 %v2301_v43, %v6469_v52  ;;  %v2677_v48 = vsel %vm2582_vm4, %v2428_v60, %v2676_v24  ;;  %v3574_v34 = vrot.slane %v3573_v38, 4  ;;  %v3580_v29 = vsel %vm143_vm0, %v2858_v17, 0.0 }
 0x2ec   :  { %v2302_v6 = vmul.f32 0.125, %v2072_v40  ;;  %v2303_v15 = vmul.f32 0.125, %v2079_v31  ;;  %v3563_v56 = vadd.f32 %v3562_v23, %v3561_v63  ;;  %v3569_v49 = vrot.slane %v3568_v1, 2 }
 0x2ed   :  { %v2678_v9 = vsel %vm2584_vm5, %v2429_v54, %v2677_v48  ;;  %v3575_v7 = vadd.f32 %v3574_v34, %v3573_v38  ;;  %v3581_v21 = vrot.slane %v3580_v29, 4  ;;  %v3587_v50 = vsel %vm143_vm0, %v2859_v42, 0.0 }
 0x2ee   :  { %v2430_v36 = vmul.f32 %v2302_v6, %v6471_v51  ;;  %v2431_v25 = vmul.f32 %v2303_v15, %v6479_v62  ;;  %v3564_v4 = vrot.slane %v3563_v56, 1  ;;  %v3570_v19 = vadd.f32 %v3569_v49, %v3568_v1  ;;  %v127_v1 = vld [vmem:[%s6969_s0 + $0x380] sm:$0xff]  ;;  %v128_v49 = vld [vmem:[%s6969_s0 + $0x388] sm:$0xff] }
 0x2ef   :  { %v3576_v27 = vrot.slane %v3575_v7, 2  ;;  %v3582_v33 = vadd.f32 %v3581_v21, %v3580_v29  ;;  %v3588_v61 = vrot.slane %v3587_v50, 4  ;;  %v3594_v0 = vsel %vm143_vm0, %v2860_v5, 0.0 }
 0x2f0   :  { %v2679_v35 = vsel %vm2586_vm6, %v2430_v36, %v2678_v9  ;;  %v3565_v20 = vadd.f32 %v3564_v4, %v3563_v56  ;;  %v3571_v8 = vrot.slane %v3570_v19, 1  ;;  %v3595_v14 = vrot.slane %v3594_v0, 4 }
 0x2f1   :  { %v2680_v16 = vsel %vm2588_vm7, %v2431_v25, %v2679_v35  ;;  %v3577_v41 = vadd.f32 %v3576_v27, %v3575_v7  ;;  %v3583_v32 = vrot.slane %v3582_v33, 2  ;;  %v3589_v47 = vadd.f32 %v3588_v61, %v3587_v50 }
 0x2f2   :  { %v2750_v55 = vsel %vm143_vm0, %v2680_v16, 0.0  ;;  %v3572_v44 = vadd.f32 %v3571_v8, %v3570_v19  ;;  %v3596_v2 = vadd.f32 %v3595_v14, %v3594_v0  ;;  %v3601_v53 = vsel %vm143_vm0, %v2861_v3, 0.0  ;;  %v129_v3 = vld [vmem:[%s6969_s0 + $0x390] sm:$0xff] }
 0x2f3   :  { %2751 = vadd.xlane.f32.xlu0 %v2750_v55  ;;  %v3578_v11 = vrot.slane %v3577_v41, 1  ;;  %v3584_v17 = vadd.f32 %v3583_v32, %v3582_v33  ;;  %v3590_v63 = vrot.slane %v3589_v47, 2  ;;  %v3602_v30 = vrot.slane %v3601_v53, 4 }
 0x2f4   :  { %v3597_v43 = vrot.slane %v3596_v2, 2  ;;  %v3608_v60 = vsel %vm143_vm0, %v2862_v13, 0.0  ;;  %v3879_v24 = vmul.f32 0.125, %v3565_v20  ;;  %v3880_v38 = vmul.f32 0.125, %v3572_v44 }
 0x2f5   :  { %v3579_v40 = vadd.f32 %v3578_v11, %v3577_v41  ;;  %v3585_v31 = vrot.slane %v3584_v17, 1  ;;  %v3591_v42 = vadd.f32 %v3590_v63, %v3589_v47  ;;  %v3603_v23 = vadd.f32 %v3602_v30, %v3601_v53 }
 0x2f6   :  { %v3598_v54 = vadd.f32 %v3597_v43, %v3596_v2  ;;  %v3609_v48 = vrot.slane %v3608_v60, 4  ;;  %v4007_v34 = vmul.f32 %v3879_v24, %v6295_v45  ;;  %v4008_v29 = vmul.f32 %v3880_v38, %v6297_v26  ;;  %v131_v2 = vld [vmem:[%s6969_s0 + $0x3a0] sm:$0xff]  ;;  %v132_v24 = vld [vmem:[%s6969_s0 + $0x3a8] sm:$0xff] }
 0x2f7   :  { %v3586_v6 = vadd.f32 %v3585_v31, %v3584_v17  ;;  %v3592_v15 = vrot.slane %v3591_v42, 1  ;;  %v3604_v5 = vrot.slane %v3603_v23, 2  ;;  %v3881_v56 = vmul.f32 0.125, %v3579_v40 }
 0x2f8   :  { %v3599_v9 = vrot.slane %v3598_v54, 1  ;;  %v3610_v7 = vadd.f32 %v3609_v48, %v3608_v60  ;;  %v4251_v21 = vsel %vm2576_vm1, %v4008_v29, %v4007_v34  ;;  %v928_v50 = vsel %vm143_vm0, %v127_v1, 0.0 }
 0x2f9   :  { %v3593_v36 = vadd.f32 %v3592_v15, %v3591_v42  ;;  %v3605_v25 = vadd.f32 %v3604_v5, %v3603_v23  ;;  %v3882_v4 = vmul.f32 0.125, %v3586_v6  ;;  %v4009_v45 = vmul.f32 %v3881_v56, %v6303_v58  ;;  %v130_v58 = vld [vmem:[%s6969_s0 + $0x398] sm:$0xff] }
 0x2fa   :  { %v3600_v26 = vadd.f32 %v3599_v9, %v3598_v54  ;;  %v3611_v19 = vrot.slane %v3610_v7, 2  ;;  %v929_v27 = vrot.slane %v928_v50, 4  ;;  %v935_v33 = vsel %vm143_vm0, %v128_v49, 0.0  ;;  %v133_v54 = vld [vmem:[%s6969_s0 + $0x3b0] sm:$0xff] }
 0x2fb   :  { %v3606_v61 = vrot.slane %v3605_v25, 1  ;;  %v3883_v0 = vmul.f32 0.125, %v3593_v36  ;;  %v4010_v35 = vmul.f32 %v3882_v4, %v6311_v22  ;;  %v4252_v20 = vsel %vm2578_vm2, %v4009_v45, %v4251_v21  ;;  %v134_v21 = vld [vmem:[%s6969_s0 + $0x3b8] sm:$0xff] }
 0x2fc   :  { %v3612_v8 = vadd.f32 %v3611_v19, %v3610_v7  ;;  %v3884_v14 = vmul.f32 0.125, %v3600_v26  ;;  %v930_v16 = vadd.f32 %v929_v27, %v928_v50  ;;  %v936_v13 = vrot.slane %v935_v33, 4 }
 0x2fd   :  { %v3607_v41 = vadd.f32 %v3606_v61, %v3605_v25  ;;  %v4011_v32 = vmul.f32 %v3883_v0, %v6319_v59  ;;  %v4253_v47 = vsel %vm2580_vm3, %v4010_v35, %v4252_v20  ;;  %v942_v55 = vsel %vm143_vm0, %v129_v3, 0.0  ;;  %v1280_v0 = vld [vmem:[%s6970_s1 + $0x380] sm:$0xff] }
 0x2fe   :  { %v3613_v44 = vrot.slane %v3612_v8, 1  ;;  %v4012_v22 = vmul.f32 %v3884_v14, %v6325_v12  ;;  %v931_v53 = vrot.slane %v930_v16, 2  ;;  %v937_v11 = vadd.f32 %v936_v13, %v935_v33 }
 0x2ff   :  { %v3885_v17 = vmul.f32 0.125, %v3607_v41  ;;  %v4254_v63 = vsel %vm2582_vm4, %v4011_v32, %v4253_v47  ;;  %v943_v30 = vrot.slane %v942_v55, 4  ;;  %v949_v43 = vsel %vm143_vm0, %v130_v58, 0.0  ;;  %v1281_v32 = vld [vmem:[%s6970_s1 + $0x388] sm:$0xff] }
 0x300   :  { %v3614_v59 = vadd.f32 %v3613_v44, %v3612_v8  ;;  %v4255_v60 = vsel %vm2584_vm5, %v4012_v22, %v4254_v63  ;;  %v932_v12 = vadd.f32 %v931_v53, %v930_v16  ;;  %v938_v38 = vrot.slane %v937_v11, 2  ;;  %v1282_v63 = vld [vmem:[%s6970_s1 + $0x390] sm:$0xff] }
 0x301   :  { %v4013_v40 = vmul.f32 %v3885_v17, %v6327_v37  ;;  %v944_v31 = vadd.f32 %v943_v30, %v942_v55  ;;  %v950_v42 = vrot.slane %v949_v43, 4  ;;  %v956_v23 = vsel %vm143_vm0, %v131_v2, 0.0 }
 0x302   :  { %v3886_v1 = vmul.f32 0.125, %v3614_v59  ;;  %v933_v48 = vrot.slane %v932_v12, 1  ;;  %v939_v34 = vadd.f32 %v938_v38, %v937_v11  ;;  %v957_v29 = vrot.slane %v956_v23, 4 }
 0x303   :  { %v4256_v6 = vsel %vm2586_vm6, %v4013_v40, %v4255_v60  ;;  %v945_v15 = vrot.slane %v944_v31, 2  ;;  %v951_v5 = vadd.f32 %v950_v42, %v949_v43  ;;  %v963_v56 = vsel %vm143_vm0, %v132_v24, 0.0  ;;  %v1283_v40 = vld [vmem:[%s6970_s1 + $0x398] sm:$0xff] }
 0x304   :  { %v4014_v37 = vmul.f32 %v3886_v1, %v6335_v46  ;;  %v934_v49 = vadd.f32 %v933_v48, %v932_v12  ;;  %v940_v9 = vrot.slane %v939_v34, 1  ;;  %v958_v7 = vadd.f32 %v957_v29, %v956_v23 }
 0x305   :  { %v946_v50 = vadd.f32 %v945_v15, %v944_v31  ;;  %v952_v36 = vrot.slane %v951_v5, 2  ;;  %v964_v25 = vrot.slane %v963_v56, 4  ;;  %v970_v4 = vsel %vm143_vm0, %v133_v54, 0.0  ;;  %v1284_v31 = vld [vmem:[%s6970_s1 + $0x3a0] sm:$0xff] }
 0x306   :  { %v4257_v45 = vsel %vm2588_vm7, %v4014_v37, %v4256_v6  ;;  %v941_v26 = vadd.f32 %v940_v9, %v939_v34  ;;  %v959_v19 = vrot.slane %v958_v7, 2  ;;  %v971_v3 = vrot.slane %v970_v4, 4 }
 0x307   :  { %v4331_v27 = vsel %vm143_vm0, %v4257_v45, 0.0  ;;  %v947_v46 = vrot.slane %v946_v50, 1  ;;  %v953_v33 = vadd.f32 %v952_v36, %v951_v5  ;;  %v965_v61 = vadd.f32 %v964_v25, %v963_v56  ;;  %v1285_v56 = vld [vmem:[%s6970_s1 + $0x3a8] sm:$0xff] }
 0x308   :  { %4332 = vadd.xlane.f32.xlu1 %v4331_v27  ;;  %v960_v35 = vadd.f32 %v959_v19, %v958_v7  ;;  %v972_v20 = vadd.f32 %v971_v3, %v970_v4  ;;  %v977_v8 = vsel %vm143_vm0, %v134_v21, 0.0  ;;  %v6583_v14 = vmul.f32 0.125, %v934_v49  ;;  %v1286_v4 = vld [vmem:[%s6970_s1 + $0x3b0] sm:$0xff] }
 0x309   :  { %v948_v58 = vadd.f32 %v947_v46, %v946_v50  ;;  %v954_v16 = vrot.slane %v953_v33, 1  ;;  %v966_v13 = vrot.slane %v965_v61, 2  ;;  %v978_v41 = vrot.slane %v977_v8, 4 }
 0x30a   :  { %v961_v47 = vrot.slane %v960_v35, 1  ;;  %v973_v55 = vrot.slane %v972_v20, 2  ;;  %v6588_v44 = vmul.f32 0.125, %v941_v26  ;;  %v2080_v22 = vsel %vm143_vm0, %v1280_v0, 0.0 }
 0x30b   :  { %v955_v2 = vadd.f32 %v954_v16, %v953_v33  ;;  %v967_v53 = vadd.f32 %v966_v13, %v965_v61  ;;  %v979_v11 = vadd.f32 %v978_v41, %v977_v8  ;;  %v6591_v17 = vmul.f32 0.125, %v948_v58  ;;  %v1287_v61 = vld [vmem:[%s6970_s1 + $0x3b8] sm:$0xff] }
 0x30c   :  { %v962_v30 = vadd.f32 %v961_v47, %v960_v35  ;;  %v974_v43 = vadd.f32 %v973_v55, %v972_v20  ;;  %v2081_v59 = vrot.slane %v2080_v22, 4  ;;  %v2087_v60 = vsel %vm143_vm0, %v1281_v32, 0.0 }
 0x30d   :  { %v968_v24 = vrot.slane %v967_v53, 1  ;;  %v980_v12 = vrot.slane %v979_v11, 2  ;;  %v6597_v38 = vmul.f32 0.125, %v955_v2  ;;  %v2088_v42 = vrot.slane %v2087_v60, 4 }
 0x30e   :  { %v975_v23 = vrot.slane %v974_v43, 1  ;;  %v6605_v1 = vmul.f32 0.125, %v962_v30  ;;  %v2082_v54 = vadd.f32 %v2081_v59, %v2080_v22  ;;  %v2094_v48 = vsel %vm143_vm0, %v1282_v63, 0.0 }
 0x30f   :  { %v969_v34 = vadd.f32 %v968_v24, %v967_v53  ;;  %v981_v29 = vadd.f32 %v980_v12, %v979_v11  ;;  %v2089_v6 = vadd.f32 %v2088_v42, %v2087_v60  ;;  %v2095_v15 = vrot.slane %v2094_v48, 4 }
 0x310   :  { %v976_v5 = vadd.f32 %v975_v23, %v974_v43  ;;  %v2083_v37 = vrot.slane %v2082_v54, 2  ;;  %v2101_v49 = vsel %vm143_vm0, %v1283_v40, 0.0  ;;  %v2108_v9 = vsel %vm143_vm0, %v1284_v31, 0.0 }
 0x311   :  { %v982_v7 = vrot.slane %v981_v29, 1  ;;  %v6613_v21 = vmul.f32 0.125, %v969_v34  ;;  %v2090_v50 = vrot.slane %v2089_v6, 2  ;;  %v2096_v36 = vadd.f32 %v2095_v15, %v2094_v48  ;;  %v2863_v34 = vld [vmem:[%s6971_s2 + $0x340] sm:$0xff] }
 0x312   :  { %v6615_v25 = vmul.f32 0.125, %v976_v5  ;;  %v2084_v45 = vadd.f32 %v2083_v37, %v2082_v54  ;;  %v2102_v26 = vrot.slane %v2101_v49, 4  ;;  %v2109_v19 = vrot.slane %v2108_v9, 4 }
 0x313   :  { %v983_v3 = vadd.f32 %v982_v7, %v981_v29  ;;  %v2091_v27 = vadd.f32 %v2090_v50, %v2089_v6  ;;  %v2097_v46 = vrot.slane %v2096_v36, 2  ;;  %v2115_v33 = vsel %vm143_vm0, %v1285_v56, 0.0  ;;  %v2864_v7 = vld [vmem:[%s6971_s2 + $0x348] sm:$0xff] }
 0x314   :  { %v2085_v0 = vrot.slane %v2084_v45, 1  ;;  %v2103_v35 = vadd.f32 %v2102_v26, %v2101_v49  ;;  %v2110_v20 = vadd.f32 %v2109_v19, %v2108_v9  ;;  %v2116_v8 = vrot.slane %v2115_v33, 4 }
 0x315   :  { %v6624_v58 = vmul.f32 0.125, %v983_v3  ;;  %v2092_v16 = vrot.slane %v2091_v27, 1  ;;  %v2098_v13 = vadd.f32 %v2097_v46, %v2096_v36  ;;  %v2122_v41 = vsel %vm143_vm0, %v1286_v4, 0.0  ;;  %v2865_v46 = vld [vmem:[%s6971_s2 + $0x350] sm:$0xff] }
 0x316   :  { %v2086_v32 = vadd.f32 %v2085_v0, %v2084_v45  ;;  %v2104_v47 = vrot.slane %v2103_v35, 2  ;;  %v2111_v55 = vrot.slane %v2110_v20, 2  ;;  %v2117_v22 = vadd.f32 %v2116_v8, %v2115_v33 }
 0x317   :  { %v2093_v2 = vadd.f32 %v2092_v16, %v2091_v27  ;;  %v2099_v53 = vrot.slane %v2098_v13, 1  ;;  %v2123_v11 = vrot.slane %v2122_v41, 4  ;;  %v2129_v63 = vsel %vm143_vm0, %v1287_v61, 0.0 }
 0x318   :  { %v2105_v30 = vadd.f32 %v2104_v47, %v2103_v35  ;;  %v2112_v43 = vadd.f32 %v2111_v55, %v2110_v20  ;;  %v2118_v59 = vrot.slane %v2117_v22, 2  ;;  %v2130_v60 = vrot.slane %v2129_v63, 4 }
 0x319   :  { %v2100_v24 = vadd.f32 %v2099_v53, %v2098_v13  ;;  %v2124_v12 = vadd.f32 %v2123_v11, %v2122_v41  ;;  %v2304_v40 = vmul.f32 0.125, %v2086_v32  ;;  %v2305_v31 = vmul.f32 0.125, %v2093_v2  ;;  %v2866_v32 = vld [vmem:[%s6971_s2 + $0x358] sm:$0xff] }
 0x31a   :  { %v2106_v42 = vrot.slane %v2105_v30, 1  ;;  %v2113_v23 = vrot.slane %v2112_v43, 1  ;;  %v2119_v54 = vadd.f32 %v2118_v59, %v2117_v22  ;;  %v2131_v48 = vadd.f32 %v2130_v60, %v2129_v63  ;;  %v2867_v59 = vld [vmem:[%s6971_s2 + $0x360] sm:$0xff]  ;;  %v2868_v60 = vld [vmem:[%s6971_s2 + $0x368] sm:$0xff] }
 0x31b   :  { %v2125_v29 = vrot.slane %v2124_v12, 2  ;;  %v2306_v6 = vmul.f32 0.125, %v2100_v24  ;;  %v2432_v15 = vmul.f32 %v2304_v40, %v6583_v14  ;;  %v2433_v5 = vmul.f32 %v2305_v31, %v6588_v44 }
 0x31c   :  { %v2107_v56 = vadd.f32 %v2106_v42, %v2105_v30  ;;  %v2114_v37 = vadd.f32 %v2113_v23, %v2112_v43  ;;  %v2120_v49 = vrot.slane %v2119_v54, 1  ;;  %v2132_v9 = vrot.slane %v2131_v48, 2 }
 0x31d   :  { %v2126_v50 = vadd.f32 %v2125_v29, %v2124_v12  ;;  %v2434_v36 = vmul.f32 %v2306_v6, %v6591_v17  ;;  %v2681_v4 = vsel %vm2576_vm1, %v2433_v5, %v2432_v15  ;;  %v3615_v45 = vsel %vm143_vm0, %v2863_v34, 0.0 }
 0x31e   :  { %v2121_v26 = vadd.f32 %v2120_v49, %v2119_v54  ;;  %v2133_v19 = vadd.f32 %v2132_v9, %v2131_v48  ;;  %v2307_v3 = vmul.f32 0.125, %v2107_v56  ;;  %v2308_v27 = vmul.f32 0.125, %v2114_v37  ;;  %v2869_v49 = vld [vmem:[%s6971_s2 + $0x370] sm:$0xff] }
 0x31f   :  { %v2127_v33 = vrot.slane %v2126_v50, 1  ;;  %v2682_v61 = vsel %vm2578_vm2, %v2434_v36, %v2681_v4  ;;  %v3616_v0 = vrot.slane %v3615_v45, 4  ;;  %v3622_v35 = vsel %vm143_vm0, %v2864_v7, 0.0  ;;  %v2870_v4 = vld [vmem:[%s6971_s2 + $0x378] sm:$0xff] }
 0x320   :  { %v2134_v20 = vrot.slane %v2133_v19, 1  ;;  %v2309_v8 = vmul.f32 0.125, %v2121_v26  ;;  %v2435_v16 = vmul.f32 %v2307_v3, %v6597_v38  ;;  %v2436_v13 = vmul.f32 %v2308_v27, %v6605_v1 }
 0x321   :  { %v2128_v41 = vadd.f32 %v2127_v33, %v2126_v50  ;;  %v3617_v47 = vadd.f32 %v3616_v0, %v3615_v45  ;;  %v3623_v55 = vrot.slane %v3622_v35, 4  ;;  %v3629_v22 = vsel %vm143_vm0, %v2865_v46, 0.0 }
 0x322   :  { %v2135_v2 = vadd.f32 %v2134_v20, %v2133_v19  ;;  %v2437_v53 = vmul.f32 %v2309_v8, %v6613_v21  ;;  %v2683_v11 = vsel %vm2580_vm3, %v2435_v16, %v2682_v61  ;;  %v3630_v63 = vrot.slane %v3629_v22, 4 }
 0x323   :  { %v2310_v30 = vmul.f32 0.125, %v2128_v41  ;;  %v2684_v43 = vsel %vm2582_vm4, %v2436_v13, %v2683_v11  ;;  %v3618_v24 = vrot.slane %v3617_v47, 2  ;;  %v3624_v12 = vadd.f32 %v3623_v55, %v3622_v35 }
 0x324   :  { %v2311_v40 = vmul.f32 0.125, %v2135_v2  ;;  %v2685_v31 = vsel %vm2584_vm5, %v2437_v53, %v2684_v43  ;;  %v3631_v42 = vadd.f32 %v3630_v63, %v3629_v22  ;;  %v3636_v23 = vsel %vm143_vm0, %v2866_v32, 0.0 }
 0x325   :  { %v2438_v54 = vmul.f32 %v2310_v30, %v6615_v25  ;;  %v3619_v48 = vadd.f32 %v3618_v24, %v3617_v47  ;;  %v3625_v34 = vrot.slane %v3624_v12, 2  ;;  %v3637_v29 = vrot.slane %v3636_v23, 4  ;;  %v135_v24 = vld [vmem:[%s6969_s0 + $0x3c0] sm:$0xff] }
 0x326   :  { %v2439_v6 = vmul.f32 %v2311_v40, %v6624_v58  ;;  %v3632_v15 = vrot.slane %v3631_v42, 2  ;;  %v3643_v5 = vsel %vm143_vm0, %v2867_v59, 0.0  ;;  %v3650_v56 = vsel %vm143_vm0, %v2868_v60, 0.0 }
 0x327   :  { %v2686_v37 = vsel %vm2586_vm6, %v2438_v54, %v2685_v31  ;;  %v3620_v9 = vrot.slane %v3619_v48, 1  ;;  %v3626_v7 = vadd.f32 %v3625_v34, %v3624_v12  ;;  %v3638_v50 = vadd.f32 %v3637_v29, %v3636_v23  ;;  %v136_v29 = vld [vmem:[%s6969_s0 + $0x3c8] sm:$0xff] }
 0x328   :  { %v2687_v36 = vsel %vm2588_vm7, %v2439_v6, %v2686_v37  ;;  %v3633_v45 = vadd.f32 %v3632_v15, %v3631_v42  ;;  %v3644_v26 = vrot.slane %v3643_v5, 4  ;;  %v3651_v19 = vrot.slane %v3650_v56, 4 }
 0x329   :  { %v2753_v3 = vsel %vm143_vm0, %v2687_v36, 0.0  ;;  %v3621_v27 = vadd.f32 %v3620_v9, %v3619_v48  ;;  %v3627_v46 = vrot.slane %v3626_v7, 1  ;;  %v3639_v33 = vrot.slane %v3638_v50, 2  ;;  %v137_v9 = vld [vmem:[%s6969_s0 + $0x3d0] sm:$0xff] }
 0x32a   :  { %2754 = vadd.xlane.f32.xlu0 %v2753_v3  ;;  %v3634_v61 = vrot.slane %v3633_v45, 1  ;;  %v3645_v0 = vadd.f32 %v3644_v26, %v3643_v5  ;;  %v3652_v35 = vadd.f32 %v3651_v19, %v3650_v56  ;;  %v3657_v20 = vsel %vm143_vm0, %v2869_v49, 0.0  ;;  %v138_v19 = vld [vmem:[%s6969_s0 + $0x3d8] sm:$0xff] }
 0x32b   :  { %v3628_v8 = vadd.f32 %v3627_v46, %v3626_v7  ;;  %v3640_v16 = vadd.f32 %v3639_v33, %v3638_v50  ;;  %v3658_v13 = vrot.slane %v3657_v20, 4  ;;  %v3664_v41 = vsel %vm143_vm0, %v2870_v4, 0.0 }
 0x32c   :  { %v3635_v32 = vadd.f32 %v3634_v61, %v3633_v45  ;;  %v3646_v47 = vrot.slane %v3645_v0, 2  ;;  %v3653_v55 = vrot.slane %v3652_v35, 2  ;;  %v3665_v22 = vrot.slane %v3664_v41, 4 }
 0x32d   :  { %v3641_v2 = vrot.slane %v3640_v16, 1  ;;  %v3659_v53 = vadd.f32 %v3658_v13, %v3657_v20  ;;  %v3887_v11 = vmul.f32 0.125, %v3621_v27  ;;  %v3888_v63 = vmul.f32 0.125, %v3628_v8 }
 0x32e   :  { %v3647_v30 = vadd.f32 %v3646_v47, %v3645_v0  ;;  %v3654_v43 = vadd.f32 %v3653_v55, %v3652_v35  ;;  %v3666_v59 = vadd.f32 %v3665_v22, %v3664_v41  ;;  %v3889_v60 = vmul.f32 0.125, %v3635_v32 }
 0x32f   :  { %v3642_v12 = vadd.f32 %v3641_v2, %v3640_v16  ;;  %v3660_v40 = vrot.slane %v3659_v53, 2  ;;  %v4015_v31 = vmul.f32 %v3887_v11, %v6442_v39  ;;  %v4016_v42 = vmul.f32 %v3888_v63, %v6444_v10  ;;  %v139_v16 = vld [vmem:[%s6969_s0 + $0x3e0] sm:$0xff] }
 0x330   :  { %v3648_v23 = vrot.slane %v3647_v30, 1  ;;  %v3655_v54 = vrot.slane %v3654_v43, 1  ;;  %v3667_v48 = vrot.slane %v3666_v59, 2  ;;  %v4017_v34 = vmul.f32 %v3889_v60, %v6451_v28 }
 0x331   :  { %v3661_v6 = vadd.f32 %v3660_v40, %v3659_v53  ;;  %v3890_v15 = vmul.f32 0.125, %v3642_v12  ;;  %v4258_v5 = vsel %vm2576_vm1, %v4016_v42, %v4015_v31  ;;  %v984_v56 = vsel %vm143_vm0, %v135_v24, 0.0 }
 0x332   :  { %v3649_v37 = vadd.f32 %v3648_v23, %v3647_v30  ;;  %v3656_v49 = vadd.f32 %v3655_v54, %v3654_v43  ;;  %v3668_v39 = vadd.f32 %v3667_v48, %v3666_v59  ;;  %v4259_v10 = vsel %vm2578_vm2, %v4017_v34, %v4258_v5  ;;  %v142_v23 = vld [vmem:[%s6969_s0 + $0x3f8] sm:$0xff] }
 0x333   :  { %v3662_v28 = vrot.slane %v3661_v6, 1  ;;  %v4018_v7 = vmul.f32 %v3890_v15, %v6456_v18  ;;  %v985_v50 = vrot.slane %v984_v56, 4  ;;  %v991_v36 = vsel %vm143_vm0, %v136_v29, 0.0 }
 0x334   :  { %v3669_v4 = vrot.slane %v3668_v39, 1  ;;  %v3891_v45 = vmul.f32 0.125, %v3649_v37  ;;  %v3892_v26 = vmul.f32 0.125, %v3656_v49  ;;  %v992_v3 = vrot.slane %v991_v36, 4 }
 0x335   :  { %v3663_v27 = vadd.f32 %v3662_v28, %v3661_v6  ;;  %v4260_v46 = vsel %vm2580_vm3, %v4018_v7, %v4259_v10  ;;  %v986_v33 = vadd.f32 %v985_v50, %v984_v56  ;;  %v998_v61 = vsel %vm143_vm0, %v137_v9, 0.0  ;;  %v1288_v7 = vld [vmem:[%s6970_s1 + $0x3c0] sm:$0xff] }
 0x336   :  { %v3670_v0 = vadd.f32 %v3669_v4, %v3668_v39  ;;  %v4019_v18 = vmul.f32 %v3891_v45, %v6462_v57  ;;  %v4020_v35 = vmul.f32 %v3892_v26, %v6469_v52  ;;  %v993_v20 = vadd.f32 %v992_v3, %v991_v36  ;;  %v140_v52 = vld [vmem:[%s6969_s0 + $0x3e8] sm:$0xff] }
 0x337   :  { %v3893_v8 = vmul.f32 0.125, %v3663_v27  ;;  %v987_v13 = vrot.slane %v986_v33, 2  ;;  %v999_v41 = vrot.slane %v998_v61, 4  ;;  %v1005_v32 = vsel %vm143_vm0, %v138_v19, 0.0 }
 0x338   :  { %v3894_v47 = vmul.f32 0.125, %v3670_v0  ;;  %v4261_v55 = vsel %vm2582_vm4, %v4019_v18, %v4260_v46  ;;  %v994_v22 = vrot.slane %v993_v20, 2  ;;  %v1006_v2 = vrot.slane %v1005_v32, 4  ;;  %v1289_v46 = vld [vmem:[%s6970_s1 + $0x3c8] sm:$0xff] }
 0x339   :  { %v4021_v53 = vmul.f32 %v3893_v8, %v6471_v51  ;;  %v4262_v57 = vsel %vm2584_vm5, %v4020_v35, %v4261_v55  ;;  %v988_v11 = vadd.f32 %v987_v13, %v986_v33  ;;  %v1000_v63 = vadd.f32 %v999_v41, %v998_v61  ;;  %v141_v51 = vld [vmem:[%s6969_s0 + $0x3f0] sm:$0xff]  ;;  %v1291_v13 = vld [vmem:[%s6970_s1 + $0x3d8] sm:$0xff] }
 0x33a   :  { %v4022_v30 = vmul.f32 %v3894_v47, %v6479_v62  ;;  %v995_v43 = vadd.f32 %v994_v22, %v993_v20  ;;  %v1007_v59 = vadd.f32 %v1006_v2, %v1005_v32  ;;  %v1012_v60 = vsel %vm143_vm0, %v139_v16, 0.0  ;;  %v1290_v16 = vld [vmem:[%s6970_s1 + $0x3d0] sm:$0xff] }
 0x33b   :  { %v4263_v24 = vsel %vm2586_vm6, %v4021_v53, %v4262_v57  ;;  %v989_v12 = vrot.slane %v988_v11, 1  ;;  %v1001_v40 = vrot.slane %v1000_v63, 2  ;;  %v1013_v31 = vrot.slane %v1012_v60, 4 }
 0x33c   :  { %v4264_v42 = vsel %vm2588_vm7, %v4022_v30, %v4263_v24  ;;  %v996_v62 = vrot.slane %v995_v43, 1  ;;  %v1008_v54 = vrot.slane %v1007_v59, 2  ;;  %v1019_v48 = vsel %vm143_vm0, %v140_v52, 0.0  ;;  %v1292_v30 = vld [vmem:[%s6970_s1 + $0x3e0] sm:$0xff] }
 0x33d   :  { %v4334_v34 = vsel %vm143_vm0, %v4264_v42, 0.0  ;;  %v990_v29 = vadd.f32 %v989_v12, %v988_v11  ;;  %v1002_v6 = vadd.f32 %v1001_v40, %v1000_v63  ;;  %v1014_v15 = vadd.f32 %v1013_v31, %v1012_v60 }
 0x33e   :  { %4335 = vadd.xlane.f32.xlu1 %v4334_v34  ;;  %v997_v5 = vadd.f32 %v996_v62, %v995_v43  ;;  %v1009_v56 = vadd.f32 %v1008_v54, %v1007_v59  ;;  %v1020_v37 = vrot.slane %v1019_v48, 4  ;;  %v1026_v49 = vsel %vm143_vm0, %v141_v51, 0.0  ;;  %v1293_v54 = vld [vmem:[%s6970_s1 + $0x3e8] sm:$0xff] }
 0x33f   :  { %v1003_v39 = vrot.slane %v1002_v6, 1  ;;  %v1015_v10 = vrot.slane %v1014_v15, 2  ;;  %v1027_v9 = vrot.slane %v1026_v49, 4  ;;  %v1033_v28 = vsel %vm143_vm0, %v142_v23, 0.0 }
 0x340   :  { %v1010_v50 = vrot.slane %v1009_v56, 1  ;;  %v1021_v36 = vadd.f32 %v1020_v37, %v1019_v48  ;;  %v1034_v4 = vrot.slane %v1033_v28, 4  ;;  %v6727_v45 = vmul.f32 0.125, %v990_v29 }
 0x341   :  { %v1004_v26 = vadd.f32 %v1003_v39, %v1002_v6  ;;  %v1016_v19 = vadd.f32 %v1015_v10, %v1014_v15  ;;  %v1028_v3 = vadd.f32 %v1027_v9, %v1026_v49  ;;  %v6729_v27 = vmul.f32 0.125, %v997_v5  ;;  %v1294_v49 = vld [vmem:[%s6970_s1 + $0x3f0] sm:$0xff]  ;;  %v1295_v39 = vld [vmem:[%s6970_s1 + $0x3f8] sm:$0xff] }
 0x342   :  { %v1011_v33 = vadd.f32 %v1010_v50, %v1009_v56  ;;  %v1022_v61 = vrot.slane %v1021_v36, 2  ;;  %v1035_v0 = vadd.f32 %v1034_v4, %v1033_v28  ;;  %v2136_v18 = vsel %vm143_vm0, %v1288_v7, 0.0 }
 0x343   :  { %v1017_v35 = vrot.slane %v1016_v19, 1  ;;  %v1029_v20 = vrot.slane %v1028_v3, 2  ;;  %v6735_v8 = vmul.f32 0.125, %v1004_v26  ;;  %v2137_v41 = vrot.slane %v2136_v18, 4 }
 0x344   :  { %v1023_v32 = vadd.f32 %v1022_v61, %v1021_v36  ;;  %v1036_v47 = vrot.slane %v1035_v0, 2  ;;  %v6743_v55 = vmul.f32 0.125, %v1011_v33  ;;  %v2143_v22 = vsel %vm143_vm0, %v1289_v46, 0.0 }
 0x345   :  { %v1018_v2 = vadd.f32 %v1017_v35, %v1016_v19  ;;  %v1030_v53 = vadd.f32 %v1029_v20, %v1028_v3  ;;  %v2138_v57 = vadd.f32 %v2137_v41, %v2136_v18  ;;  %v2144_v52 = vrot.slane %v2143_v22, 4 }
 0x346   :  { %v1024_v11 = vrot.slane %v1023_v32, 1  ;;  %v1037_v63 = vadd.f32 %v1036_v47, %v1035_v0  ;;  %v2150_v43 = vsel %vm143_vm0, %v1290_v16, 0.0  ;;  %v2157_v59 = vsel %vm143_vm0, %v1291_v13, 0.0 }
 0x347   :  { %v1031_v60 = vrot.slane %v1030_v53, 1  ;;  %v6751_v24 = vmul.f32 0.125, %v1018_v2  ;;  %v2139_v51 = vrot.slane %v2138_v57, 2  ;;  %v2145_v12 = vadd.f32 %v2144_v52, %v2143_v22 }
 0x348   :  { %v1025_v40 = vadd.f32 %v1024_v11, %v1023_v32  ;;  %v1038_v31 = vrot.slane %v1037_v63, 1  ;;  %v2151_v42 = vrot.slane %v2150_v43, 4  ;;  %v2158_v23 = vrot.slane %v2157_v59, 4  ;;  %v2879_v11 = vld [vmem:[%s6971_s2 + $0x3c0] sm:$0xff] }
 0x349   :  { %v1032_v62 = vadd.f32 %v1031_v60, %v1030_v53  ;;  %v2140_v48 = vadd.f32 %v2139_v51, %v2138_v57  ;;  %v2146_v34 = vrot.slane %v2145_v12, 2  ;;  %v2164_v29 = vsel %vm143_vm0, %v1292_v30, 0.0 }
 0x34a   :  { %v1039_v6 = vadd.f32 %v1038_v31, %v1037_v63  ;;  %v6757_v15 = vmul.f32 0.125, %v1025_v40  ;;  %v2152_v5 = vadd.f32 %v2151_v42, %v2150_v43  ;;  %v2159_v56 = vadd.f32 %v2158_v23, %v2157_v59 }
 0x34b   :  { %v6759_v37 = vmul.f32 0.125, %v1032_v62  ;;  %v2141_v10 = vrot.slane %v2140_v48, 1  ;;  %v2147_v9 = vadd.f32 %v2146_v34, %v2145_v12  ;;  %v2165_v28 = vrot.slane %v2164_v29, 4  ;;  %v2880_v62 = vld [vmem:[%s6971_s2 + $0x3c8] sm:$0xff] }
 0x34c   :  { %v6767_v7 = vmul.f32 0.125, %v1039_v6  ;;  %v2153_v50 = vrot.slane %v2152_v5, 2  ;;  %v2160_v36 = vrot.slane %v2159_v56, 2  ;;  %v2171_v4 = vsel %vm143_vm0, %v1293_v54, 0.0 }
 0x34d   :  { %v2142_v26 = vadd.f32 %v2141_v10, %v2140_v48  ;;  %v2148_v19 = vrot.slane %v2147_v9, 1  ;;  %v2166_v3 = vadd.f32 %v2165_v28, %v2164_v29  ;;  %v2172_v46 = vrot.slane %v2171_v4, 4 }
 0x34e   :  { %v2154_v33 = vadd.f32 %v2153_v50, %v2152_v5  ;;  %v2161_v61 = vadd.f32 %v2160_v36, %v2159_v56  ;;  %v2178_v0 = vsel %vm143_vm0, %v1294_v49, 0.0  ;;  %v2185_v18 = vsel %vm143_vm0, %v1295_v39, 0.0  ;;  %v2881_v50 = vld [vmem:[%s6971_s2 + $0x3d0] sm:$0xff] }
 0x34f   :  { %v2149_v35 = vadd.f32 %v2148_v19, %v2147_v9  ;;  %v2167_v20 = vrot.slane %v2166_v3, 2  ;;  %v2173_v16 = vadd.f32 %v2172_v46, %v2171_v4  ;;  %v2179_v13 = vrot.slane %v2178_v0, 4 }
 0x350   :  { %v2155_v41 = vrot.slane %v2154_v33, 1  ;;  %v2162_v32 = vrot.slane %v2161_v61, 1  ;;  %v2186_v47 = vrot.slane %v2185_v18, 4  ;;  %v2312_v22 = vmul.f32 0.125, %v2142_v26 }
 0x351   :  { %v2168_v2 = vadd.f32 %v2167_v20, %v2166_v3  ;;  %v2174_v53 = vrot.slane %v2173_v16, 2  ;;  %v2180_v57 = vadd.f32 %v2179_v13, %v2178_v0  ;;  %v2313_v52 = vmul.f32 0.125, %v2149_v35 }
 0x352   :  { %v2156_v63 = vadd.f32 %v2155_v41, %v2154_v33  ;;  %v2163_v30 = vadd.f32 %v2162_v32, %v2161_v61  ;;  %v2187_v43 = vadd.f32 %v2186_v47, %v2185_v18  ;;  %v2440_v59 = vmul.f32 %v2312_v22, %v6727_v45  ;;  %v2882_v18 = vld [vmem:[%s6971_s2 + $0x3d8] sm:$0xff]  ;;  %v2883_v22 = vld [vmem:[%s6971_s2 + $0x3e0] sm:$0xff] }
 0x353   :  { %v2169_v60 = vrot.slane %v2168_v2, 1  ;;  %v2175_v51 = vadd.f32 %v2174_v53, %v2173_v16  ;;  %v2181_v12 = vrot.slane %v2180_v57, 2  ;;  %v2441_v40 = vmul.f32 %v2313_v52, %v6729_v27 }
 0x354   :  { %v2188_v31 = vrot.slane %v2187_v43, 2  ;;  %v2314_v42 = vmul.f32 0.125, %v2156_v63  ;;  %v2315_v23 = vmul.f32 0.125, %v2163_v30  ;;  %v3727_v54 = vsel %vm143_vm0, %v2879_v11, 0.0 }
 0x355   :  { %v2170_v48 = vadd.f32 %v2169_v60, %v2168_v2  ;;  %v2176_v34 = vrot.slane %v2175_v51, 1  ;;  %v2182_v29 = vadd.f32 %v2181_v12, %v2180_v57  ;;  %v2688_v6 = vsel %vm2576_vm1, %v2441_v40, %v2440_v59 }
 0x356   :  { %v2189_v5 = vadd.f32 %v2188_v31, %v2187_v43  ;;  %v2442_v56 = vmul.f32 %v2314_v42, %v6735_v8  ;;  %v2443_v49 = vmul.f32 %v2315_v23, %v6743_v55  ;;  %v3728_v39 = vrot.slane %v3727_v54, 4  ;;  %v2884_v43 = vld [vmem:[%s6971_s2 + $0x3e8] sm:$0xff]  ;;  %v2885_v23 = vld [vmem:[%s6971_s2 + $0x3f0] sm:$0xff] }
 0x357   :  { %v2177_v10 = vadd.f32 %v2176_v34, %v2175_v51  ;;  %v2183_v9 = vrot.slane %v2182_v29, 1  ;;  %v2316_v28 = vmul.f32 0.125, %v2170_v48  ;;  %v3734_v36 = vsel %vm143_vm0, %v2880_v62, 0.0  ;;  %v2886_v62 = vld [vmem:[%s6971_s2 + $0x3f8] sm:$0xff] }
 0x358   :  { %v2190_v4 = vrot.slane %v2189_v5, 1  ;;  %v2689_v26 = vsel %vm2578_vm2, %v2442_v56, %v2688_v6  ;;  %v3729_v19 = vadd.f32 %v3728_v39, %v3727_v54  ;;  %v3735_v3 = vrot.slane %v3734_v36, 4 }
 0x359   :  { %v2184_v46 = vadd.f32 %v2183_v9, %v2182_v29  ;;  %v2317_v33 = vmul.f32 0.125, %v2177_v10  ;;  %v2444_v61 = vmul.f32 %v2316_v28, %v6751_v24  ;;  %v2690_v0 = vsel %vm2580_vm3, %v2443_v49, %v2689_v26 }
 0x35a   :  { %v2191_v35 = vadd.f32 %v2190_v4, %v2189_v5  ;;  %v3730_v20 = vrot.slane %v3729_v19, 2  ;;  %v3736_v16 = vadd.f32 %v3735_v3, %v3734_v36  ;;  %v3741_v13 = vsel %vm143_vm0, %v2881_v50, 0.0 }
 0x35b   :  { %v2318_v41 = vmul.f32 0.125, %v2184_v46  ;;  %v2445_v32 = vmul.f32 %v2317_v33, %v6757_v15  ;;  %v2691_v47 = vsel %vm2582_vm4, %v2444_v61, %v2690_v0  ;;  %v3742_v2 = vrot.slane %v3741_v13, 4 }
 0x35c   :  { %v2319_v53 = vmul.f32 0.125, %v2191_v35  ;;  %v3731_v57 = vadd.f32 %v3730_v20, %v3729_v19  ;;  %v3737_v52 = vrot.slane %v3736_v16, 2  ;;  %v3748_v11 = vsel %vm143_vm0, %v2882_v18, 0.0 }
 0x35d   :  { %v2446_v63 = vmul.f32 %v2318_v41, %v6759_v37  ;;  %v2692_v30 = vsel %vm2584_vm5, %v2445_v32, %v2691_v47  ;;  %v3743_v59 = vadd.f32 %v3742_v2, %v3741_v13  ;;  %v3749_v60 = vrot.slane %v3748_v11, 4  ;;  %v2871_v41 = vld [vmem:[%s6971_s2 + $0x380] sm:$0xff] }
 0x35e   :  { %v2447_v51 = vmul.f32 %v2319_v53, %v6767_v7  ;;  %v3732_v12 = vrot.slane %v3731_v57, 1  ;;  %v3738_v40 = vadd.f32 %v3737_v52, %v3736_v16  ;;  %v3755_v31 = vsel %vm143_vm0, %v2883_v22, 0.0 }
 0x35f   :  { %v2693_v42 = vsel %vm2586_vm6, %v2446_v63, %v2692_v30  ;;  %v3744_v54 = vrot.slane %v3743_v59, 2  ;;  %v3750_v48 = vadd.f32 %v3749_v60, %v3748_v11  ;;  %v3756_v34 = vrot.slane %v3755_v31, 4  ;;  %v2872_v63 = vld [vmem:[%s6971_s2 + $0x388] sm:$0xff] }
 0x360   :  { %v2694_v29 = vsel %vm2588_vm7, %v2447_v51, %v2693_v42  ;;  %v3733_v6 = vadd.f32 %v3732_v12, %v3731_v57  ;;  %v3739_v5 = vrot.slane %v3738_v40, 1  ;;  %v3762_v56 = vsel %vm143_vm0, %v2884_v43, 0.0  ;;  %v2873_v42 = vld [vmem:[%s6971_s2 + $0x390] sm:$0xff] }
 0x361   :  { %v2756_v49 = vsel %vm143_vm0, %v2694_v29, 0.0  ;;  %v3745_v39 = vadd.f32 %v3744_v54, %v3743_v59  ;;  %v3751_v10 = vrot.slane %v3750_v48, 2  ;;  %v3757_v9 = vadd.f32 %v3756_v34, %v3755_v31 }
 0x362   :  { %2757 = vadd.xlane.f32.xlu0 %v2756_v49  ;;  %v3740_v28 = vadd.f32 %v3739_v5, %v3738_v40  ;;  %v3763_v50 = vrot.slane %v3762_v56, 4  ;;  %v3769_v36 = vsel %vm143_vm0, %v2885_v23, 0.0  ;;  %v3776_v4 = vsel %vm143_vm0, %v2886_v62, 0.0 }
 0x363   :  { %v3746_v26 = vrot.slane %v3745_v39, 1  ;;  %v3752_v19 = vadd.f32 %v3751_v10, %v3750_v48  ;;  %v3758_v3 = vrot.slane %v3757_v9, 2  ;;  %v3770_v46 = vrot.slane %v3769_v36, 4 }
 0x364   :  { %v3764_v33 = vadd.f32 %v3763_v50, %v3762_v56  ;;  %v3777_v61 = vrot.slane %v3776_v4, 4  ;;  %v3903_v0 = vmul.f32 0.125, %v3733_v6  ;;  %v3904_v18 = vmul.f32 0.125, %v3740_v28 }
 0x365   :  { %v3747_v35 = vadd.f32 %v3746_v26, %v3745_v39  ;;  %v3753_v20 = vrot.slane %v3752_v19, 1  ;;  %v3759_v16 = vadd.f32 %v3758_v3, %v3757_v9  ;;  %v3771_v13 = vadd.f32 %v3770_v46, %v3769_v36 }
 0x366   :  { %v3765_v32 = vrot.slane %v3764_v33, 2  ;;  %v3778_v47 = vadd.f32 %v3777_v61, %v3776_v4  ;;  %v4031_v22 = vmul.f32 %v3903_v0, %v6727_v45  ;;  %v4032_v2 = vmul.f32 %v3904_v18, %v6729_v27 }
 0x367   :  { %v3754_v53 = vadd.f32 %v3753_v20, %v3752_v19  ;;  %v3760_v57 = vrot.slane %v3759_v16, 1  ;;  %v3772_v52 = vrot.slane %v3771_v13, 2  ;;  %v3905_v11 = vmul.f32 0.125, %v3747_v35  ;;  %v2876_v20 = vld [vmem:[%s6971_s2 + $0x3a8] sm:$0xff] }
 0x368   :  { %v3766_v30 = vadd.f32 %v3765_v32, %v3764_v33  ;;  %v3779_v43 = vrot.slane %v3778_v47, 2  ;;  %v4272_v59 = vsel %vm2576_vm1, %v4032_v2, %v4031_v22  ;;  %v3671_v60 = vsel %vm143_vm0, %v2871_v41, 0.0 }
 0x369   :  { %v3761_v51 = vadd.f32 %v3760_v57, %v3759_v16  ;;  %v3773_v12 = vadd.f32 %v3772_v52, %v3771_v13  ;;  %v3906_v40 = vmul.f32 0.125, %v3754_v53  ;;  %v4033_v45 = vmul.f32 %v3905_v11, %v6735_v8  ;;  %v2874_v8 = vld [vmem:[%s6971_s2 + $0x398] sm:$0xff] }
 0x36a   :  { %v3767_v27 = vrot.slane %v3766_v30, 1  ;;  %v3780_v31 = vadd.f32 %v3779_v43, %v3778_v47  ;;  %v3672_v23 = vrot.slane %v3671_v60, 4  ;;  %v3678_v62 = vsel %vm143_vm0, %v2872_v63, 0.0  ;;  %v2878_v53 = vld [vmem:[%s6971_s2 + $0x3b8] sm:$0xff] }
 0x36b   :  { %v3774_v54 = vrot.slane %v3773_v12, 1  ;;  %v3907_v48 = vmul.f32 0.125, %v3761_v51  ;;  %v4034_v34 = vmul.f32 %v3906_v40, %v6743_v55  ;;  %v4273_v29 = vsel %vm2578_vm2, %v4033_v45, %v4272_v59  ;;  %v2875_v55 = vld [vmem:[%s6971_s2 + $0x3a0] sm:$0xff] }
 0x36c   :  { %v3768_v6 = vadd.f32 %v3767_v27, %v3766_v30  ;;  %v3781_v5 = vrot.slane %v3780_v31, 1  ;;  %v3673_v56 = vadd.f32 %v3672_v23, %v3671_v60  ;;  %v3679_v49 = vrot.slane %v3678_v62, 4 }
 0x36d   :  { %v3775_v39 = vadd.f32 %v3774_v54, %v3773_v12  ;;  %v4035_v10 = vmul.f32 %v3907_v48, %v6751_v24  ;;  %v4274_v9 = vsel %vm2580_vm3, %v4034_v34, %v4273_v29  ;;  %v3685_v28 = vsel %vm143_vm0, %v2873_v42, 0.0 }
 0x36e   :  { %v3782_v50 = vadd.f32 %v3781_v5, %v3780_v31  ;;  %v3908_v36 = vmul.f32 0.125, %v3768_v6  ;;  %v3674_v4 = vrot.slane %v3673_v56, 2  ;;  %v3680_v26 = vadd.f32 %v3679_v49, %v3678_v62 }
 0x36f   :  { %v3909_v19 = vmul.f32 0.125, %v3775_v39  ;;  %v4275_v3 = vsel %vm2582_vm4, %v4035_v10, %v4274_v9  ;;  %v3686_v46 = vrot.slane %v3685_v28, 4  ;;  %v3692_v33 = vsel %vm143_vm0, %v2874_v8, 0.0 }
 0x370   :  { %v3910_v61 = vmul.f32 0.125, %v3782_v50  ;;  %v4036_v24 = vmul.f32 %v3908_v36, %v6757_v15  ;;  %v3675_v0 = vadd.f32 %v3674_v4, %v3673_v56  ;;  %v3681_v18 = vrot.slane %v3680_v26, 2 }
 0x371   :  { %v4037_v35 = vmul.f32 %v3909_v19, %v6759_v37  ;;  %v3687_v16 = vadd.f32 %v3686_v46, %v3685_v28  ;;  %v3693_v13 = vrot.slane %v3692_v33, 4  ;;  %v3699_v41 = vsel %vm143_vm0, %v2875_v55, 0.0  ;;  %v2877_v37 = vld [vmem:[%s6971_s2 + $0x3b0] sm:$0xff]  ;;  %s4559_s2 = smov [#allocation2]  }
 0x372   :  { %v4038_v32 = vmul.f32 %v3910_v61, %v6767_v7  ;;  %v4276_v47 = vsel %vm2584_vm5, %v4036_v24, %v4275_v3  ;;  %v3676_v22 = vrot.slane %v3675_v0, 1  ;;  %v3682_v2 = vadd.f32 %v3681_v18, %v3680_v26  ;;  %s4526_s20 = sshll.u32 %s4559_s2, 4  ;;  %s4527_s20 = int_to_ptr.vmem [resolvable:$true] %s4526_s20 }
 0x373   :  { %v4277_v15 = vsel %vm2586_vm6, %v4037_v35, %v4276_v47  ;;  %v3688_v57 = vrot.slane %v3687_v16, 2  ;;  %v3694_v52 = vadd.f32 %v3693_v13, %v3692_v33  ;;  %v3700_v11 = vrot.slane %v3699_v41, 4  ;;  %s4535_s21 = scalar_lea.vmem %s4527_s20, 16  ;;  %s4539_s22 = scalar_lea.vmem %s4527_s20, 32 }
 0x374   :  { %v4278_v63 = vsel %vm2588_vm7, %v4038_v32, %v4277_v15  ;;  %v3677_v7 = vadd.f32 %v3676_v22, %v3675_v0  ;;  %v3683_v30 = vrot.slane %v3682_v2, 1  ;;  %v3706_v43 = vsel %vm143_vm0, %v2876_v20, 0.0  ;;  %p4536_p0 = scmp.ne.s32.totalorder %s4527_s20, %s4535_s21  ;;  %p4540_p1 = scmp.lt.s32.totalorder %s4527_s20, %s4527_s20 }
 0x375   :  { %v4340_v59 = vsel %vm143_vm0, %v4278_v63, 0.0  ;;  %v3689_v60 = vadd.f32 %v3688_v57, %v3687_v16  ;;  %v3695_v51 = vrot.slane %v3694_v52, 2  ;;  %v3701_v12 = vadd.f32 %v3700_v11, %v3699_v41  ;;  %p4541_p2 = scmp.lt.s32.totalorder %s4539_s22, %s4535_s21 }
 0x376   :  { %4341 = vadd.xlane.f32.xlu1 %v4340_v59  ;;  %v3684_v40 = vadd.f32 %v3683_v30, %v3682_v2  ;;  %v3707_v45 = vrot.slane %v3706_v43, 4  ;;  %v3713_v27 = vsel %vm143_vm0, %v2877_v37, 0.0  ;;  %v3720_v31 = vsel %vm143_vm0, %v2878_v53, 0.0  ;;  %v2713_v30 = vpop.xlane.xlu0 %2712 }
 0x377   :  { %v3690_v42 = vrot.slane %v3689_v60, 1  ;;  %v3696_v23 = vadd.f32 %v3695_v51, %v3694_v52  ;;  %v3702_v62 = vrot.slane %v3701_v12, 2  ;;  %v3714_v54 = vrot.slane %v3713_v27, 4  ;;  %p4542_p3 = por %p4541_p2, %p4540_p1 }
 0x378   :  { %v3708_v48 = vadd.f32 %v3707_v45, %v3706_v43  ;;  %v3721_v34 = vrot.slane %v3720_v31, 4  ;;  %v3895_v29 = vmul.f32 0.125, %v3677_v7  ;;  %v3896_v6 = vmul.f32 0.125, %v3684_v40  ;;  %v2719_v7 = vpop.xlane.xlu1 %2718 }
 0x379   :  { %v3691_v5 = vadd.f32 %v3690_v42, %v3689_v60  ;;  %v3697_v8 = vrot.slane %v3696_v23, 1  ;;  %v3703_v56 = vadd.f32 %v3702_v62, %v3701_v12  ;;  %v3715_v49 = vadd.f32 %v3714_v54, %v3713_v27  ;;  %p4543_p4 = pnand %p4542_p3, %p4536_p0 }
 0x37a   :  { %v3709_v39 = vrot.slane %v3708_v48, 2  ;;  %v3722_v10 = vadd.f32 %v3721_v34, %v3720_v31  ;;  %v4023_v9 = vmul.f32 %v3895_v29, %v6583_v14  ;;  %v4024_v28 = vmul.f32 %v3896_v6, %v6588_v44  ;;  %v2716_v59 = vpop.xlane.xlu0 %2715 }
 0x37b   :  { %v3698_v50 = vadd.f32 %v3697_v8, %v3696_v23  ;;  %v3704_v36 = vrot.slane %v3703_v56, 1  ;;  %v3716_v55 = vrot.slane %v3715_v49, 2  ;;  %v3897_v4 = vmul.f32 0.125, %v3691_v5 }
 0x37c   :  { %v3710_v26 = vadd.f32 %v3709_v39, %v3708_v48  ;;  %v3723_v19 = vrot.slane %v3722_v10, 2  ;;  %v4265_v3 = vsel %vm2576_vm1, %v4024_v28, %v4023_v9  ;;  %v2722_v43 = vpop.xlane.xlu1 %2721  ;;  %v4344_v39 = vsub.f32 1.0, %v2716_v59 }
 0x37d   :  { %v3705_v46 = vadd.f32 %v3704_v36, %v3703_v56  ;;  %v3717_v33 = vadd.f32 %v3716_v55, %v3715_v49  ;;  %v3898_v61 = vmul.f32 0.125, %v3698_v50  ;;  %v4025_v24 = vmul.f32 %v3897_v4, %v6591_v17 }
 0x37e   :  { %v3711_v0 = vrot.slane %v3710_v26, 1  ;;  %v3724_v18 = vadd.f32 %v3723_v19, %v3722_v10  ;;  %v4297_v51 = vpop.xlane.xlu0 %4296  ;;  %v4407_v56 = vlaneseq  ;;  %v4343_v49 = vsub.f32 1.0, %v2713_v30 }
 0x37f   :  { %v3718_v35 = vrot.slane %v3717_v33, 1  ;;  %v3899_v20 = vmul.f32 0.125, %v3705_v46  ;;  %v4026_v14 = vmul.f32 %v3898_v61, %v6597_v38  ;;  %v4266_v44 = vsel %vm2578_vm2, %v4025_v24, %v4265_v3 }
 0x380   :  { %v3712_v16 = vadd.f32 %v3711_v0, %v3710_v26  ;;  %v3725_v13 = vrot.slane %v3724_v18, 1  ;;  %v4300_v60 = vpop.xlane.xlu1 %4299  ;;  %v4345_v10 = vsub.f32 1.0, %v2719_v7  ;;  %v4346_v9 = vsub.f32 1.0, %v2722_v43 }
 0x381   :  { %v3719_v41 = vadd.f32 %v3718_v35, %v3717_v33  ;;  %v4027_v32 = vmul.f32 %v3899_v20, %v6605_v1  ;;  %v4267_v47 = vsel %vm2580_vm3, %v4026_v14, %v4266_v44  ;;  %v4359_v3 = vadd.f32 %v4343_v49, %v4297_v51 }
 0x382   :  { %v3726_v22 = vadd.f32 %v3725_v13, %v3724_v18  ;;  %v3900_v2 = vmul.f32 0.125, %v3712_v16  ;;  %v2725_v12 = vpop.xlane.xlu0 %2724  ;;  %v4360_v46 = vadd.f32 %v4344_v39, %v4300_v60  ;;  %v6886_v0 = vand.u32 127, %v4407_v56 }
 0x383   :  { %v3901_v15 = vmul.f32 0.125, %v3719_v41  ;;  %v4268_v17 = vsel %vm2582_vm4, %v4027_v32, %v4267_v47  ;;  %v4347_v50 = vsub.f32 1.0, %v2725_v12  ;;  %vm4418_vm8 = vcmask 130112  }
 0x384   :  { %v3902_v37 = vmul.f32 0.125, %v3726_v22  ;;  %v4028_v53 = vmul.f32 %v3900_v2, %v6613_v21  ;;  %v4303_v21 = vpop.xlane.xlu1 %4302  ;;  %v4375_v22 = vmax.f32 %v4359_v3, 0.0  ;;  %v4376_v2 = vmax.f32 %v4360_v46, 0.0 }
 0x385   :  { %v4029_v57 = vmul.f32 %v3901_v15, %v6615_v25  ;;  %v4361_v61 = vadd.f32 %v4345_v10, %v4303_v21  ;;  %v4420_v30 = vadd.s32 4294967280, %v6886_v0  ;;  %v4427_v43 = vadd.s32 4294967272, %v6886_v0 }
 0x386   :  { %v4030_v38 = vmul.f32 %v3902_v37, %v6624_v58  ;;  %v4269_v52 = vsel %vm2584_vm5, %v4028_v53, %v4268_v17  ;;  %v2728_v40 = vpop.xlane.xlu0 %2727  ;;  %v6899_v53 = vshrl.u32 %v4407_v56, 7  ;;  %v4434_v60 = vadd.s32 4294967264, %v6886_v0 }
 0x387   :  { %v4270_v11 = vsel %vm2586_vm6, %v4029_v57, %v4269_v52  ;;  %v4348_v36 = vsub.f32 1.0, %v2728_v40  ;;  %v4377_v17 = vmax.f32 %v4361_v61, 0.0  ;;  %v4413_v57 = vadd.s32 4294967288, %v6886_v0 }
 0x388   :  { %v4271_v1 = vsel %vm2588_vm7, %v4030_v38, %v4270_v11  ;;  %v4306_v25 = vpop.xlane.xlu1 %4305  ;;  %v4441_v51 = vadd.s32 4294967256, %v6886_v0  ;;  %v4448_v21 = vadd.s32 4294967248, %v6886_v0  ;;  %v4411_v40 = vsub.s32 %v6886_v0, %v6899_v53 }
 0x389   :  { %v4337_v63 = vsel %vm143_vm0, %v4271_v1, 0.0  ;;  %v4362_v24 = vadd.f32 %v4346_v9, %v4306_v25  ;;  %vm4425_vm9 = vcmask 195712   ;;  %vm4432_vm10 = vcmask 261312  }
 0x38a   :  { %4338 = vadd.xlane.f32.xlu0 %v4337_v63  ;;  %v2731_v45 = vpop.xlane.xlu0 %2730  ;;  %vm4439_vm11 = vcmask 326912   ;;  %vm4446_vm12 = vcmask 392512   ;;  %vm4453_vm13 = vcmask 458112   ;;  %vm4460_vm14 = vcmask 523712  }
 0x38b   :  { %v4349_v55 = vsub.f32 1.0, %v2731_v45  ;;  %v4378_v37 = vmax.f32 %v4362_v24, 0.0  ;;  %v4455_v45 = vadd.s32 4294967240, %v6886_v0  ;;  %vm4467_vm15 = vcmask 589312  }
 0x38c   :  { %v4309_v58 = vpop.xlane.xlu1 %4308  ;;  %v4469_v56 = vadd.s32 4294967224, %v6886_v0  ;;  %vm4474_vm0 = vcmask 654912   ;;  %vm4481_vm1 = vcmask 720512   ;;  %vm4488_vm2 = vcmask 786112  }
 0x38d   :  { %v4363_v18 = vadd.f32 %v4347_v50, %v4309_v58  ;;  %v4416_v58 = vsub.s32 %v4413_v57, %v6899_v53  ;;  %vm4495_vm3 = vcmask 851712   ;;  %vm4502_vm4 = vcmask 917312  }
 0x38e   :  { %v2734_v31 = vpop.xlane.xlu0 %2733  ;;  %vm4509_vm5 = vcmask 982912   ;;  %vm4516_vm6 = vcmask 1048512  }
 0x38f   :  { %v4350_v4 = vsub.f32 1.0, %v2734_v31  ;;  %v4379_v38 = vmax.f32 %v4363_v18, 0.0  ;;  %v4472_v18 = vsub.s32 %v4469_v56, %v6899_v53 }
 0x390   :  { %v4312_v27 = vpop.xlane.xlu1 %4311 }
 0x391   :  { %v4364_v35 = vadd.f32 %v4348_v36, %v4312_v27 }
 0x392   :  { %v2737_v23 = vpop.xlane.xlu0 %2736 }
 0x393   :  { %v4351_v26 = vsub.f32 1.0, %v2737_v23  ;;  %v4380_v52 = vmax.f32 %v4364_v35, 0.0  ;;  %v4423_v23 = vsub.s32 %v4420_v30, %v6899_v53  ;;  %v4497_v35 = vadd.s32 4294967192, %v6886_v0 }
 0x394   :  { %v4315_v42 = vpop.xlane.xlu1 %4314 }
 0x395   :  { %v4365_v20 = vadd.f32 %v4349_v55, %v4315_v42  ;;  %v4424_v10 = vrot.slane %v4377_v17, %v4423_v23  ;;  %v4504_v17 = vadd.s32 4294967184, %v6886_v0 }
 0x396   :  { %v2740_v54 = vpop.xlane.xlu0 %2739 }
 0x397   :  { %v4352_v19 = vsub.f32 1.0, %v2740_v54  ;;  %v4381_v11 = vmax.f32 %v4365_v20, 0.0  ;;  %v4437_v54 = vsub.s32 %v4434_v60, %v6899_v53 }
 0x398   :  { %v4318_v62 = vpop.xlane.xlu1 %4317 }
 0x399   :  { %v6888_v14 = vadd.f32 %v4350_v4, %v4318_v62  ;;  %v4430_v62 = vsub.s32 %v4427_v43, %v6899_v53  ;;  %v4438_v50 = vrot.slane %v4379_v38, %v4437_v54  ;;  %v4483_v4 = vadd.s32 4294967208, %v6886_v0 }
 0x39a   :  { %v2743_v34 = vpop.xlane.xlu0 %2742 }
 0x39b   :  { %v4353_v33 = vsub.f32 1.0, %v2743_v34  ;;  %v4382_v1 = vmax.f32 %v6888_v14, 0.0  ;;  %v4451_v34 = vsub.s32 %v4448_v21, %v6899_v53  ;;  %v4431_v9 = vrot.slane %v4378_v37, %v4430_v62 }
 0x39c   :  { %v4321_v48 = vpop.xlane.xlu1 %4320 }
 0x39d   :  { %v6893_v41 = vadd.f32 %v4351_v26, %v4321_v48  ;;  %v4444_v48 = vsub.s32 %v4441_v51, %v6899_v53  ;;  %v4452_v55 = vrot.slane %v4381_v11, %v4451_v34 }
 0x39e   :  { %v2746_v6 = vpop.xlane.xlu0 %2745 }
 0x39f   :  { %v4354_v16 = vsub.f32 1.0, %v2746_v6  ;;  %v4383_v7 = vmax.f32 %v6893_v41, 0.0  ;;  %v4417_v6 = vrot.slane %v4376_v2, %v4416_v58  ;;  %v4445_v36 = vrot.slane %v4380_v52, %v4444_v48 }
 0x3a0   :  { %v4324_v29 = vpop.xlane.xlu1 %4323  ;;  %v4486_v41 = vsub.s32 %v4483_v4, %v6899_v53  ;;  %v4500_v52 = vsub.s32 %v4497_v35, %v6899_v53 }
 0x3a1   :  { %v6895_v32 = vadd.f32 %v4352_v19, %v4324_v29  ;;  %v4412_v29 = vrot.slane %v4375_v22, %v4411_v40 }
 0x3a2   :  { %v6884_v8 = vpop.xlane.xlu0 %2748 }
 0x3a3   :  { %v4355_v13 = vsub.f32 1.0, %v6884_v8  ;;  %v4384_v59 = vmax.f32 %v6895_v32, 0.0  ;;  %v4462_v8 = vadd.s32 4294967232, %v6886_v0  ;;  %v4419_v19 = vsel %vm4418_vm8, %v4417_v6, %v4412_v29 }
 0x3a4   :  { %v4327_v5 = vpop.xlane.xlu1 %4326  ;;  %v4426_v14 = vsel %vm4425_vm9, %v4424_v10, %v4419_v19 }
 0x3a5   :  { %v6897_v47 = vadd.f32 %v4353_v33, %v4327_v5  ;;  %v4458_v5 = vsub.s32 %v4455_v45, %v6899_v53  ;;  %v4465_v46 = vsub.s32 %v4462_v8, %v6899_v53  ;;  %v4490_v33 = vadd.s32 4294967200, %v6886_v0 }
 0x3a6   :  { %v6890_v44 = vpop.xlane.xlu0 %2751  ;;  %v4473_v38 = vrot.slane %v4384_v59, %v4472_v18  ;;  %v4507_v59 = vsub.s32 %v4504_v17, %v6899_v53 }
 0x3a7   :  { %v4356_v25 = vsub.f32 1.0, %v6890_v44  ;;  %v4385_v27 = vmax.f32 %v6897_v47, 0.0  ;;  %v4459_v3 = vrot.slane %v4382_v1, %v4458_v5  ;;  %v4511_v47 = vadd.s32 4294967176, %v6886_v0 }
 0x3a8   :  { %v4330_v28 = vpop.xlane.xlu1 %4329  ;;  %v4466_v2 = vrot.slane %v4383_v7, %v4465_v46 }
 0x3a9   :  { %v6903_v63 = vadd.f32 %v4354_v16, %v4330_v28  ;;  %v4476_v28 = vadd.s32 4294967216, %v6886_v0  ;;  %v4514_v0 = vsub.s32 %v4511_v47, %v6899_v53 }
 0x3ab   :  { %v4386_v42 = vmax.f32 %v6903_v63, 0.0  ;;  %v4479_v44 = vsub.s32 %v4476_v28, %v6899_v53 }
 0x3ac   :  { %v4333_v15 = vpop.xlane.xlu1 %4332 }
 0x3ad   :  { %v4371_v39 = vadd.f32 %v4355_v13, %v4333_v15  ;;  %v4433_v13 = vsel %vm4432_vm10, %v4431_v9, %v4426_v14  ;;  %v4493_v15 = vsub.s32 %v4490_v33, %v6899_v53  ;;  %v4480_v63 = vrot.slane %v4385_v27, %v4479_v44 }
 0x3ae   :  { %v4440_v22 = vsel %vm4439_vm11, %v4438_v50, %v4433_v13  ;;  %v4487_v60 = vrot.slane %v4386_v42, %v4486_v41 }
 0x3af   :  { %v4387_v20 = vmax.f32 %v4371_v39, 0.0  ;;  %v4447_v57 = vsel %vm4446_vm12, %v4445_v36, %v4440_v22 }
 0x3b0   :  { %v4454_v1 = vsel %vm4453_vm13, %v4452_v55, %v4447_v57 }
 0x3b1   :  { %v4461_v43 = vsel %vm4460_vm14, %v4459_v3, %v4454_v1  ;;  %v4494_v32 = vrot.slane %v4387_v20, %v4493_v15 }
 0x3b2   :  { %v4468_v21 = vsel %vm4467_vm15, %v4466_v2, %v4461_v43 }
 0x3b7   :  { %v6912_v12 = vpop.xlane.xlu0 %2754 }
 0x3b8   :  { %v4357_v11 = vsub.f32 1.0, %v6912_v12 }
 0x3cb   :  { %v4336_v31 = vpop.xlane.xlu1 %4335 }
 0x3cc   :  { %v4372_v24 = vadd.f32 %v4356_v25, %v4336_v31  ;;  %v4475_v25 = vsel %vm4474_vm0, %v4473_v38, %v4468_v21 }
 0x3cd   :  { %v4482_v58 = vsel %vm4481_vm1, %v4480_v63, %v4475_v25 }
 0x3ce   :  { %v4388_v37 = vmax.f32 %v4372_v24, 0.0  ;;  %v4489_v45 = vsel %vm4488_vm2, %v4487_v60, %v4482_v58 }
 0x3cf   :  { %v4496_v31 = vsel %vm4495_vm3, %v4494_v32, %v4489_v45 }
 0x3d0   :  { %v4501_v12 = vrot.slane %v4388_v37, %v4500_v52 }
 0x3d2   :  { %v4503_v23 = vsel %vm4502_vm4, %v4501_v12, %v4496_v31 }
 0x3ef   :  { %v2758_v49 = vpop.xlane.xlu0 %2757 }
 0x3f0   :  { %v4358_v61 = vsub.f32 1.0, %v2758_v49 }
 0x403   :  { %v4342_v26 = vpop.xlane.xlu1 %4341 }
 0x404   :  { %v4374_v16 = vadd.f32 %v4358_v61, %v4342_v26 }
 0x406   :  { %v4390_v7 = vmax.f32 %v4374_v16, 0.0 }
 0x408   :  { %v4515_v27 = vrot.slane %v4390_v7, %v4514_v0 }
 0x417   :  { %v4339_v30 = vpop.xlane.xlu0 %4338 }
 0x418   :  { %v4373_v51 = vadd.f32 %v4357_v11, %v4339_v30 }
 0x41a   :  { %v4389_v40 = vmax.f32 %v4373_v51, 0.0 }
 0x41c   :  { %v4508_v42 = vrot.slane %v4389_v40, %v4507_v59 }
 0x41e   :  { %v4510_v62 = vsel %vm4509_vm5, %v4508_v42, %v4503_v23 }
 0x41f   :  { %v4517_v53 = vsel %vm4516_vm6, %v4515_v27, %v4510_v62 }
 0x420   :  { %4519 = vst [vmem:[#allocation2] sm:$0x1] %v4517_v53 }
 0x421   :  { %4546 = shalt.err (!%p4543_p4)
}
 0x422   :  { %s4547_s25 = scalar_lea.hbm %s6972_s3, 16 }
 0x423   :  { %p4548_p5 = scmp.ne.s32.totalorder %s6972_s3, %s4547_s25  ;;  %p4551_p6 = scmp.lt.u32.totalorder %s4547_s25, %s6972_s3 }
 0x425   :  { %p4553_p7 = pnand %p4551_p6, %p4548_p5 }
 0x427   :  { %4556 = shalt.err (!%p4553_p7)
}
 0x428   :  { %4529 = dma.vmem_to_hbm [thread:$0]  %s4527_s20, 16, %s6972_s3, [#allocation3]  }
 0x429   :  { %4557 = dma.done.wait [#allocation3], 16  }
 0x42a   :  { %4558 = vsyncadd [#allocation3], 4294967280 }
 0x42b   :  { %4533 = vsyncpa [#allocation3], 1 }

</bundles_post_ra>
